<compile_context>
chip_gen: v7x
topology: tpu7x:2x2x1
jax: 0.10.0
libtpu: 0.0.40
codegen_flags: <defaults>
</compile_context>

<pallas_src>
import numpy as np
import jax
import jax.numpy as jnp
from jax.experimental import pallas as pl
from jax.experimental.pallas import tpu as pltpu


def _round_up(x, m):
    return ((x + m - 1) // m) * m


# -----------------------------------------------------------------------------
# Deterministic parameter construction (host-side numpy, fast + reproducible)
# -----------------------------------------------------------------------------
def make_conv(rng, out_c, in_c, kh, kw):
    fan_in = in_c * kh * kw
    w = rng.standard_normal((out_c, in_c, kh, kw)).astype(np.float32) * np.sqrt(2.0 / fan_in)
    return jnp.asarray(w)


def make_bn(rng, c):
    gamma = (1.0 + 0.1 * rng.standard_normal(c)).astype(np.float32)
    beta = (0.1 * rng.standard_normal(c)).astype(np.float32)
    mean = (0.1 * rng.standard_normal(c)).astype(np.float32)
    var = (1.0 + 0.1 * rng.uniform(size=c)).astype(np.float32)
    return (jnp.asarray(gamma), jnp.asarray(beta), jnp.asarray(mean), jnp.asarray(var))


def make_linear_np(rng, in_f, out_f):
    bound = 1.0 / np.sqrt(in_f)
    w = rng.uniform(-bound, bound, (in_f, out_f)).astype(np.float32)  # (in, out)
    b = rng.uniform(-bound, bound, (out_f,)).astype(np.float32)
    return w, b


# -----------------------------------------------------------------------------
# ResNet50 backbone (plain JAX, NCHW, inference-mode BN)
# -----------------------------------------------------------------------------
def conv2d(x, w, stride=1, padding=0):
    return jax.lax.conv_general_dilated(
        x, w, window_strides=(stride, stride),
        padding=((padding, padding), (padding, padding)),
        dimension_numbers=('NCHW', 'OIHW', 'NCHW'))


def bn_infer(x, p, eps=1e-5):
    gamma, beta, mean, var = p
    scale = gamma / jnp.sqrt(var + eps)
    bias = beta - mean * scale
    return x * scale[None, :, None, None] + bias[None, :, None, None]


def maxpool3x3s2(x):
    return jax.lax.reduce_window(
        x, -jnp.inf, jax.lax.max,
        window_dimensions=(1, 1, 3, 3), window_strides=(1, 1, 2, 2),
        padding=((0, 0), (0, 0), (1, 1), (1, 1)))


def make_bottleneck(rng, in_c, planes, stride, downsample):
    p = {
        'conv1': make_conv(rng, planes, in_c, 1, 1), 'bn1': make_bn(rng, planes),
        'conv2': make_conv(rng, planes, planes, 3, 3), 'bn2': make_bn(rng, planes),
        'conv3': make_conv(rng, planes * 4, planes, 1, 1), 'bn3': make_bn(rng, planes * 4),
        'stride': stride,
    }
    if downsample:
        p['down_conv'] = make_conv(rng, planes * 4, in_c, 1, 1)
        p['down_bn'] = make_bn(rng, planes * 4)
    return p


def bottleneck_fwd(x, p):
    identity = x
    out = jax.nn.relu(bn_infer(conv2d(x, p['conv1']), p['bn1']))
    out = jax.nn.relu(bn_infer(conv2d(out, p['conv2'], stride=p['stride'], padding=1), p['bn2']))
    out = bn_infer(conv2d(out, p['conv3']), p['bn3'])
    if 'down_conv' in p:
        identity = bn_infer(conv2d(x, p['down_conv'], stride=p['stride']), p['down_bn'])
    return jax.nn.relu(out + identity)


def make_resnet50(rng):
    params = {
        'conv1': make_conv(rng, 64, 3, 7, 7),
        'bn1': make_bn(rng, 64),
        'layers': [],
    }
    cfg = [(64, 3, 1), (128, 4, 2), (256, 6, 2), (512, 3, 2)]
    in_c = 64
    for planes, n_blocks, stride in cfg:
        blocks = []
        for b in range(n_blocks):
            s = stride if b == 0 else 1
            downsample = (b == 0)
            blocks.append(make_bottleneck(rng, in_c, planes, s, downsample))
            in_c = planes * 4
        params['layers'].append(blocks)
    return params


def resnet50_features(x, params):
    # x: (B, 3, H, W) NCHW -> (B, 2048, H/32, W/32)
    h = jax.nn.relu(bn_infer(conv2d(x, params['conv1'], stride=2, padding=3), params['bn1']))
    h = maxpool3x3s2(h)
    for blocks in params['layers']:
        for blk in blocks:
            h = bottleneck_fwd(h, blk)
    return h


# -----------------------------------------------------------------------------
# Pallas kernel: shared_fc (BN folded into bf16 weights) + age_head + clamp
# -----------------------------------------------------------------------------
def head_kernel(pooled_ref, w1_ref, b1_ref, w2_ref, b2_ref, w3_ref, b3_ref,
                w4_ref, b4_ref, out_ref):
    # pooled_ref: (Bt, 2048) bf16 — global average pool + bf16 cast done in the wrapper.
    pooled = pooled_ref[...]

    # Linear(2048,1024) + BatchNorm1d(1024) (scale folded into bf16 weights, f32 bias), ReLU
    h1 = jnp.dot(pooled, w1_ref[...], preferred_element_type=jnp.float32) + b1_ref[...]
    h1 = jnp.maximum(h1, 0.0)
    # Dropout(0.4): identity in eval mode

    # Linear(1024,512) + BatchNorm1d(512) folded, ReLU
    h2 = jnp.dot(h1.astype(jnp.bfloat16), w2_ref[...],
                 preferred_element_type=jnp.float32) + b2_ref[...]
    h2 = jnp.maximum(h2, 0.0)

    # age_head: Linear(512,128) + ReLU
    h3 = jnp.dot(h2.astype(jnp.bfloat16), w3_ref[...],
                 preferred_element_type=jnp.float32) + b3_ref[...]
    h3 = jnp.maximum(h3, 0.0)

    # Linear(128,1): VPU multiply + lane reduce instead of an N=1 MXU pass
    age = jnp.sum(h3 * w4_ref[...], axis=-1, keepdims=True) + b4_ref[...]

    out_ref[...] = jnp.clip(age, 0.0, 100.0)      # torch.clamp(age, 0, 100)


def age_head_pallas(pooled_bf16, head_params):
    B = pooled_bf16.shape[0]
    # Adaptive batch tile: pad only to the bf16 sublane pack (16), cap tile at 128.
    b_pad = _round_up(B, 16)
    b_tile = min(128, b_pad)
    b_pad = _round_up(b_pad, b_tile)
    if b_pad != B:
        pooled_bf16 = jnp.pad(pooled_bf16, ((0, b_pad - B), (0, 0)))

    w1, b1, w2, b2, w3, b3, w4, b4 = head_params

    # Weights/biases never change across grid steps: constant index_map + single buffer.
    def const_spec(shape):
        return pl.BlockSpec(shape, lambda i: (0, 0), pipeline_mode=pl.Buffered(1))

    # advisory cost estimate: kernel is dominated by the bf16 weight stream
    weight_bytes = (2 * (w1.size + w2.size + w3.size)
                    + 4 * (b1.size + b2.size + b3.size + w4.size + b4.size))
    bytes_accessed = int(weight_bytes + b_pad * 2048 * 2 + b_pad * 4)
    flops = int(2 * b_pad * (2048 * 1024 + 1024 * 512 + 512 * 128 + 128))

    out = pl.pallas_call(
        head_kernel,
        out_shape=jax.ShapeDtypeStruct((b_pad, 1), jnp.float32),
        grid_spec=pltpu.PrefetchScalarGridSpec(
            num_scalar_prefetch=0,
            grid=(b_pad // b_tile,),
            in_specs=[
                pl.BlockSpec((b_tile, 2048), lambda i: (i, 0)),   # bf16 activations, tiled over batch
                const_spec((2048, 1024)),                          # resident bf16 weights
                const_spec((1, 1024)),
                const_spec((1024, 512)),
                const_spec((1, 512)),
                const_spec((512, 128)),
                const_spec((1, 128)),
                const_spec((1, 128)),
                const_spec((1, 1)),
            ],
            out_specs=pl.BlockSpec((b_tile, 1), lambda i: (i, 0)),
        ),
        compiler_params=pltpu.CompilerParams(
            dimension_semantics=("parallel",),        # batch axis shards across v7x's 2 TCs when grid > 1
            vmem_limit_bytes=24 * 1024 * 1024,        # ~5.2 MiB single-buffered bf16 weights + act tiles
        ),
        cost_estimate=pl.CostEstimate(flops=flops, transcendentals=0,
                                      bytes_accessed=bytes_accessed),
    )(pooled_bf16, w1, b1, w2, b2, w3, b3, w4, b4)
    return out[:B]


# -----------------------------------------------------------------------------
# Head parameters (Linear + BatchNorm1d folded into bf16 weights / f32 bias)
# -----------------------------------------------------------------------------
def make_head_params(rng):
    def bn_np(c):
        gamma = (1.0 + 0.1 * rng.standard_normal(c)).astype(np.float32)
        beta = (0.1 * rng.standard_normal(c)).astype(np.float32)
        mean = (0.1 * rng.standard_normal(c)).astype(np.float32)
        var = (1.0 + 0.1 * rng.uniform(size=c)).astype(np.float32)
        return gamma, beta, mean, var

    def folded_linear_bn_bf16(in_f, out_f):
        w, b = make_linear_np(rng, in_f, out_f)
        gamma, beta, mean, var = bn_np(out_f)
        scale = gamma / np.sqrt(var + 1e-5)          # BN fold: y = x@(W*scale) + ((b-mean)*scale+beta)
        w_folded = jnp.asarray(w * scale[None, :]).astype(jnp.bfloat16)
        bias = jnp.asarray(((b - mean) * scale + beta).reshape(1, out_f).astype(np.float32))
        return w_folded, bias

    w1, b1 = folded_linear_bn_bf16(2048, 1024)
    w2, b2 = folded_linear_bn_bf16(1024, 512)
    w3_np, b3_np = make_linear_np(rng, 512, 128)
    w4_np, b4_np = make_linear_np(rng, 128, 1)
    return (w1, b1, w2, b2,
            jnp.asarray(w3_np).astype(jnp.bfloat16), jnp.asarray(b3_np.reshape(1, 128)),
            jnp.asarray(w4_np.reshape(1, 128)),       # f32 row vector for VPU mul + lane reduce
            jnp.asarray(b4_np.reshape(1, 1)))


# -----------------------------------------------------------------------------
# Full model forward
# -----------------------------------------------------------------------------
def multitask_forward(x, backbone_params, head_params):
    feat = resnet50_features(x, backbone_params)                   # (B, 2048, h, w) NCHW
    pooled = jnp.mean(feat, axis=(2, 3)).astype(jnp.bfloat16)      # fused XLA spatial mean + bf16 cast
    return age_head_pallas(pooled, head_params)                    # (B, 1) in [0, 100]


if __name__ == "__main__":
    rng = np.random.default_rng(0)
    backbone_params = make_resnet50(rng)
    head_params = make_head_params(rng)

    x = jax.random.normal(jax.random.PRNGKey(0), (2, 3, 64, 64), jnp.float32)  # NCHW, like PyTorch

    fwd = jax.jit(lambda inp: multitask_forward(inp, backbone_params, head_params))
    age = fwd(x)
    jax.block_until_ready(age)

    assert age.shape == (2, 1)
    assert bool(jnp.all(jnp.isfinite(age)))
    assert bool(jnp.all((age >= 0.0) & (age <= 100.0)))
    print("KERNEL_OK")
</pallas_src>

<mosaic_0001>
module attributes {stable_mosaic.version = 11 : i64} {
  func.func @head_kernel(%arg0: i32, %arg1: memref<16x2048xbf16, #tpu.memory_space<vmem>>, %arg2: memref<2048x1024xbf16, #tpu.memory_space<vmem>>, %arg3: memref<1x1024xf32, #tpu.memory_space<vmem>>, %arg4: memref<1024x512xbf16, #tpu.memory_space<vmem>>, %arg5: memref<1x512xf32, #tpu.memory_space<vmem>>, %arg6: memref<512x128xbf16, #tpu.memory_space<vmem>>, %arg7: memref<1x128xf32, #tpu.memory_space<vmem>>, %arg8: memref<1x128xf32, #tpu.memory_space<vmem>>, %arg9: memref<1x1xf32, #tpu.memory_space<vmem>>, %arg10: memref<16x1xf32, #tpu.memory_space<vmem>>) attributes {dimension_semantics = [#tpu.dimension_semantics<parallel>], iteration_bounds = array<i64: 1>, scalar_prefetch = 0 : i64, scratch_operands = 0 : i64, tpu.core_type = #tpu.core_type<tc>, window_params = [{transform_indices = @transform_0, window_bounds = array<i64: 16, 2048>}, {pipeline_mode = #tpu.pipeline_mode<synchronous>, transform_indices = @transform_1, window_bounds = array<i64: 2048, 1024>}, {pipeline_mode = #tpu.pipeline_mode<synchronous>, transform_indices = @transform_2, window_bounds = array<i64: 1, 1024>}, {pipeline_mode = #tpu.pipeline_mode<synchronous>, transform_indices = @transform_3, window_bounds = array<i64: 1024, 512>}, {pipeline_mode = #tpu.pipeline_mode<synchronous>, transform_indices = @transform_4, window_bounds = array<i64: 1, 512>}, {pipeline_mode = #tpu.pipeline_mode<synchronous>, transform_indices = @transform_5, window_bounds = array<i64: 512, 128>}, {pipeline_mode = #tpu.pipeline_mode<synchronous>, transform_indices = @transform_6, window_bounds = array<i64: 1, 128>}, {pipeline_mode = #tpu.pipeline_mode<synchronous>, transform_indices = @transform_7, window_bounds = array<i64: 1, 128>}, {pipeline_mode = #tpu.pipeline_mode<synchronous>, transform_indices = @transform_8, window_bounds = array<i64: 1, 1>}, {transform_indices = @transform_9, window_bounds = array<i64: 16, 1>}]} {
    %c0 = arith.constant 0 : index
    %c0_0 = arith.constant 0 : index
    %0 = vector.load %arg1[%c0, %c0_0] : memref<16x2048xbf16, #tpu.memory_space<vmem>>, vector<16x2048xbf16>
    %c0_1 = arith.constant 0 : index
    %c0_2 = arith.constant 0 : index
    %1 = vector.load %arg2[%c0_1, %c0_2] : memref<2048x1024xbf16, #tpu.memory_space<vmem>>, vector<2048x1024xbf16>
    %cst = arith.constant dense<0.000000e+00> : vector<16x1024xf32>
    %2 = tpu.matmul %0, %1, %cst {dimension_numbers = #tpu.dot_dimension_numbers<[1], [0], [0], [1], [0, 0, 1, 1], [], []>} : vector<16x2048xbf16>, vector<2048x1024xbf16>, vector<16x1024xf32> -> vector<16x1024xf32>
    %c0_3 = arith.constant 0 : index
    %c0_4 = arith.constant 0 : index
    %3 = vector.load %arg3[%c0_3, %c0_4] : memref<1x1024xf32, #tpu.memory_space<vmem>>, vector<1x1024xf32>
    %4 = vector.broadcast %3 : vector<1x1024xf32> to vector<16x1024xf32>
    %5 = arith.addf %2, %4 : vector<16x1024xf32>
    %cst_5 = arith.constant 0.000000e+00 : f32
    %6 = vector.broadcast %cst_5 : f32 to vector<16x1024xf32>
    %7 = arith.maximumf %5, %6 : vector<16x1024xf32>
    %8 = arith.truncf %7 : vector<16x1024xf32> to vector<16x1024xbf16>
    %c0_6 = arith.constant 0 : index
    %c0_7 = arith.constant 0 : index
    %9 = vector.load %arg4[%c0_6, %c0_7] : memref<1024x512xbf16, #tpu.memory_space<vmem>>, vector<1024x512xbf16>
    %cst_8 = arith.constant dense<0.000000e+00> : vector<16x512xf32>
    %10 = tpu.matmul %8, %9, %cst_8 {dimension_numbers = #tpu.dot_dimension_numbers<[1], [0], [0], [1], [0, 0, 1, 1], [], []>} : vector<16x1024xbf16>, vector<1024x512xbf16>, vector<16x512xf32> -> vector<16x512xf32>
    %c0_9 = arith.constant 0 : index
    %c0_10 = arith.constant 0 : index
    %11 = vector.load %arg5[%c0_9, %c0_10] : memref<1x512xf32, #tpu.memory_space<vmem>>, vector<1x512xf32>
    %12 = vector.broadcast %11 : vector<1x512xf32> to vector<16x512xf32>
    %13 = arith.addf %10, %12 : vector<16x512xf32>
    %cst_11 = arith.constant 0.000000e+00 : f32
    %14 = vector.broadcast %cst_11 : f32 to vector<16x512xf32>
    %15 = arith.maximumf %13, %14 : vector<16x512xf32>
    %16 = arith.truncf %15 : vector<16x512xf32> to vector<16x512xbf16>
    %c0_12 = arith.constant 0 : index
    %c0_13 = arith.constant 0 : index
    %17 = vector.load %arg6[%c0_12, %c0_13] : memref<512x128xbf16, #tpu.memory_space<vmem>>, vector<512x128xbf16>
    %cst_14 = arith.constant dense<0.000000e+00> : vector<16x128xf32>
    %18 = tpu.matmul %16, %17, %cst_14 {dimension_numbers = #tpu.dot_dimension_numbers<[1], [0], [0], [1], [0, 0, 1, 1], [], []>} : vector<16x512xbf16>, vector<512x128xbf16>, vector<16x128xf32> -> vector<16x128xf32>
    %c0_15 = arith.constant 0 : index
    %c0_16 = arith.constant 0 : index
    %19 = vector.load %arg7[%c0_15, %c0_16] : memref<1x128xf32, #tpu.memory_space<vmem>>, vector<1x128xf32>
    %20 = vector.broadcast %19 : vector<1x128xf32> to vector<16x128xf32>
    %21 = arith.addf %18, %20 : vector<16x128xf32>
    %cst_17 = arith.constant 0.000000e+00 : f32
    %22 = vector.broadcast %cst_17 : f32 to vector<16x128xf32>
    %23 = arith.maximumf %21, %22 : vector<16x128xf32>
    %c0_18 = arith.constant 0 : index
    %c0_19 = arith.constant 0 : index
    %24 = vector.load %arg8[%c0_18, %c0_19] : memref<1x128xf32, #tpu.memory_space<vmem>>, vector<1x128xf32>
    %25 = vector.broadcast %24 : vector<1x128xf32> to vector<16x128xf32>
    %26 = arith.mulf %23, %25 : vector<16x128xf32>
    %cst_20 = arith.constant dense<0.000000e+00> : vector<16xf32>
    %27 = vector.multi_reduction <add>, %26, %cst_20 [1] : vector<16x128xf32> to vector<16xf32>
    %28 = vector.shape_cast %27 : vector<16xf32> to vector<16x1xf32>
    %c0_21 = arith.constant 0 : index
    %c0_22 = arith.constant 0 : index
    %29 = vector.load %arg9[%c0_21, %c0_22] : memref<1x1xf32, #tpu.memory_space<vmem>>, vector<1x1xf32>
    %30 = vector.broadcast %29 : vector<1x1xf32> to vector<16x1xf32>
    %31 = arith.addf %28, %30 : vector<16x1xf32>
    %cst_23 = arith.constant 0.000000e+00 : f32
    %cst_24 = arith.constant 1.000000e+02 : f32
    %32 = vector.broadcast %cst_23 : f32 to vector<16x1xf32>
    %33 = arith.maximumf %32, %31 : vector<16x1xf32>
    %34 = vector.broadcast %cst_24 : f32 to vector<16x1xf32>
    %35 = arith.minimumf %34, %33 : vector<16x1xf32>
    %c0_25 = arith.constant 0 : index
    %c0_26 = arith.constant 0 : index
    %36 = vector.load %arg10[%c0_25, %c0_26] : memref<16x1xf32, #tpu.memory_space<vmem>>, vector<16x1xf32>
    tpu.vector_store %arg10[%c0_25, %c0_26], %35 {strides = array<i32>} : memref<16x1xf32, #tpu.memory_space<vmem>>, vector<16x1xf32>,
    return
  }
  func.func @transform_0(%arg0: i32) -> (i32, i32) {
    %c0_i32 = arith.constant 0 : i32
    %c0_i32_0 = arith.constant 0 : i32
    return %arg0, %c0_i32 : i32, i32
  }
  func.func @transform_1(%arg0: i32) -> (i32, i32) {
    %c0_i32 = arith.constant 0 : i32
    %c0_i32_0 = arith.constant 0 : i32
    %c0_i32_1 = arith.constant 0 : i32
    return %c0_i32, %c0_i32_0 : i32, i32
  }
  func.func @transform_2(%arg0: i32) -> (i32, i32) {
    %c0_i32 = arith.constant 0 : i32
    %c0_i32_0 = arith.constant 0 : i32
    %c0_i32_1 = arith.constant 0 : i32
    return %c0_i32, %c0_i32_0 : i32, i32
  }
  func.func @transform_3(%arg0: i32) -> (i32, i32) {
    %c0_i32 = arith.constant 0 : i32
    %c0_i32_0 = arith.constant 0 : i32
    %c0_i32_1 = arith.constant 0 : i32
    return %c0_i32, %c0_i32_0 : i32, i32
  }
  func.func @transform_4(%arg0: i32) -> (i32, i32) {
    %c0_i32 = arith.constant 0 : i32
    %c0_i32_0 = arith.constant 0 : i32
    %c0_i32_1 = arith.constant 0 : i32
    return %c0_i32, %c0_i32_0 : i32, i32
  }
  func.func @transform_5(%arg0: i32) -> (i32, i32) {
    %c0_i32 = arith.constant 0 : i32
    %c0_i32_0 = arith.constant 0 : i32
    %c0_i32_1 = arith.constant 0 : i32
    return %c0_i32, %c0_i32_0 : i32, i32
  }
  func.func @transform_6(%arg0: i32) -> (i32, i32) {
    %c0_i32 = arith.constant 0 : i32
    %c0_i32_0 = arith.constant 0 : i32
    %c0_i32_1 = arith.constant 0 : i32
    return %c0_i32, %c0_i32_0 : i32, i32
  }
  func.func @transform_7(%arg0: i32) -> (i32, i32) {
    %c0_i32 = arith.constant 0 : i32
    %c0_i32_0 = arith.constant 0 : i32
    %c0_i32_1 = arith.constant 0 : i32
    return %c0_i32, %c0_i32_0 : i32, i32
  }
  func.func @transform_8(%arg0: i32) -> (i32, i32) {
    %c0_i32 = arith.constant 0 : i32
    %c0_i32_0 = arith.constant 0 : i32
    %c0_i32_1 = arith.constant 0 : i32
    return %c0_i32, %c0_i32_0 : i32, i32
  }
  func.func @transform_9(%arg0: i32) -> (i32, i32) {
    %c0_i32 = arith.constant 0 : i32
    %c0_i32_0 = arith.constant 0 : i32
    return %arg0, %c0_i32 : i32, i32
  }
}

</mosaic_0001>

<bundles_post_ra>
// kernel: _lambda_.1
= control target key start
LH: loop header
LB: loop body
LE: loop exit
PB: predicated region body
PF: predicated region fallthrough
CT: control target
= control target key end

     0   :  { %vm10004_vm0 = vcmask 7168   ;;  %s16227_s1 = inlined_call_operand.vmem [shape: bf16[2048,1024], index: 1, kind: input, shape index: {}]   ;;  %s16228_s0 = inlined_call_operand.vmem [shape: bf16[16,2048], index: 0, kind: input, shape index: {}]   ;;  %s16229_s2 = inlined_call_operand.vmem [shape: f32[1,1024], index: 2, kind: input, shape index: {}]   ;;  %s16230_s3 = inlined_call_operand.vmem [shape: bf16[1024,512], index: 3, kind: input, shape index: {}]   ;;  %s16231_s5 = inlined_call_operand.vmem [shape: bf16[512,128], index: 5, kind: input, shape index: {}]   ;;  %s16232_s4 = inlined_call_operand.vmem [shape: f32[1,512], index: 4, kind: input, shape index: {}]   ;;  %s16233_s8 = inlined_call_operand.<no memory space> [shape: f32[1,1], index: 8, kind: input, shape index: {}]   ;;  %s16234_s6 = inlined_call_operand.vmem [shape: f32[1,128], index: 6, kind: input, shape index: {}]   ;;  %s16235_s7 = inlined_call_operand.vmem [shape: f32[1,128], index: 7, kind: input, shape index: {}]   ;;  %s16236_s9 = inlined_call_operand.vmem [shape: f32[16,1], index: 9, kind: output, shape index: {}]  }
   0x1   :  { %v51_v0 = vld [vmem:[%s16227_s1] sm:$0xff]  ;;  %v52_v2 = vld [vmem:[%s16227_s1 + $0x8] sm:$0xff] }
   0x2   :  { %v55_v1 = vld [vmem:[%s16227_s1 + $0x20] sm:$0xff]  ;;  %v56_v4 = vld [vmem:[%s16227_s1 + $0x28] sm:$0xff] }
   0x3   :  { %v10028_v3 = vcombine.high %v51_v0, %v55_v1  ;;  %v10027_v5 = vcombine.low %v51_v0, %v55_v1  ;;  %v59_v6 = vld [vmem:[%s16227_s1 + $0x40] sm:$0xff]  ;;  %v10030_v8 = vcombine.high %v52_v2, %v56_v4  ;;  %v10029_v9 = vcombine.low %v52_v2, %v56_v4  ;;  %v60_v11 = vld [vmem:[%s16227_s1 + $0x48] sm:$0xff] }
   0x4   :  { %v63_v7 = vld [vmem:[%s16227_s1 + $0x60] sm:$0xff]  ;;  %v64_v12 = vld [vmem:[%s16227_s1 + $0x68] sm:$0xff] }
   0x5   :  { %v10036_v10 = vcombine.high %v59_v6, %v63_v7  ;;  %v67_v13 = vld [vmem:[%s16227_s1 + $0x80] sm:$0xff]  ;;  %6317 = vmatprep.subr.bf16.mxu0 %v10028_v3  ;;  %v10038_v14 = vcombine.high %v60_v11, %v64_v12  ;;  %v68_v16 = vld [vmem:[%s16227_s1 + $0x88] sm:$0xff]  ;;  %6661 = vmatprep.subr.bf16.mxu1 %v10030_v8  ;;  %v10035_v18 = vcombine.low %v59_v6, %v63_v7 }
   0x6   :  { %v71_v15 = vld [vmem:[%s16227_s1 + $0xa0] sm:$0xff]  ;;  %v72_v17 = vld [vmem:[%s16227_s1 + $0xa8] sm:$0xff]  ;;  %6318 = vmatpush1.bf16.msra.mxu0 %v10027_v5  ;;  %6662 = vmatpush1.bf16.msra.mxu1 %v10029_v9  ;;  %v10037_v19 = vcombine.low %v60_v11, %v64_v12 }
   0x7   :  { %6319 = vmatprep.subr.bf16.mxu0 %v10036_v10  ;;  %v10044_v20 = vcombine.high %v67_v13, %v71_v15  ;;  %6663 = vmatprep.subr.bf16.mxu1 %v10038_v14  ;;  %v10046_v21 = vcombine.high %v68_v16, %v72_v17  ;;  %v75_v22 = vld [vmem:[%s16227_s1 + $0xc0] sm:$0xff]  ;;  %v76_v24 = vld [vmem:[%s16227_s1 + $0xc8] sm:$0xff]  ;;  %v10043_v26 = vcombine.low %v67_v13, %v71_v15 }
   0x8   :  { %v79_v23 = vld [vmem:[%s16227_s1 + $0xe0] sm:$0xff]  ;;  %v80_v25 = vld [vmem:[%s16227_s1 + $0xe8] sm:$0xff]  ;;  %v10045_v27 = vcombine.low %v68_v16, %v72_v17 }
   0x9   :  { %v10052_v28 = vcombine.high %v75_v22, %v79_v23  ;;  %v10054_v29 = vcombine.high %v76_v24, %v80_v25  ;;  %v83_v30 = vld [vmem:[%s16227_s1 + $0x100] sm:$0xff]  ;;  %v84_v32 = vld [vmem:[%s16227_s1 + $0x108] sm:$0xff]  ;;  %v10051_v34 = vcombine.low %v75_v22, %v79_v23  ;;  %v10053_v35 = vcombine.low %v76_v24, %v80_v25 }
   0xa   :  { %6320 = vmatpush1.bf16.msra.mxu0 %v10035_v18  ;;  %6664 = vmatpush1.bf16.msra.mxu1 %v10037_v19  ;;  %v87_v31 = vld [vmem:[%s16227_s1 + $0x120] sm:$0xff]  ;;  %v88_v33 = vld [vmem:[%s16227_s1 + $0x128] sm:$0xff] }
   0xb   :  { %6321 = vmatprep.subr.bf16.mxu0 %v10044_v20  ;;  %6665 = vmatprep.subr.bf16.mxu1 %v10046_v21  ;;  %v10060_v36 = vcombine.high %v83_v30, %v87_v31  ;;  %v10062_v37 = vcombine.high %v84_v32, %v88_v33  ;;  %v91_v38 = vld [vmem:[%s16227_s1 + $0x140] sm:$0xff]  ;;  %v92_v40 = vld [vmem:[%s16227_s1 + $0x148] sm:$0xff]  ;;  %v10059_v42 = vcombine.low %v83_v30, %v87_v31 }
   0xc   :  { %v95_v39 = vld [vmem:[%s16227_s1 + $0x160] sm:$0xff]  ;;  %v96_v41 = vld [vmem:[%s16227_s1 + $0x168] sm:$0xff]  ;;  %v10061_v43 = vcombine.low %v84_v32, %v88_v33 }
   0xd   :  { %v10068_v44 = vcombine.high %v91_v38, %v95_v39  ;;  %v10070_v45 = vcombine.high %v92_v40, %v96_v41  ;;  %v99_v46 = vld [vmem:[%s16227_s1 + $0x180] sm:$0xff]  ;;  %v100_v48 = vld [vmem:[%s16227_s1 + $0x188] sm:$0xff]  ;;  %v10067_v50 = vcombine.low %v91_v38, %v95_v39  ;;  %v10069_v51 = vcombine.low %v92_v40, %v96_v41 }
   0xe   :  { %6322 = vmatpush1.bf16.msra.mxu0 %v10043_v26  ;;  %6666 = vmatpush1.bf16.msra.mxu1 %v10045_v27  ;;  %v103_v47 = vld [vmem:[%s16227_s1 + $0x1a0] sm:$0xff]  ;;  %v104_v49 = vld [vmem:[%s16227_s1 + $0x1a8] sm:$0xff] }
   0xf   :  { %6323 = vmatprep.subr.bf16.mxu0 %v10052_v28  ;;  %6667 = vmatprep.subr.bf16.mxu1 %v10054_v29  ;;  %v10076_v52 = vcombine.high %v99_v46, %v103_v47  ;;  %v12100_v53 = vld [vmem:[%s16228_s0] sm:$0xff]  ;;  %v10078_v55 = vcombine.high %v100_v48, %v104_v49  ;;  %v108_v59 = vld [vmem:[%s16227_s1 + $0x1c8] sm:$0xff]  ;;  %v10075_v61 = vcombine.low %v99_v46, %v103_v47 }
  0x10   :  { %v12105_v54 = vld [vmem:[%s16228_s0 + $0x40] sm:$0xff]  ;;  %v112_v60 = vld [vmem:[%s16227_s1 + $0x1e8] sm:$0xff]  ;;  %v10077_v62 = vcombine.low %v100_v48, %v104_v49 }
  0x11   :  { %v107_v56 = vld [vmem:[%s16227_s1 + $0x1c0] sm:$0xff]  ;;  %v12115_v58 = vcombine.high %v12100_v53, %v12105_v54  ;;  %v10086_v0 = vcombine.high %v108_v59, %v112_v60  ;;  %v116_v3 = vld [vmem:[%s16227_s1 + $0x208] sm:$0xff]  ;;  %v10085_v6 = vcombine.low %v108_v59, %v112_v60 }
  0x12   :  { %6324 = vmatpush1.bf16.msra.mxu0 %v10051_v34  ;;  %6668 = vmatpush1.bf16.msra.mxu1 %v10053_v35  ;;  %v111_v57 = vld [vmem:[%s16227_s1 + $0x1e0] sm:$0xff]  ;;  %v120_v4 = vld [vmem:[%s16227_s1 + $0x228] sm:$0xff] }
  0x13   :  { %6325 = vmatprep.subr.bf16.mxu0 %v10060_v36  ;;  %6669 = vmatprep.subr.bf16.mxu1 %v10062_v37  ;;  %v10084_v63 = vcombine.high %v107_v56, %v111_v57  ;;  %v115_v1 = vld [vmem:[%s16227_s1 + $0x200] sm:$0xff]  ;;  %v10083_v5 = vcombine.low %v107_v56, %v111_v57  ;;  %v10094_v8 = vcombine.high %v116_v3, %v120_v4  ;;  %v124_v11 = vld [vmem:[%s16227_s1 + $0x248] sm:$0xff] }
  0x14   :  { %6349 = vmatprep.mubr.bf16.mxu0 %v12115_v58  ;;  %v119_v2 = vld [vmem:[%s16227_s1 + $0x220] sm:$0xff]  ;;  %6693 = vmatprep.mubr.bf16.mxu1 %v12115_v58  ;;  %v128_v12 = vld [vmem:[%s16227_s1 + $0x268] sm:$0xff]  ;;  %v10093_v14 = vcombine.low %v116_v3, %v120_v4 }
  0x15   :  { %v10092_v7 = vcombine.high %v115_v1, %v119_v2  ;;  %v123_v9 = vld [vmem:[%s16227_s1 + $0x240] sm:$0xff]  ;;  %v10091_v13 = vcombine.low %v115_v1, %v119_v2  ;;  %v10102_v16 = vcombine.high %v124_v11, %v128_v12  ;;  %v132_v19 = vld [vmem:[%s16227_s1 + $0x288] sm:$0xff]  ;;  %v10101_v22 = vcombine.low %v124_v11, %v128_v12 }
  0x16   :  { %6326 = vmatpush1.bf16.msra.mxu0 %v10059_v42  ;;  %6670 = vmatpush1.bf16.msra.mxu1 %v10061_v43  ;;  %v127_v10 = vld [vmem:[%s16227_s1 + $0x260] sm:$0xff]  ;;  %v136_v20 = vld [vmem:[%s16227_s1 + $0x2a8] sm:$0xff] }
  0x17   :  { %6327 = vmatprep.subr.bf16.mxu0 %v10068_v44  ;;  %6671 = vmatprep.subr.bf16.mxu1 %v10070_v45  ;;  %v10100_v15 = vcombine.high %v123_v9, %v127_v10  ;;  %v131_v17 = vld [vmem:[%s16227_s1 + $0x280] sm:$0xff]  ;;  %v10099_v21 = vcombine.low %v123_v9, %v127_v10  ;;  %v10110_v24 = vcombine.high %v132_v19, %v136_v20  ;;  %v140_v27 = vld [vmem:[%s16227_s1 + $0x2c8] sm:$0xff] }
  0x18   :  { %v135_v18 = vld [vmem:[%s16227_s1 + $0x2a0] sm:$0xff]  ;;  %v144_v28 = vld [vmem:[%s16227_s1 + $0x2e8] sm:$0xff]  ;;  %v10109_v30 = vcombine.low %v132_v19, %v136_v20 }
  0x19   :  { %v10108_v23 = vcombine.high %v131_v17, %v135_v18  ;;  %v139_v25 = vld [vmem:[%s16227_s1 + $0x2c0] sm:$0xff]  ;;  %v10107_v29 = vcombine.low %v131_v17, %v135_v18  ;;  %v10118_v32 = vcombine.high %v140_v27, %v144_v28  ;;  %v148_v35 = vld [vmem:[%s16227_s1 + $0x308] sm:$0xff]  ;;  %v10117_v38 = vcombine.low %v140_v27, %v144_v28 }
  0x1a   :  { %6328 = vmatpush1.bf16.msra.mxu0 %v10067_v50  ;;  %6672 = vmatpush1.bf16.msra.mxu1 %v10069_v51  ;;  %v143_v26 = vld [vmem:[%s16227_s1 + $0x2e0] sm:$0xff]  ;;  %v152_v36 = vld [vmem:[%s16227_s1 + $0x328] sm:$0xff] }
  0x1b   :  { %6329 = vmatprep.subr.bf16.mxu0 %v10076_v52  ;;  %6673 = vmatprep.subr.bf16.mxu1 %v10078_v55  ;;  %v10116_v31 = vcombine.high %v139_v25, %v143_v26  ;;  %v147_v33 = vld [vmem:[%s16227_s1 + $0x300] sm:$0xff]  ;;  %v10115_v37 = vcombine.low %v139_v25, %v143_v26  ;;  %v10126_v40 = vcombine.high %v148_v35, %v152_v36  ;;  %v156_v43 = vld [vmem:[%s16227_s1 + $0x348] sm:$0xff] }
  0x1c   :  { %v151_v34 = vld [vmem:[%s16227_s1 + $0x320] sm:$0xff]  ;;  %v160_v44 = vld [vmem:[%s16227_s1 + $0x368] sm:$0xff]  ;;  %v10125_v46 = vcombine.low %v148_v35, %v152_v36 }
  0x1d   :  { %v10124_v39 = vcombine.high %v147_v33, %v151_v34  ;;  %v155_v41 = vld [vmem:[%s16227_s1 + $0x340] sm:$0xff]  ;;  %v10123_v45 = vcombine.low %v147_v33, %v151_v34  ;;  %v10134_v48 = vcombine.high %v156_v43, %v160_v44  ;;  %v164_v51 = vld [vmem:[%s16227_s1 + $0x388] sm:$0xff]  ;;  %v10133_v56 = vcombine.low %v156_v43, %v160_v44 }
  0x1e   :  { %6330 = vmatpush1.bf16.msra.mxu0 %v10075_v61  ;;  %6674 = vmatpush1.bf16.msra.mxu1 %v10077_v62  ;;  %v159_v42 = vld [vmem:[%s16227_s1 + $0x360] sm:$0xff]  ;;  %v168_v52 = vld [vmem:[%s16227_s1 + $0x3a8] sm:$0xff] }
  0x1f   :  { %6331 = vmatprep.subr.bf16.mxu0 %v10084_v63  ;;  %6675 = vmatprep.subr.bf16.mxu1 %v10086_v0  ;;  %v10132_v47 = vcombine.high %v155_v41, %v159_v42  ;;  %v163_v49 = vld [vmem:[%s16227_s1 + $0x380] sm:$0xff]  ;;  %v10131_v55 = vcombine.low %v155_v41, %v159_v42  ;;  %v10142_v59 = vcombine.high %v164_v51, %v168_v52  ;;  %v172_v62 = vld [vmem:[%s16227_s1 + $0x3c8] sm:$0xff] }
  0x20   :  { %v167_v50 = vld [vmem:[%s16227_s1 + $0x3a0] sm:$0xff]  ;;  %v176_v63 = vld [vmem:[%s16227_s1 + $0x3e8] sm:$0xff]  ;;  %v10141_v1 = vcombine.low %v164_v51, %v168_v52 }
  0x21   :  { %v10140_v57 = vcombine.high %v163_v49, %v167_v50  ;;  %v171_v60 = vld [vmem:[%s16227_s1 + $0x3c0] sm:$0xff]  ;;  %v10139_v0 = vcombine.low %v163_v49, %v167_v50  ;;  %v10150_v3 = vcombine.high %v172_v62, %v176_v63  ;;  %v10149_v9 = vcombine.low %v172_v62, %v176_v63  ;;  %v12252_v17 = vld [vmem:[%s16228_s0 + $0x8] sm:$0xff] }
  0x22   :  { %6332 = vmatpush1.bf16.msra.mxu0 %v10083_v5  ;;  %6676 = vmatpush1.bf16.msra.mxu1 %v10085_v6  ;;  %v175_v61 = vld [vmem:[%s16227_s1 + $0x3e0] sm:$0xff]  ;;  %v180_v6 = vld [vmem:[%s16227_s1 + $0x408] sm:$0xff] }
  0x23   :  { %6333 = vmatprep.subr.bf16.mxu0 %v10092_v7  ;;  %6677 = vmatprep.subr.bf16.mxu1 %v10094_v8  ;;  %v10148_v2 = vcombine.high %v171_v60, %v175_v61  ;;  %v179_v4 = vld [vmem:[%s16227_s1 + $0x400] sm:$0xff]  ;;  %v184_v7 = vld [vmem:[%s16227_s1 + $0x428] sm:$0xff]  ;;  %v10147_v8 = vcombine.low %v171_v60, %v175_v61 }
  0x24   :  { %v183_v5 = vld [vmem:[%s16227_s1 + $0x420] sm:$0xff]  ;;  %v10158_v11 = vcombine.high %v180_v6, %v184_v7  ;;  %v12257_v18 = vld [vmem:[%s16228_s0 + $0x48] sm:$0xff] }
  0x25   :  { %v10156_v10 = vcombine.high %v179_v4, %v183_v5  ;;  %v187_v12 = vld [vmem:[%s16227_s1 + $0x440] sm:$0xff]  ;;  %v10155_v19 = vcombine.low %v179_v4, %v183_v5  ;;  %v200_v25 = vld [vmem:[%s16227_s1 + $0x4a8] sm:$0xff] }
  0x26   :  { %6334 = vmatpush1.bf16.msra.mxu0 %v10091_v13  ;;  %6678 = vmatpush1.bf16.msra.mxu1 %v10093_v14  ;;  %v191_v13 = vld [vmem:[%s16227_s1 + $0x460] sm:$0xff]  ;;  %v188_v14 = vld [vmem:[%s16227_s1 + $0x448] sm:$0xff] }
  0x27   :  { %6335 = vmatprep.subr.bf16.mxu0 %v10100_v15  ;;  %6679 = vmatprep.subr.bf16.mxu1 %v10102_v16  ;;  %v12244_v15 = vcombine.low %v12100_v53, %v12105_v54  ;;  %v192_v16 = vld [vmem:[%s16227_s1 + $0x468] sm:$0xff]  ;;  %v10157_v53 = vcombine.low %v180_v6, %v184_v7  ;;  %v10164_v54 = vcombine.high %v187_v12, %v191_v13 }
  0x28   :  { %v10166_v20 = vcombine.high %v188_v14, %v192_v16  ;;  %v10163_v26 = vcombine.low %v187_v12, %v191_v13  ;;  %v10165_v27 = vcombine.low %v188_v14, %v192_v16  ;;  %v208_v33 = vld [vmem:[%s16227_s1 + $0x4e8] sm:$0xff] }
  0x29   :  { %v216_v41 = vld [vmem:[%s16227_s1 + $0x528] sm:$0xff] }
  0x2a   :  { %6336 = vmatpush1.bf16.msra.mxu0 %v10099_v21  ;;  %6680 = vmatpush1.bf16.msra.mxu1 %v10101_v22  ;;  %v195_v21 = vld [vmem:[%s16227_s1 + $0x480] sm:$0xff]  ;;  %v224_v49 = vld [vmem:[%s16227_s1 + $0x568] sm:$0xff] }
  0x2b   :  { %6337 = vmatprep.subr.bf16.mxu0 %v10108_v23  ;;  %6681 = vmatprep.subr.bf16.mxu1 %v10110_v24  ;;  %v199_v22 = vld [vmem:[%s16227_s1 + $0x4a0] sm:$0xff]  ;;  %v12267_v23 = vcombine.high %v12252_v17, %v12257_v18  ;;  %v196_v24 = vld [vmem:[%s16227_s1 + $0x488] sm:$0xff] }
  0x2c   :  { %v10172_v28 = vcombine.high %v195_v21, %v199_v22  ;;  %v10171_v34 = vcombine.low %v195_v21, %v199_v22  ;;  %v10173_v35 = vcombine.low %v196_v24, %v200_v25  ;;  %v232_v60 = vld [vmem:[%s16227_s1 + $0x5a8] sm:$0xff] }
  0x2d   :  { %v240_v4 = vld [vmem:[%s16227_s1 + $0x5e8] sm:$0xff] }
  0x2e   :  { %6338 = vmatpush1.bf16.msra.mxu0 %v10107_v29  ;;  %6682 = vmatpush1.bf16.msra.mxu1 %v10109_v30  ;;  %v10174_v29 = vcombine.high %v196_v24, %v200_v25  ;;  %v203_v30 = vld [vmem:[%s16227_s1 + $0x4c0] sm:$0xff]  ;;  %v248_v12 = vld [vmem:[%s16227_s1 + $0x628] sm:$0xff] }
  0x2f   :  { %6339 = vmatprep.subr.bf16.mxu0 %v10116_v31  ;;  %6683 = vmatprep.subr.bf16.mxu1 %v10118_v32  ;;  %v207_v31 = vld [vmem:[%s16227_s1 + $0x4e0] sm:$0xff]  ;;  %v204_v32 = vld [vmem:[%s16227_s1 + $0x4c8] sm:$0xff] }
  0x30   :  { %v10180_v36 = vcombine.high %v203_v30, %v207_v31  ;;  %v10179_v42 = vcombine.low %v203_v30, %v207_v31  ;;  %v10181_v43 = vcombine.low %v204_v32, %v208_v33  ;;  %v256_v21 = vld [vmem:[%s16227_s1 + $0x668] sm:$0xff] }
  0x31   :  { %v264_v30 = vld [vmem:[%s16227_s1 + $0x6a8] sm:$0xff] }
  0x32   :  { %6340 = vmatpush1.bf16.msra.mxu0 %v10115_v37  ;;  %6684 = vmatpush1.bf16.msra.mxu1 %v10117_v38  ;;  %v10182_v37 = vcombine.high %v204_v32, %v208_v33  ;;  %v211_v38 = vld [vmem:[%s16227_s1 + $0x500] sm:$0xff] }
  0x33   :  { %6341 = vmatprep.subr.bf16.mxu0 %v10124_v39  ;;  %6685 = vmatprep.subr.bf16.mxu1 %v10126_v40  ;;  %v215_v39 = vld [vmem:[%s16227_s1 + $0x520] sm:$0xff]  ;;  %v212_v40 = vld [vmem:[%s16227_s1 + $0x508] sm:$0xff] }
  0x34   :  { %v10188_v44 = vcombine.high %v211_v38, %v215_v39  ;;  %v10187_v50 = vcombine.low %v211_v38, %v215_v39  ;;  %v10189_v51 = vcombine.low %v212_v40, %v216_v41  ;;  %v272_v38 = vld [vmem:[%s16227_s1 + $0x6e8] sm:$0xff] }
  0x36   :  { %6342 = vmatpush1.bf16.msra.mxu0 %v10123_v45  ;;  %6686 = vmatpush1.bf16.msra.mxu1 %v10125_v46  ;;  %v10190_v45 = vcombine.high %v212_v40, %v216_v41  ;;  %v219_v46 = vld [vmem:[%s16227_s1 + $0x540] sm:$0xff] }
  0x37   :  { %6343 = vmatprep.subr.bf16.mxu0 %v10132_v47  ;;  %6687 = vmatprep.subr.bf16.mxu1 %v10134_v48  ;;  %v223_v47 = vld [vmem:[%s16227_s1 + $0x560] sm:$0xff]  ;;  %v220_v48 = vld [vmem:[%s16227_s1 + $0x548] sm:$0xff] }
  0x38   :  { %v10196_v52 = vcombine.high %v219_v46, %v223_v47  ;;  %v10195_v61 = vcombine.low %v219_v46, %v223_v47  ;;  %v10197_v62 = vcombine.low %v220_v48, %v224_v49  ;;  %v280_v46 = vld [vmem:[%s16227_s1 + $0x728] sm:$0xff] }
  0x3a   :  { %6344 = vmatpush1.bf16.msra.mxu0 %v10131_v55  ;;  %6688 = vmatpush1.bf16.msra.mxu1 %v10133_v56  ;;  %v10198_v55 = vcombine.high %v220_v48, %v224_v49  ;;  %v227_v56 = vld [vmem:[%s16227_s1 + $0x580] sm:$0xff] }
  0x3b   :  { %6345 = vmatprep.subr.bf16.mxu0 %v10140_v57  ;;  %6689 = vmatprep.subr.bf16.mxu1 %v10142_v59  ;;  %v231_v57 = vld [vmem:[%s16227_s1 + $0x5a0] sm:$0xff]  ;;  %v228_v59 = vld [vmem:[%s16227_s1 + $0x588] sm:$0xff] }
  0x3c   :  { %v10204_v63 = vcombine.high %v227_v56, %v231_v57  ;;  %v10203_v5 = vcombine.low %v227_v56, %v231_v57  ;;  %v10205_v6 = vcombine.low %v228_v59, %v232_v60  ;;  %v288_v56 = vld [vmem:[%s16227_s1 + $0x768] sm:$0xff] }
  0x3e   :  { %6346 = vmatpush1.bf16.msra.mxu0 %v10139_v0  ;;  %6690 = vmatpush1.bf16.msra.mxu1 %v10141_v1  ;;  %v10206_v0 = vcombine.high %v228_v59, %v232_v60  ;;  %v235_v1 = vld [vmem:[%s16227_s1 + $0x5c0] sm:$0xff] }
  0x3f   :  { %6347 = vmatprep.subr.bf16.mxu0 %v10148_v2  ;;  %6691 = vmatprep.subr.bf16.mxu1 %v10150_v3  ;;  %v239_v2 = vld [vmem:[%s16227_s1 + $0x5e0] sm:$0xff]  ;;  %v236_v3 = vld [vmem:[%s16227_s1 + $0x5c8] sm:$0xff] }
  0x40   :  { %v10212_v7 = vcombine.high %v235_v1, %v239_v2  ;;  %v10211_v13 = vcombine.low %v235_v1, %v239_v2  ;;  %v10213_v14 = vcombine.low %v236_v3, %v240_v4  ;;  %v296_v1 = vld [vmem:[%s16227_s1 + $0x7a8] sm:$0xff] }
  0x42   :  { %6348 = vmatpush1.bf16.msra.mxu0 %v10147_v8  ;;  %6692 = vmatpush1.bf16.msra.mxu1 %v10149_v9  ;;  %v10214_v8 = vcombine.high %v236_v3, %v240_v4  ;;  %v243_v9 = vld [vmem:[%s16227_s1 + $0x600] sm:$0xff] }
  0x43   :  { %6360 = vmatprep.subr.bf16.mxu0 %v10156_v10  ;;  %6704 = vmatprep.subr.bf16.mxu1 %v10158_v11  ;;  %v247_v10 = vld [vmem:[%s16227_s1 + $0x620] sm:$0xff]  ;;  %v244_v11 = vld [vmem:[%s16227_s1 + $0x608] sm:$0xff] }
  0x44   :  { %v10220_v16 = vcombine.high %v243_v9, %v247_v10  ;;  %v10219_v22 = vcombine.low %v243_v9, %v247_v10  ;;  %v10221_v24 = vcombine.low %v244_v11, %v248_v12  ;;  %v304_v9 = vld [vmem:[%s16227_s1 + $0x7e8] sm:$0xff] }
  0x45   :  { %6350 = vmatmul.mubr.bf16.vlgmr.msra.gmra.mrb[0].mxu0 %v12244_v15  ;;  %6694 = vmatmul.mubr.bf16.vlgmr.msra.gmra.mrb[0].mxu1 %v12244_v15 }
  0x46   :  { %6361 = vmatpush1.bf16.msra.mxu0 %v10155_v19  ;;  %6705 = vmatpush1.bf16.msra.mxu1 %v10157_v53  ;;  %v10222_v19 = vcombine.high %v244_v11, %v248_v12  ;;  %v251_v53 = vld [vmem:[%s16227_s1 + $0x640] sm:$0xff] }
  0x47   :  { %6362 = vmatprep.subr.bf16.mxu0 %v10164_v54  ;;  %6706 = vmatprep.subr.bf16.mxu1 %v10166_v20  ;;  %v255_v54 = vld [vmem:[%s16227_s1 + $0x660] sm:$0xff]  ;;  %v252_v20 = vld [vmem:[%s16227_s1 + $0x648] sm:$0xff] }
  0x48   :  { %6392 = vmatprep.mubr.bf16.mxu0 %v12267_v23  ;;  %6736 = vmatprep.mubr.bf16.mxu1 %v12267_v23  ;;  %v10228_v25 = vcombine.high %v251_v53, %v255_v54  ;;  %v10227_v31 = vcombine.low %v251_v53, %v255_v54  ;;  %v10229_v32 = vcombine.low %v252_v20, %v256_v21  ;;  %v312_v53 = vld [vmem:[%s16227_s1 + $0x828] sm:$0xff] }
  0x4a   :  { %6363 = vmatpush1.bf16.msra.mxu0 %v10163_v26  ;;  %6707 = vmatpush1.bf16.msra.mxu1 %v10165_v27  ;;  %v10230_v26 = vcombine.high %v252_v20, %v256_v21  ;;  %v259_v27 = vld [vmem:[%s16227_s1 + $0x680] sm:$0xff] }
  0x4b   :  { %6364 = vmatprep.subr.bf16.mxu0 %v10172_v28  ;;  %6708 = vmatprep.subr.bf16.mxu1 %v10174_v29  ;;  %v263_v28 = vld [vmem:[%s16227_s1 + $0x6a0] sm:$0xff]  ;;  %v260_v29 = vld [vmem:[%s16227_s1 + $0x688] sm:$0xff] }
  0x4c   :  { %v10236_v33 = vcombine.high %v259_v27, %v263_v28  ;;  %v10235_v39 = vcombine.low %v259_v27, %v263_v28  ;;  %v10237_v40 = vcombine.low %v260_v29, %v264_v30  ;;  %v12458_v27 = vcombine.low %v12252_v17, %v12257_v18  ;;  %v320_v28 = vld [vmem:[%s16227_s1 + $0x868] sm:$0xff] }
  0x4e   :  { %6365 = vmatpush1.bf16.msra.mxu0 %v10171_v34  ;;  %6709 = vmatpush1.bf16.msra.mxu1 %v10173_v35  ;;  %v10238_v34 = vcombine.high %v260_v29, %v264_v30  ;;  %v267_v35 = vld [vmem:[%s16227_s1 + $0x6c0] sm:$0xff]  ;;  %v12466_v29 = vld [vmem:[%s16228_s0 + $0x10] sm:$0xff] }
  0x4f   :  { %6366 = vmatprep.subr.bf16.mxu0 %v10180_v36  ;;  %6710 = vmatprep.subr.bf16.mxu1 %v10182_v37  ;;  %v271_v36 = vld [vmem:[%s16227_s1 + $0x6e0] sm:$0xff]  ;;  %v268_v37 = vld [vmem:[%s16227_s1 + $0x6c8] sm:$0xff]  ;;  %v12471_v30 = vld [vmem:[%s16228_s0 + $0x50] sm:$0xff] }
  0x50   :  { %v10244_v41 = vcombine.high %v267_v35, %v271_v36  ;;  %v10243_v47 = vcombine.low %v267_v35, %v271_v36  ;;  %v10245_v48 = vcombine.low %v268_v37, %v272_v38  ;;  %v12481_v35 = vcombine.high %v12466_v29, %v12471_v30  ;;  %v324_v36 = vld [vmem:[%s16227_s1 + $0x888] sm:$0xff] }
  0x52   :  { %6367 = vmatpush1.bf16.msra.mxu0 %v10179_v42  ;;  %6711 = vmatpush1.bf16.msra.mxu1 %v10181_v43  ;;  %v10246_v42 = vcombine.high %v268_v37, %v272_v38  ;;  %v275_v43 = vld [vmem:[%s16227_s1 + $0x700] sm:$0xff]  ;;  %v328_v37 = vld [vmem:[%s16227_s1 + $0x8a8] sm:$0xff] }
  0x53   :  { %6368 = vmatprep.subr.bf16.mxu0 %v10188_v44  ;;  %6712 = vmatprep.subr.bf16.mxu1 %v10190_v45  ;;  %v279_v44 = vld [vmem:[%s16227_s1 + $0x720] sm:$0xff]  ;;  %v276_v45 = vld [vmem:[%s16227_s1 + $0x708] sm:$0xff] }
  0x54   :  { %v10252_v49 = vcombine.high %v275_v43, %v279_v44  ;;  %v10251_v57 = vcombine.low %v275_v43, %v279_v44  ;;  %v10253_v59 = vcombine.low %v276_v45, %v280_v46  ;;  %v335_v43 = vld [vmem:[%s16227_s1 + $0x8e0] sm:$0xff]  ;;  %v332_v44 = vld [vmem:[%s16227_s1 + $0x8c8] sm:$0xff] }
  0x56   :  { %6369 = vmatpush1.bf16.msra.mxu0 %v10187_v50  ;;  %6713 = vmatpush1.bf16.msra.mxu1 %v10189_v51  ;;  %v10254_v50 = vcombine.high %v276_v45, %v280_v46  ;;  %v283_v51 = vld [vmem:[%s16227_s1 + $0x740] sm:$0xff]  ;;  %v336_v45 = vld [vmem:[%s16227_s1 + $0x8e8] sm:$0xff] }
  0x57   :  { %6370 = vmatprep.subr.bf16.mxu0 %v10196_v52  ;;  %6714 = vmatprep.subr.bf16.mxu1 %v10198_v55  ;;  %v287_v52 = vld [vmem:[%s16227_s1 + $0x760] sm:$0xff]  ;;  %v284_v55 = vld [vmem:[%s16227_s1 + $0x748] sm:$0xff] }
  0x58   :  { %v10260_v60 = vcombine.high %v283_v51, %v287_v52  ;;  %v10259_v2 = vcombine.low %v283_v51, %v287_v52  ;;  %v10261_v3 = vcombine.low %v284_v55, %v288_v56  ;;  %v343_v51 = vld [vmem:[%s16227_s1 + $0x920] sm:$0xff]  ;;  %v340_v52 = vld [vmem:[%s16227_s1 + $0x908] sm:$0xff] }
  0x5a   :  { %6371 = vmatpush1.bf16.msra.mxu0 %v10195_v61  ;;  %6715 = vmatpush1.bf16.msra.mxu1 %v10197_v62  ;;  %v10262_v61 = vcombine.high %v284_v55, %v288_v56  ;;  %v291_v62 = vld [vmem:[%s16227_s1 + $0x780] sm:$0xff]  ;;  %v344_v55 = vld [vmem:[%s16227_s1 + $0x928] sm:$0xff] }
  0x5b   :  { %6372 = vmatprep.subr.bf16.mxu0 %v10204_v63  ;;  %6716 = vmatprep.subr.bf16.mxu1 %v10206_v0  ;;  %v295_v63 = vld [vmem:[%s16227_s1 + $0x7a0] sm:$0xff]  ;;  %v292_v0 = vld [vmem:[%s16227_s1 + $0x788] sm:$0xff] }
  0x5c   :  { %v10268_v4 = vcombine.high %v291_v62, %v295_v63  ;;  %v10267_v10 = vcombine.low %v291_v62, %v295_v63  ;;  %v10269_v11 = vcombine.low %v292_v0, %v296_v1  ;;  %v351_v62 = vld [vmem:[%s16227_s1 + $0x960] sm:$0xff]  ;;  %v348_v63 = vld [vmem:[%s16227_s1 + $0x948] sm:$0xff] }
  0x5e   :  { %6373 = vmatpush1.bf16.msra.mxu0 %v10203_v5  ;;  %6717 = vmatpush1.bf16.msra.mxu1 %v10205_v6  ;;  %v10270_v5 = vcombine.high %v292_v0, %v296_v1  ;;  %v299_v6 = vld [vmem:[%s16227_s1 + $0x7c0] sm:$0xff]  ;;  %v352_v0 = vld [vmem:[%s16227_s1 + $0x968] sm:$0xff] }
  0x5f   :  { %6374 = vmatprep.subr.bf16.mxu0 %v10212_v7  ;;  %6718 = vmatprep.subr.bf16.mxu1 %v10214_v8  ;;  %v303_v7 = vld [vmem:[%s16227_s1 + $0x7e0] sm:$0xff]  ;;  %v300_v8 = vld [vmem:[%s16227_s1 + $0x7c8] sm:$0xff] }
  0x60   :  { %v10276_v12 = vcombine.high %v299_v6, %v303_v7  ;;  %v10275_v54 = vcombine.low %v299_v6, %v303_v7  ;;  %v10277_v20 = vcombine.low %v300_v8, %v304_v9  ;;  %v359_v6 = vld [vmem:[%s16227_s1 + $0x9a0] sm:$0xff]  ;;  %v356_v7 = vld [vmem:[%s16227_s1 + $0x988] sm:$0xff] }
  0x62   :  { %6375 = vmatpush1.bf16.msra.mxu0 %v10211_v13  ;;  %6719 = vmatpush1.bf16.msra.mxu1 %v10213_v14  ;;  %v10278_v13 = vcombine.high %v300_v8, %v304_v9  ;;  %v307_v14 = vld [vmem:[%s16227_s1 + $0x800] sm:$0xff]  ;;  %v360_v8 = vld [vmem:[%s16227_s1 + $0x9a8] sm:$0xff] }
  0x63   :  { %6376 = vmatprep.subr.bf16.mxu0 %v10220_v16  ;;  %6720 = vmatprep.subr.bf16.mxu1 %v10222_v19  ;;  %v311_v16 = vld [vmem:[%s16227_s1 + $0x820] sm:$0xff]  ;;  %v308_v19 = vld [vmem:[%s16227_s1 + $0x808] sm:$0xff] }
  0x64   :  { %v10284_v21 = vcombine.high %v307_v14, %v311_v16  ;;  %v10285_v17 = vcombine.low %v308_v19, %v312_v53 }
  0x66   :  { %6377 = vmatpush1.bf16.msra.mxu0 %v10219_v22  ;;  %6721 = vmatpush1.bf16.msra.mxu1 %v10221_v24  ;;  %v10286_v22 = vcombine.high %v308_v19, %v312_v53  ;;  %v315_v24 = vld [vmem:[%s16227_s1 + $0x840] sm:$0xff]  ;;  %v368_v19 = vld [vmem:[%s16227_s1 + $0x9e8] sm:$0xff] }
  0x67   :  { %6378 = vmatprep.subr.bf16.mxu0 %v10228_v25  ;;  %6722 = vmatprep.subr.bf16.mxu1 %v10230_v26  ;;  %v319_v25 = vld [vmem:[%s16227_s1 + $0x860] sm:$0xff]  ;;  %v316_v26 = vld [vmem:[%s16227_s1 + $0x848] sm:$0xff] }
  0x68   :  { %v10292_v18 = vcombine.high %v315_v24, %v319_v25  ;;  %v10291_v38 = vcombine.low %v315_v24, %v319_v25  ;;  %v375_v24 = vld [vmem:[%s16227_s1 + $0xa20] sm:$0xff]  ;;  %v372_v25 = vld [vmem:[%s16227_s1 + $0xa08] sm:$0xff] }
  0x6a   :  { %6379 = vmatpush1.bf16.msra.mxu0 %v10227_v31  ;;  %6723 = vmatpush1.bf16.msra.mxu1 %v10229_v32  ;;  %v10283_v31 = vcombine.low %v307_v14, %v311_v16  ;;  %v10294_v32 = vcombine.high %v316_v26, %v320_v28  ;;  %v367_v14 = vld [vmem:[%s16227_s1 + $0x9e0] sm:$0xff]  ;;  %v364_v16 = vld [vmem:[%s16227_s1 + $0x9c8] sm:$0xff] }
  0x6b   :  { %6380 = vmatprep.subr.bf16.mxu0 %v10236_v33  ;;  %6724 = vmatprep.subr.bf16.mxu1 %v10238_v34  ;;  %v323_v33 = vld [vmem:[%s16227_s1 + $0x880] sm:$0xff] }
  0x6c   :  { %v327_v34 = vld [vmem:[%s16227_s1 + $0x8a0] sm:$0xff] }
  0x6d   :  { %v10299_v46 = vcombine.low %v323_v33, %v327_v34 }
  0x6e   :  { %6381 = vmatpush1.bf16.msra.mxu0 %v10235_v39  ;;  %6725 = vmatpush1.bf16.msra.mxu1 %v10237_v40  ;;  %v10293_v39 = vcombine.low %v316_v26, %v320_v28  ;;  %v10300_v40 = vcombine.high %v323_v33, %v327_v34  ;;  %v376_v26 = vld [vmem:[%s16227_s1 + $0xa28] sm:$0xff]  ;;  %v383_v33 = vld [vmem:[%s16227_s1 + $0xa60] sm:$0xff] }
  0x6f   :  { %6382 = vmatprep.subr.bf16.mxu0 %v10244_v41  ;;  %6726 = vmatprep.subr.bf16.mxu1 %v10246_v42  ;;  %v10302_v41 = vcombine.high %v324_v36, %v328_v37  ;;  %v331_v42 = vld [vmem:[%s16227_s1 + $0x8c0] sm:$0xff]  ;;  %v380_v34 = vld [vmem:[%s16227_s1 + $0xa48] sm:$0xff] }
  0x70   :  { %v10307_v56 = vcombine.low %v331_v42, %v335_v43 }
  0x72   :  { %6383 = vmatpush1.bf16.msra.mxu0 %v10243_v47  ;;  %6727 = vmatpush1.bf16.msra.mxu1 %v10245_v48  ;;  %v10301_v47 = vcombine.low %v324_v36, %v328_v37  ;;  %v10308_v48 = vcombine.high %v331_v42, %v335_v43  ;;  %v384_v36 = vld [vmem:[%s16227_s1 + $0xa68] sm:$0xff]  ;;  %v391_v42 = vld [vmem:[%s16227_s1 + $0xaa0] sm:$0xff] }
  0x73   :  { %6384 = vmatprep.subr.bf16.mxu0 %v10252_v49  ;;  %6728 = vmatprep.subr.bf16.mxu1 %v10254_v50  ;;  %v10310_v49 = vcombine.high %v332_v44, %v336_v45  ;;  %v339_v50 = vld [vmem:[%s16227_s1 + $0x900] sm:$0xff]  ;;  %v388_v43 = vld [vmem:[%s16227_s1 + $0xa88] sm:$0xff] }
  0x74   :  { %v10315_v1 = vcombine.low %v339_v50, %v343_v51 }
  0x76   :  { %6385 = vmatpush1.bf16.msra.mxu0 %v10251_v57  ;;  %6729 = vmatpush1.bf16.msra.mxu1 %v10253_v59  ;;  %v10309_v57 = vcombine.low %v332_v44, %v336_v45  ;;  %v10316_v59 = vcombine.high %v339_v50, %v343_v51  ;;  %v392_v44 = vld [vmem:[%s16227_s1 + $0xaa8] sm:$0xff]  ;;  %v399_v50 = vld [vmem:[%s16227_s1 + $0xae0] sm:$0xff] }
  0x77   :  { %6386 = vmatprep.subr.bf16.mxu0 %v10260_v60  ;;  %6730 = vmatprep.subr.bf16.mxu1 %v10262_v61  ;;  %v10318_v60 = vcombine.high %v340_v52, %v344_v55  ;;  %v347_v61 = vld [vmem:[%s16227_s1 + $0x940] sm:$0xff]  ;;  %v396_v51 = vld [vmem:[%s16227_s1 + $0xac8] sm:$0xff] }
  0x78   :  { %v10323_v9 = vcombine.low %v347_v61, %v351_v62 }
  0x7a   :  { %6387 = vmatpush1.bf16.msra.mxu0 %v10259_v2  ;;  %6731 = vmatpush1.bf16.msra.mxu1 %v10261_v3  ;;  %v10317_v2 = vcombine.low %v340_v52, %v344_v55  ;;  %v10324_v3 = vcombine.high %v347_v61, %v351_v62  ;;  %v400_v52 = vld [vmem:[%s16227_s1 + $0xae8] sm:$0xff]  ;;  %v407_v61 = vld [vmem:[%s16227_s1 + $0xb20] sm:$0xff] }
  0x7b   :  { %6388 = vmatprep.subr.bf16.mxu0 %v10268_v4  ;;  %6732 = vmatprep.subr.bf16.mxu1 %v10270_v5  ;;  %v10326_v4 = vcombine.high %v348_v63, %v352_v0  ;;  %v355_v5 = vld [vmem:[%s16227_s1 + $0x980] sm:$0xff]  ;;  %v404_v62 = vld [vmem:[%s16227_s1 + $0xb08] sm:$0xff] }
  0x7c   :  { %v10331_v53 = vcombine.low %v355_v5, %v359_v6 }
  0x7e   :  { %6389 = vmatpush1.bf16.msra.mxu0 %v10267_v10  ;;  %6733 = vmatpush1.bf16.msra.mxu1 %v10269_v11  ;;  %v10325_v10 = vcombine.low %v348_v63, %v352_v0  ;;  %v10332_v11 = vcombine.high %v355_v5, %v359_v6  ;;  %v408_v63 = vld [vmem:[%s16227_s1 + $0xb28] sm:$0xff]  ;;  %v415_v5 = vld [vmem:[%s16227_s1 + $0xb60] sm:$0xff] }
  0x7f   :  { %6390 = vmatprep.subr.bf16.mxu0 %v10276_v12  ;;  %6734 = vmatprep.subr.bf16.mxu1 %v10278_v13  ;;  %v10334_v12 = vcombine.high %v356_v7, %v360_v8  ;;  %v363_v13 = vld [vmem:[%s16227_s1 + $0x9c0] sm:$0xff]  ;;  %v412_v6 = vld [vmem:[%s16227_s1 + $0xb48] sm:$0xff] }
  0x80   :  { %v10339_v28 = vcombine.low %v363_v13, %v367_v14 }
  0x82   :  { %6391 = vmatpush1.bf16.msra.mxu0 %v10275_v54  ;;  %6735 = vmatpush1.bf16.msra.mxu1 %v10277_v20  ;;  %v10333_v54 = vcombine.low %v356_v7, %v360_v8  ;;  %v10340_v20 = vcombine.high %v363_v13, %v367_v14  ;;  %v416_v7 = vld [vmem:[%s16227_s1 + $0xb68] sm:$0xff]  ;;  %v423_v13 = vld [vmem:[%s16227_s1 + $0xba0] sm:$0xff] }
  0x83   :  { %6403 = vmatprep.subr.bf16.mxu0 %v10284_v21  ;;  %6747 = vmatprep.subr.bf16.mxu1 %v10286_v22  ;;  %v10342_v21 = vcombine.high %v364_v16, %v368_v19  ;;  %v371_v22 = vld [vmem:[%s16227_s1 + $0xa00] sm:$0xff]  ;;  %v420_v14 = vld [vmem:[%s16227_s1 + $0xb88] sm:$0xff] }
  0x84   :  { %v10347_v37 = vcombine.low %v371_v22, %v375_v24 }
  0x85   :  { %6393 = vmatmul.mubr.bf16.vlgmr.msra.gmra.mrb[0].mxu0 %v12458_v27  ;;  %6737 = vmatmul.mubr.bf16.vlgmr.msra.gmra.mrb[0].mxu1 %v12458_v27 }
  0x86   :  { %6404 = vmatpush1.bf16.msra.mxu0 %v10283_v31  ;;  %6748 = vmatpush1.bf16.msra.mxu1 %v10285_v17  ;;  %v10341_v31 = vcombine.low %v364_v16, %v368_v19  ;;  %v10348_v17 = vcombine.high %v371_v22, %v375_v24  ;;  %v424_v16 = vld [vmem:[%s16227_s1 + $0xba8] sm:$0xff]  ;;  %v431_v22 = vld [vmem:[%s16227_s1 + $0xbe0] sm:$0xff] }
  0x87   :  { %6405 = vmatprep.subr.bf16.mxu0 %v10292_v18  ;;  %6749 = vmatprep.subr.bf16.mxu1 %v10294_v32  ;;  %v10350_v18 = vcombine.high %v372_v25, %v376_v26  ;;  %v379_v32 = vld [vmem:[%s16227_s1 + $0xa40] sm:$0xff]  ;;  %v428_v24 = vld [vmem:[%s16227_s1 + $0xbc8] sm:$0xff] }
  0x88   :  { %6435 = vmatprep.mubr.bf16.mxu0 %v12481_v35  ;;  %6779 = vmatprep.mubr.bf16.mxu1 %v12481_v35  ;;  %v10355_v45 = vcombine.low %v379_v32, %v383_v33 }
  0x8a   :  { %6406 = vmatpush1.bf16.msra.mxu0 %v10291_v38  ;;  %6750 = vmatpush1.bf16.msra.mxu1 %v10293_v39  ;;  %v10349_v38 = vcombine.low %v372_v25, %v376_v26  ;;  %v10356_v39 = vcombine.high %v379_v32, %v383_v33  ;;  %v432_v25 = vld [vmem:[%s16227_s1 + $0xbe8] sm:$0xff]  ;;  %v439_v32 = vld [vmem:[%s16227_s1 + $0xc20] sm:$0xff] }
  0x8b   :  { %6407 = vmatprep.subr.bf16.mxu0 %v10300_v40  ;;  %6751 = vmatprep.subr.bf16.mxu1 %v10302_v41  ;;  %v10358_v40 = vcombine.high %v380_v34, %v384_v36  ;;  %v387_v41 = vld [vmem:[%s16227_s1 + $0xa80] sm:$0xff]  ;;  %v436_v33 = vld [vmem:[%s16227_s1 + $0xc08] sm:$0xff] }
  0x8c   :  { %v10363_v55 = vcombine.low %v387_v41, %v391_v42 }
  0x8e   :  { %6408 = vmatpush1.bf16.msra.mxu0 %v10299_v46  ;;  %6752 = vmatpush1.bf16.msra.mxu1 %v10301_v47  ;;  %v10357_v46 = vcombine.low %v380_v34, %v384_v36  ;;  %v10364_v47 = vcombine.high %v387_v41, %v391_v42  ;;  %v440_v34 = vld [vmem:[%s16227_s1 + $0xc28] sm:$0xff]  ;;  %v447_v41 = vld [vmem:[%s16227_s1 + $0xc60] sm:$0xff] }
  0x8f   :  { %6409 = vmatprep.subr.bf16.mxu0 %v10308_v48  ;;  %6753 = vmatprep.subr.bf16.mxu1 %v10310_v49  ;;  %v10366_v48 = vcombine.high %v388_v43, %v392_v44  ;;  %v395_v49 = vld [vmem:[%s16227_s1 + $0xac0] sm:$0xff]  ;;  %v444_v42 = vld [vmem:[%s16227_s1 + $0xc48] sm:$0xff] }
  0x90   :  { %v10371_v0 = vcombine.low %v395_v49, %v399_v50 }
  0x92   :  { %6410 = vmatpush1.bf16.msra.mxu0 %v10307_v56  ;;  %6754 = vmatpush1.bf16.msra.mxu1 %v10309_v57  ;;  %v10365_v56 = vcombine.low %v388_v43, %v392_v44  ;;  %v10372_v57 = vcombine.high %v395_v49, %v399_v50  ;;  %v12672_v43 = vcombine.low %v12466_v29, %v12471_v30  ;;  %v448_v44 = vld [vmem:[%s16227_s1 + $0xc68] sm:$0xff]  ;;  %v451_v49 = vld [vmem:[%s16227_s1 + $0xc80] sm:$0xff] }
  0x93   :  { %6411 = vmatprep.subr.bf16.mxu0 %v10316_v59  ;;  %6755 = vmatprep.subr.bf16.mxu1 %v10318_v60  ;;  %v10374_v59 = vcombine.high %v396_v51, %v400_v52  ;;  %v403_v60 = vld [vmem:[%s16227_s1 + $0xb00] sm:$0xff]  ;;  %v10413_v29 = vcombine.low %v436_v33, %v440_v34 }
  0x94   :  { %v10379_v8 = vcombine.low %v403_v60, %v407_v61  ;;  %v455_v50 = vld [vmem:[%s16227_s1 + $0xca0] sm:$0xff] }
  0x96   :  { %6412 = vmatpush1.bf16.msra.mxu0 %v10315_v1  ;;  %6756 = vmatpush1.bf16.msra.mxu1 %v10317_v2  ;;  %v10373_v1 = vcombine.low %v396_v51, %v400_v52  ;;  %v10380_v2 = vcombine.high %v403_v60, %v407_v61  ;;  %v452_v52 = vld [vmem:[%s16227_s1 + $0xc88] sm:$0xff]  ;;  %v459_v61 = vld [vmem:[%s16227_s1 + $0xcc0] sm:$0xff] }
  0x97   :  { %6413 = vmatprep.subr.bf16.mxu0 %v10324_v3  ;;  %6757 = vmatprep.subr.bf16.mxu1 %v10326_v4  ;;  %v10382_v3 = vcombine.high %v404_v62, %v408_v63  ;;  %v411_v4 = vld [vmem:[%s16227_s1 + $0xb40] sm:$0xff] }
  0x98   :  { %v10387_v19 = vcombine.low %v411_v4, %v415_v5 }
  0x9a   :  { %6414 = vmatpush1.bf16.msra.mxu0 %v10323_v9  ;;  %6758 = vmatpush1.bf16.msra.mxu1 %v10325_v10  ;;  %v10381_v9 = vcombine.low %v404_v62, %v408_v63  ;;  %v10388_v10 = vcombine.high %v411_v4, %v415_v5  ;;  %v463_v62 = vld [vmem:[%s16227_s1 + $0xce0] sm:$0xff]  ;;  %v460_v63 = vld [vmem:[%s16227_s1 + $0xcc8] sm:$0xff] }
  0x9b   :  { %6415 = vmatprep.subr.bf16.mxu0 %v10332_v11  ;;  %6759 = vmatprep.subr.bf16.mxu1 %v10334_v12  ;;  %v10390_v11 = vcombine.high %v412_v6, %v416_v7  ;;  %v419_v12 = vld [vmem:[%s16227_s1 + $0xb80] sm:$0xff] }
  0x9c   :  { %v10395_v26 = vcombine.low %v419_v12, %v423_v13  ;;  %v467_v5 = vld [vmem:[%s16227_s1 + $0xd00] sm:$0xff] }
  0x9e   :  { %6416 = vmatpush1.bf16.msra.mxu0 %v10331_v53  ;;  %6760 = vmatpush1.bf16.msra.mxu1 %v10333_v54  ;;  %v10389_v53 = vcombine.low %v412_v6, %v416_v7  ;;  %v10396_v54 = vcombine.high %v419_v12, %v423_v13  ;;  %v471_v6 = vld [vmem:[%s16227_s1 + $0xd20] sm:$0xff]  ;;  %v468_v7 = vld [vmem:[%s16227_s1 + $0xd08] sm:$0xff] }
  0x9f   :  { %6417 = vmatprep.subr.bf16.mxu0 %v10340_v20  ;;  %6761 = vmatprep.subr.bf16.mxu1 %v10342_v21  ;;  %v10398_v20 = vcombine.high %v420_v14, %v424_v16  ;;  %v427_v21 = vld [vmem:[%s16227_s1 + $0xbc0] sm:$0xff] }
  0xa0   :  { %v10403_v36 = vcombine.low %v427_v21, %v431_v22  ;;  %v475_v13 = vld [vmem:[%s16227_s1 + $0xd40] sm:$0xff] }
  0xa2   :  { %6418 = vmatpush1.bf16.msra.mxu0 %v10339_v28  ;;  %6762 = vmatpush1.bf16.msra.mxu1 %v10341_v31  ;;  %v10397_v28 = vcombine.low %v420_v14, %v424_v16  ;;  %v10404_v31 = vcombine.high %v427_v21, %v431_v22  ;;  %v479_v14 = vld [vmem:[%s16227_s1 + $0xd60] sm:$0xff]  ;;  %v476_v16 = vld [vmem:[%s16227_s1 + $0xd48] sm:$0xff] }
  0xa3   :  { %6419 = vmatprep.subr.bf16.mxu0 %v10348_v17  ;;  %6763 = vmatprep.subr.bf16.mxu1 %v10350_v18  ;;  %v10406_v17 = vcombine.high %v428_v24, %v432_v25  ;;  %v435_v18 = vld [vmem:[%s16227_s1 + $0xc00] sm:$0xff] }
  0xa4   :  { %v483_v22 = vld [vmem:[%s16227_s1 + $0xd80] sm:$0xff] }
  0xa6   :  { %6420 = vmatpush1.bf16.msra.mxu0 %v10347_v37  ;;  %6764 = vmatpush1.bf16.msra.mxu1 %v10349_v38  ;;  %v10405_v37 = vcombine.low %v428_v24, %v432_v25  ;;  %v10412_v38 = vcombine.high %v435_v18, %v439_v32  ;;  %v487_v24 = vld [vmem:[%s16227_s1 + $0xda0] sm:$0xff]  ;;  %v484_v25 = vld [vmem:[%s16227_s1 + $0xd88] sm:$0xff] }
  0xa7   :  { %6421 = vmatprep.subr.bf16.mxu0 %v10356_v39  ;;  %6765 = vmatprep.subr.bf16.mxu1 %v10358_v40  ;;  %v10414_v39 = vcombine.high %v436_v33, %v440_v34  ;;  %v443_v40 = vld [vmem:[%s16227_s1 + $0xc40] sm:$0xff]  ;;  %v492_v34 = vld [vmem:[%s16227_s1 + $0xdc8] sm:$0xff] }
  0xa8   :  { %v10420_v30 = vcombine.high %v443_v40, %v447_v41  ;;  %v495_v33 = vld [vmem:[%s16227_s1 + $0xde0] sm:$0xff] }
  0xaa   :  { %6422 = vmatpush1.bf16.msra.mxu0 %v10355_v45  ;;  %6766 = vmatpush1.bf16.msra.mxu1 %v10357_v46  ;;  %v12680_v45 = vld [vmem:[%s16228_s0 + $0x18] sm:$0xff] }
  0xab   :  { %6423 = vmatprep.subr.bf16.mxu0 %v10364_v47  ;;  %6767 = vmatprep.subr.bf16.mxu1 %v10366_v48  ;;  %v12685_v46 = vld [vmem:[%s16228_s0 + $0x58] sm:$0xff]  ;;  %v10411_v47 = vcombine.low %v435_v18, %v439_v32  ;;  %v10422_v48 = vcombine.high %v444_v42, %v448_v44  ;;  %v491_v32 = vld [vmem:[%s16227_s1 + $0xdc0] sm:$0xff] }
  0xac   :  { %v12695_v51 = vcombine.high %v12680_v45, %v12685_v46 }
  0xae   :  { %6424 = vmatpush1.bf16.msra.mxu0 %v10363_v55  ;;  %6768 = vmatpush1.bf16.msra.mxu1 %v10365_v56  ;;  %v456_v55 = vld [vmem:[%s16227_s1 + $0xca8] sm:$0xff]  ;;  %v10419_v56 = vcombine.low %v443_v40, %v447_v41  ;;  %v499_v41 = vld [vmem:[%s16227_s1 + $0xe00] sm:$0xff] }
  0xaf   :  { %6425 = vmatprep.subr.bf16.mxu0 %v10372_v57  ;;  %6769 = vmatprep.subr.bf16.mxu1 %v10374_v59  ;;  %v10421_v57 = vcombine.low %v444_v42, %v448_v44  ;;  %v10428_v59 = vcombine.high %v451_v49, %v455_v50  ;;  %v10430_v60 = vcombine.high %v452_v52, %v456_v55  ;;  %v503_v42 = vld [vmem:[%s16227_s1 + $0xe20] sm:$0xff]  ;;  %v500_v44 = vld [vmem:[%s16227_s1 + $0xe08] sm:$0xff] }
  0xb2   :  { %6426 = vmatpush1.bf16.msra.mxu0 %v10371_v0  ;;  %6770 = vmatpush1.bf16.msra.mxu1 %v10373_v1  ;;  %v464_v0 = vld [vmem:[%s16227_s1 + $0xce8] sm:$0xff]  ;;  %v10427_v1 = vcombine.low %v451_v49, %v455_v50  ;;  %v507_v50 = vld [vmem:[%s16227_s1 + $0xe40] sm:$0xff] }
  0xb3   :  { %6427 = vmatprep.subr.bf16.mxu0 %v10380_v2  ;;  %6771 = vmatprep.subr.bf16.mxu1 %v10382_v3  ;;  %v10429_v2 = vcombine.low %v452_v52, %v456_v55  ;;  %v10436_v3 = vcombine.high %v459_v61, %v463_v62  ;;  %v10438_v4 = vcombine.high %v460_v63, %v464_v0  ;;  %v511_v52 = vld [vmem:[%s16227_s1 + $0xe60] sm:$0xff]  ;;  %v508_v55 = vld [vmem:[%s16227_s1 + $0xe48] sm:$0xff] }
  0xb6   :  { %6428 = vmatpush1.bf16.msra.mxu0 %v10379_v8  ;;  %6772 = vmatpush1.bf16.msra.mxu1 %v10381_v9  ;;  %v472_v8 = vld [vmem:[%s16227_s1 + $0xd28] sm:$0xff]  ;;  %v10435_v9 = vcombine.low %v459_v61, %v463_v62  ;;  %v515_v62 = vld [vmem:[%s16227_s1 + $0xe80] sm:$0xff] }
  0xb7   :  { %6429 = vmatprep.subr.bf16.mxu0 %v10388_v10  ;;  %6773 = vmatprep.subr.bf16.mxu1 %v10390_v11  ;;  %v10437_v10 = vcombine.low %v460_v63, %v464_v0  ;;  %v10444_v11 = vcombine.high %v467_v5, %v471_v6  ;;  %v10446_v12 = vcombine.high %v468_v7, %v472_v8  ;;  %v519_v63 = vld [vmem:[%s16227_s1 + $0xea0] sm:$0xff]  ;;  %v516_v0 = vld [vmem:[%s16227_s1 + $0xe88] sm:$0xff] }
  0xba   :  { %6430 = vmatpush1.bf16.msra.mxu0 %v10387_v19  ;;  %6774 = vmatpush1.bf16.msra.mxu1 %v10389_v53  ;;  %v480_v19 = vld [vmem:[%s16227_s1 + $0xd68] sm:$0xff]  ;;  %v10443_v53 = vcombine.low %v467_v5, %v471_v6  ;;  %v523_v6 = vld [vmem:[%s16227_s1 + $0xec0] sm:$0xff] }
  0xbb   :  { %6431 = vmatprep.subr.bf16.mxu0 %v10396_v54  ;;  %6775 = vmatprep.subr.bf16.mxu1 %v10398_v20  ;;  %v10445_v54 = vcombine.low %v468_v7, %v472_v8  ;;  %v10452_v20 = vcombine.high %v475_v13, %v479_v14  ;;  %v10454_v21 = vcombine.high %v476_v16, %v480_v19  ;;  %v527_v7 = vld [vmem:[%s16227_s1 + $0xee0] sm:$0xff]  ;;  %v524_v8 = vld [vmem:[%s16227_s1 + $0xec8] sm:$0xff] }
  0xbe   :  { %6432 = vmatpush1.bf16.msra.mxu0 %v10395_v26  ;;  %6776 = vmatpush1.bf16.msra.mxu1 %v10397_v28  ;;  %v488_v26 = vld [vmem:[%s16227_s1 + $0xda8] sm:$0xff]  ;;  %v10451_v28 = vcombine.low %v475_v13, %v479_v14  ;;  %v531_v14 = vld [vmem:[%s16227_s1 + $0xf00] sm:$0xff] }
  0xbf   :  { %6433 = vmatprep.subr.bf16.mxu0 %v10404_v31  ;;  %6777 = vmatprep.subr.bf16.mxu1 %v10406_v17  ;;  %v10453_v31 = vcombine.low %v476_v16, %v480_v19  ;;  %v10460_v17 = vcombine.high %v483_v22, %v487_v24  ;;  %v10462_v18 = vcombine.high %v484_v25, %v488_v26  ;;  %v535_v16 = vld [vmem:[%s16227_s1 + $0xf20] sm:$0xff]  ;;  %v532_v19 = vld [vmem:[%s16227_s1 + $0xf08] sm:$0xff] }
  0xc2   :  { %6434 = vmatpush1.bf16.msra.mxu0 %v10403_v36  ;;  %6778 = vmatpush1.bf16.msra.mxu1 %v10405_v37  ;;  %v496_v36 = vld [vmem:[%s16227_s1 + $0xde8] sm:$0xff]  ;;  %v10459_v37 = vcombine.low %v483_v22, %v487_v24  ;;  %v539_v24 = vld [vmem:[%s16227_s1 + $0xf40] sm:$0xff] }
  0xc3   :  { %6446 = vmatprep.subr.bf16.mxu0 %v10412_v38  ;;  %6790 = vmatprep.subr.bf16.mxu1 %v10414_v39  ;;  %v10461_v38 = vcombine.low %v484_v25, %v488_v26  ;;  %v10468_v39 = vcombine.high %v491_v32, %v495_v33  ;;  %v10470_v40 = vcombine.high %v492_v34, %v496_v36  ;;  %v543_v25 = vld [vmem:[%s16227_s1 + $0xf60] sm:$0xff]  ;;  %v540_v26 = vld [vmem:[%s16227_s1 + $0xf48] sm:$0xff] }
  0xc5   :  { %6436 = vmatmul.mubr.bf16.vlgmr.msra.gmra.mrb[0].mxu0 %v12672_v43  ;;  %6780 = vmatmul.mubr.bf16.vlgmr.msra.gmra.mrb[0].mxu1 %v12672_v43 }
  0xc6   :  { %6447 = vmatpush1.bf16.msra.mxu0 %v10411_v47  ;;  %6791 = vmatpush1.bf16.msra.mxu1 %v10413_v29  ;;  %v504_v47 = vld [vmem:[%s16227_s1 + $0xe28] sm:$0xff]  ;;  %v10467_v29 = vcombine.low %v491_v32, %v495_v33  ;;  %v547_v33 = vld [vmem:[%s16227_s1 + $0xf80] sm:$0xff] }
  0xc7   :  { %6448 = vmatprep.subr.bf16.mxu0 %v10420_v30  ;;  %6792 = vmatprep.subr.bf16.mxu1 %v10422_v48  ;;  %v10469_v30 = vcombine.low %v492_v34, %v496_v36  ;;  %v10476_v48 = vcombine.high %v499_v41, %v503_v42  ;;  %v10478_v49 = vcombine.high %v500_v44, %v504_v47  ;;  %v551_v34 = vld [vmem:[%s16227_s1 + $0xfa0] sm:$0xff]  ;;  %v548_v36 = vld [vmem:[%s16227_s1 + $0xf88] sm:$0xff] }
  0xc8   :  { %6478 = vmatprep.mubr.bf16.mxu0 %v12695_v51  ;;  %6822 = vmatprep.mubr.bf16.mxu1 %v12695_v51 }
  0xca   :  { %6449 = vmatpush1.bf16.msra.mxu0 %v10419_v56  ;;  %6793 = vmatpush1.bf16.msra.mxu1 %v10421_v57  ;;  %v512_v56 = vld [vmem:[%s16227_s1 + $0xe68] sm:$0xff]  ;;  %v10475_v57 = vcombine.low %v499_v41, %v503_v42  ;;  %v555_v42 = vld [vmem:[%s16227_s1 + $0xfc0] sm:$0xff] }
  0xcb   :  { %6450 = vmatprep.subr.bf16.mxu0 %v10428_v59  ;;  %6794 = vmatprep.subr.bf16.mxu1 %v10430_v60  ;;  %v10477_v59 = vcombine.low %v500_v44, %v504_v47  ;;  %v10484_v60 = vcombine.high %v507_v50, %v511_v52  ;;  %v10486_v61 = vcombine.high %v508_v55, %v512_v56  ;;  %v559_v44 = vld [vmem:[%s16227_s1 + $0xfe0] sm:$0xff]  ;;  %v556_v47 = vld [vmem:[%s16227_s1 + $0xfc8] sm:$0xff] }
  0xce   :  { %6451 = vmatpush1.bf16.msra.mxu0 %v10427_v1  ;;  %6795 = vmatpush1.bf16.msra.mxu1 %v10429_v2  ;;  %v520_v1 = vld [vmem:[%s16227_s1 + $0xea8] sm:$0xff]  ;;  %v10483_v2 = vcombine.low %v507_v50, %v511_v52  ;;  %v563_v52 = vld [vmem:[%s16227_s1 + $0x1000] sm:$0xff] }
  0xcf   :  { %6452 = vmatprep.subr.bf16.mxu0 %v10436_v3  ;;  %6796 = vmatprep.subr.bf16.mxu1 %v10438_v4  ;;  %v10485_v3 = vcombine.low %v508_v55, %v512_v56  ;;  %v10492_v4 = vcombine.high %v515_v62, %v519_v63  ;;  %v10494_v5 = vcombine.high %v516_v0, %v520_v1  ;;  %v567_v55 = vld [vmem:[%s16227_s1 + $0x1020] sm:$0xff]  ;;  %v564_v56 = vld [vmem:[%s16227_s1 + $0x1008] sm:$0xff] }
  0xd2   :  { %6453 = vmatpush1.bf16.msra.mxu0 %v10435_v9  ;;  %6797 = vmatpush1.bf16.msra.mxu1 %v10437_v10  ;;  %v528_v9 = vld [vmem:[%s16227_s1 + $0xee8] sm:$0xff]  ;;  %v10491_v10 = vcombine.low %v515_v62, %v519_v63  ;;  %v571_v63 = vld [vmem:[%s16227_s1 + $0x1040] sm:$0xff] }
  0xd3   :  { %6454 = vmatprep.subr.bf16.mxu0 %v10444_v11  ;;  %6798 = vmatprep.subr.bf16.mxu1 %v10446_v12  ;;  %v10493_v11 = vcombine.low %v516_v0, %v520_v1  ;;  %v10500_v12 = vcombine.high %v523_v6, %v527_v7  ;;  %v10502_v13 = vcombine.high %v524_v8, %v528_v9  ;;  %v575_v0 = vld [vmem:[%s16227_s1 + $0x1060] sm:$0xff]  ;;  %v572_v1 = vld [vmem:[%s16227_s1 + $0x1048] sm:$0xff] }
  0xd6   :  { %6455 = vmatpush1.bf16.msra.mxu0 %v10443_v53  ;;  %6799 = vmatpush1.bf16.msra.mxu1 %v10445_v54  ;;  %v536_v53 = vld [vmem:[%s16227_s1 + $0xf28] sm:$0xff]  ;;  %v10499_v54 = vcombine.low %v523_v6, %v527_v7  ;;  %v10539_v6 = vcombine.low %v563_v52, %v567_v55 }
  0xd7   :  { %6456 = vmatprep.subr.bf16.mxu0 %v10452_v20  ;;  %6800 = vmatprep.subr.bf16.mxu1 %v10454_v21  ;;  %v10501_v20 = vcombine.low %v524_v8, %v528_v9  ;;  %v10508_v21 = vcombine.high %v531_v14, %v535_v16  ;;  %v10510_v22 = vcombine.high %v532_v19, %v536_v53  ;;  %v579_v8 = vld [vmem:[%s16227_s1 + $0x1080] sm:$0xff] }
  0xd8   :  { %v583_v9 = vld [vmem:[%s16227_s1 + $0x10a0] sm:$0xff] }
  0xda   :  { %6457 = vmatpush1.bf16.msra.mxu0 %v10451_v28  ;;  %6801 = vmatpush1.bf16.msra.mxu1 %v10453_v31  ;;  %v544_v28 = vld [vmem:[%s16227_s1 + $0xf68] sm:$0xff]  ;;  %v10507_v31 = vcombine.low %v531_v14, %v535_v16  ;;  %v10556_v16 = vcombine.high %v579_v8, %v583_v9 }
  0xdb   :  { %6458 = vmatprep.subr.bf16.mxu0 %v10460_v17  ;;  %6802 = vmatprep.subr.bf16.mxu1 %v10462_v18  ;;  %v10509_v17 = vcombine.low %v532_v19, %v536_v53  ;;  %v10516_v18 = vcombine.high %v539_v24, %v543_v25  ;;  %v10518_v32 = vcombine.high %v540_v26, %v544_v28  ;;  %v587_v53 = vld [vmem:[%s16227_s1 + $0x10c0] sm:$0xff] }
  0xde   :  { %6459 = vmatpush1.bf16.msra.mxu0 %v10459_v37  ;;  %6803 = vmatpush1.bf16.msra.mxu1 %v10461_v38  ;;  %v552_v37 = vld [vmem:[%s16227_s1 + $0xfa8] sm:$0xff]  ;;  %v10515_v38 = vcombine.low %v539_v24, %v543_v25 }
  0xdf   :  { %6460 = vmatprep.subr.bf16.mxu0 %v10468_v39  ;;  %6804 = vmatprep.subr.bf16.mxu1 %v10470_v40  ;;  %v10517_v39 = vcombine.low %v540_v26, %v544_v28  ;;  %v10524_v40 = vcombine.high %v547_v33, %v551_v34  ;;  %v10526_v41 = vcombine.high %v548_v36, %v552_v37  ;;  %v595_v28 = vld [vmem:[%s16227_s1 + $0x1100] sm:$0xff] }
  0xe2   :  { %6461 = vmatpush1.bf16.msra.mxu0 %v10467_v29  ;;  %6805 = vmatpush1.bf16.msra.mxu1 %v10469_v30  ;;  %v560_v29 = vld [vmem:[%s16227_s1 + $0xfe8] sm:$0xff]  ;;  %v10523_v30 = vcombine.low %v547_v33, %v551_v34 }
  0xe3   :  { %6462 = vmatprep.subr.bf16.mxu0 %v10476_v48  ;;  %6806 = vmatprep.subr.bf16.mxu1 %v10478_v49  ;;  %v10525_v48 = vcombine.low %v548_v36, %v552_v37  ;;  %v10532_v49 = vcombine.high %v555_v42, %v559_v44  ;;  %v10534_v50 = vcombine.high %v556_v47, %v560_v29  ;;  %v603_v37 = vld [vmem:[%s16227_s1 + $0x1140] sm:$0xff] }
  0xe6   :  { %6463 = vmatpush1.bf16.msra.mxu0 %v10475_v57  ;;  %6807 = vmatpush1.bf16.msra.mxu1 %v10477_v59  ;;  %v568_v57 = vld [vmem:[%s16227_s1 + $0x1028] sm:$0xff]  ;;  %v10531_v59 = vcombine.low %v555_v42, %v559_v44 }
  0xe7   :  { %6464 = vmatprep.subr.bf16.mxu0 %v10484_v60  ;;  %6808 = vmatprep.subr.bf16.mxu1 %v10486_v61  ;;  %v10533_v60 = vcombine.low %v556_v47, %v560_v29  ;;  %v10540_v61 = vcombine.high %v563_v52, %v567_v55  ;;  %v10542_v62 = vcombine.high %v564_v56, %v568_v57  ;;  %v611_v29 = vld [vmem:[%s16227_s1 + $0x1180] sm:$0xff] }
  0xea   :  { %6465 = vmatpush1.bf16.msra.mxu0 %v10483_v2  ;;  %6809 = vmatpush1.bf16.msra.mxu1 %v10485_v3  ;;  %v12886_v2 = vcombine.low %v12680_v45, %v12685_v46  ;;  %v576_v3 = vld [vmem:[%s16227_s1 + $0x1068] sm:$0xff]  ;;  %v10541_v45 = vcombine.low %v564_v56, %v568_v57  ;;  %v10548_v46 = vcombine.high %v571_v63, %v575_v0  ;;  %v619_v57 = vld [vmem:[%s16227_s1 + $0x11c0] sm:$0xff] }
  0xeb   :  { %6466 = vmatprep.subr.bf16.mxu0 %v10492_v4  ;;  %6810 = vmatprep.subr.bf16.mxu1 %v10494_v5  ;;  %v12894_v4 = vld [vmem:[%s16228_s0 + $0x20] sm:$0xff]  ;;  %v10550_v7 = vcombine.high %v572_v1, %v576_v3  ;;  %v10549_v14 = vcombine.low %v572_v1, %v576_v3 }
  0xec   :  { %v12899_v5 = vld [vmem:[%s16228_s0 + $0x60] sm:$0xff] }
  0xed   :  { %v627_v3 = vld [vmem:[%s16227_s1 + $0x1200] sm:$0xff] }
  0xee   :  { %6467 = vmatpush1.bf16.msra.mxu0 %v10491_v10  ;;  %6811 = vmatpush1.bf16.msra.mxu1 %v10493_v11  ;;  %v12909_v10 = vcombine.high %v12894_v4, %v12899_v5  ;;  %v580_v11 = vld [vmem:[%s16227_s1 + $0x1088] sm:$0xff] }
  0xef   :  { %6468 = vmatprep.subr.bf16.mxu0 %v10500_v12  ;;  %6812 = vmatprep.subr.bf16.mxu1 %v10502_v13  ;;  %v584_v12 = vld [vmem:[%s16227_s1 + $0x10a8] sm:$0xff]  ;;  %v10547_v13 = vcombine.low %v571_v63, %v575_v0 }
  0xf0   :  { %v10558_v19 = vcombine.high %v580_v11, %v584_v12  ;;  %v10557_v24 = vcombine.low %v580_v11, %v584_v12  ;;  %v635_v12 = vld [vmem:[%s16227_s1 + $0x1240] sm:$0xff] }
  0xf2   :  { %6469 = vmatpush1.bf16.msra.mxu0 %v10499_v54  ;;  %6813 = vmatpush1.bf16.msra.mxu1 %v10501_v20  ;;  %v591_v54 = vld [vmem:[%s16227_s1 + $0x10e0] sm:$0xff]  ;;  %v588_v20 = vld [vmem:[%s16227_s1 + $0x10c8] sm:$0xff] }
  0xf3   :  { %6470 = vmatprep.subr.bf16.mxu0 %v10508_v21  ;;  %6814 = vmatprep.subr.bf16.mxu1 %v10510_v22  ;;  %v592_v21 = vld [vmem:[%s16227_s1 + $0x10e8] sm:$0xff]  ;;  %v10555_v22 = vcombine.low %v579_v8, %v583_v9  ;;  %v10564_v25 = vcombine.high %v587_v53, %v591_v54 }
  0xf4   :  { %v10566_v26 = vcombine.high %v588_v20, %v592_v21  ;;  %v10565_v33 = vcombine.low %v588_v20, %v592_v21  ;;  %v643_v21 = vld [vmem:[%s16227_s1 + $0x1280] sm:$0xff] }
  0xf6   :  { %6471 = vmatpush1.bf16.msra.mxu0 %v10507_v31  ;;  %6815 = vmatpush1.bf16.msra.mxu1 %v10509_v17  ;;  %v599_v31 = vld [vmem:[%s16227_s1 + $0x1120] sm:$0xff]  ;;  %v596_v17 = vld [vmem:[%s16227_s1 + $0x1108] sm:$0xff] }
  0xf7   :  { %6472 = vmatprep.subr.bf16.mxu0 %v10516_v18  ;;  %6816 = vmatprep.subr.bf16.mxu1 %v10518_v32  ;;  %v600_v18 = vld [vmem:[%s16227_s1 + $0x1128] sm:$0xff]  ;;  %v10563_v32 = vcombine.low %v587_v53, %v591_v54  ;;  %v10572_v34 = vcombine.high %v595_v28, %v599_v31 }
  0xf8   :  { %v10574_v36 = vcombine.high %v596_v17, %v600_v18  ;;  %v10573_v42 = vcombine.low %v596_v17, %v600_v18  ;;  %v651_v18 = vld [vmem:[%s16227_s1 + $0x12c0] sm:$0xff] }
  0xfa   :  { %6473 = vmatpush1.bf16.msra.mxu0 %v10515_v38  ;;  %6817 = vmatpush1.bf16.msra.mxu1 %v10517_v39  ;;  %v607_v38 = vld [vmem:[%s16227_s1 + $0x1160] sm:$0xff]  ;;  %v604_v39 = vld [vmem:[%s16227_s1 + $0x1148] sm:$0xff] }
  0xfb   :  { %6474 = vmatprep.subr.bf16.mxu0 %v10524_v40  ;;  %6818 = vmatprep.subr.bf16.mxu1 %v10526_v41  ;;  %v608_v40 = vld [vmem:[%s16227_s1 + $0x1168] sm:$0xff]  ;;  %v10571_v41 = vcombine.low %v595_v28, %v599_v31  ;;  %v10580_v44 = vcombine.high %v603_v37, %v607_v38 }
  0xfc   :  { %v10582_v47 = vcombine.high %v604_v39, %v608_v40  ;;  %v10581_v52 = vcombine.low %v604_v39, %v608_v40  ;;  %v659_v40 = vld [vmem:[%s16227_s1 + $0x1300] sm:$0xff] }
  0xfe   :  { %6475 = vmatpush1.bf16.msra.mxu0 %v10523_v30  ;;  %6819 = vmatpush1.bf16.msra.mxu1 %v10525_v48  ;;  %v615_v30 = vld [vmem:[%s16227_s1 + $0x11a0] sm:$0xff]  ;;  %v612_v48 = vld [vmem:[%s16227_s1 + $0x1188] sm:$0xff] }
  0xff   :  { %6476 = vmatprep.subr.bf16.mxu0 %v10532_v49  ;;  %6820 = vmatprep.subr.bf16.mxu1 %v10534_v50  ;;  %v616_v49 = vld [vmem:[%s16227_s1 + $0x11a8] sm:$0xff]  ;;  %v10579_v50 = vcombine.low %v603_v37, %v607_v38  ;;  %v10588_v55 = vcombine.high %v611_v29, %v615_v30 }
 0x100   :  { %v10590_v56 = vcombine.high %v612_v48, %v616_v49  ;;  %v10589_v63 = vcombine.low %v612_v48, %v616_v49  ;;  %v667_v49 = vld [vmem:[%s16227_s1 + $0x1340] sm:$0xff] }
 0x102   :  { %6477 = vmatpush1.bf16.msra.mxu0 %v10531_v59  ;;  %6821 = vmatpush1.bf16.msra.mxu1 %v10533_v60  ;;  %v623_v59 = vld [vmem:[%s16227_s1 + $0x11e0] sm:$0xff]  ;;  %v620_v60 = vld [vmem:[%s16227_s1 + $0x11c8] sm:$0xff] }
 0x103   :  { %6489 = vmatprep.subr.bf16.mxu0 %v10540_v61  ;;  %6833 = vmatprep.subr.bf16.mxu1 %v10542_v62  ;;  %v624_v61 = vld [vmem:[%s16227_s1 + $0x11e8] sm:$0xff]  ;;  %v10587_v62 = vcombine.low %v611_v29, %v615_v30  ;;  %v10596_v0 = vcombine.high %v619_v57, %v623_v59 }
 0x104   :  { %v10598_v1 = vcombine.high %v620_v60, %v624_v61  ;;  %v10597_v8 = vcombine.low %v620_v60, %v624_v61  ;;  %v675_v61 = vld [vmem:[%s16227_s1 + $0x1380] sm:$0xff] }
 0x105   :  { %6479 = vmatmul.mubr.bf16.vlgmr.msra.gmra.mrb[0].mxu0 %v12886_v2  ;;  %6823 = vmatmul.mubr.bf16.vlgmr.msra.gmra.mrb[0].mxu1 %v12886_v2 }
 0x106   :  { %6490 = vmatpush1.bf16.msra.mxu0 %v10539_v6  ;;  %6834 = vmatpush1.bf16.msra.mxu1 %v10541_v45  ;;  %v631_v6 = vld [vmem:[%s16227_s1 + $0x1220] sm:$0xff]  ;;  %v628_v45 = vld [vmem:[%s16227_s1 + $0x1208] sm:$0xff] }
 0x107   :  { %6491 = vmatprep.subr.bf16.mxu0 %v10548_v46  ;;  %6835 = vmatprep.subr.bf16.mxu1 %v10550_v7  ;;  %v632_v46 = vld [vmem:[%s16227_s1 + $0x1228] sm:$0xff]  ;;  %v10595_v7 = vcombine.low %v619_v57, %v623_v59  ;;  %v10604_v9 = vcombine.high %v627_v3, %v631_v6 }
 0x108   :  { %6521 = vmatprep.mubr.bf16.mxu0 %v12909_v10  ;;  %6865 = vmatprep.mubr.bf16.mxu1 %v12909_v10  ;;  %v10606_v11 = vcombine.high %v628_v45, %v632_v46  ;;  %v10605_v53 = vcombine.low %v628_v45, %v632_v46  ;;  %v683_v46 = vld [vmem:[%s16227_s1 + $0x13c0] sm:$0xff] }
 0x10a   :  { %6492 = vmatpush1.bf16.msra.mxu0 %v10547_v13  ;;  %6836 = vmatpush1.bf16.msra.mxu1 %v10549_v14  ;;  %v639_v13 = vld [vmem:[%s16227_s1 + $0x1260] sm:$0xff]  ;;  %v636_v14 = vld [vmem:[%s16227_s1 + $0x1248] sm:$0xff] }
 0x10b   :  { %6493 = vmatprep.subr.bf16.mxu0 %v10556_v16  ;;  %6837 = vmatprep.subr.bf16.mxu1 %v10558_v19  ;;  %v640_v16 = vld [vmem:[%s16227_s1 + $0x1268] sm:$0xff]  ;;  %v10603_v19 = vcombine.low %v627_v3, %v631_v6  ;;  %v10612_v54 = vcombine.high %v635_v12, %v639_v13 }
 0x10c   :  { %v10614_v20 = vcombine.high %v636_v14, %v640_v16  ;;  %v10613_v28 = vcombine.low %v636_v14, %v640_v16  ;;  %v691_v16 = vld [vmem:[%s16227_s1 + $0x1400] sm:$0xff] }
 0x10e   :  { %6494 = vmatpush1.bf16.msra.mxu0 %v10555_v22  ;;  %6838 = vmatpush1.bf16.msra.mxu1 %v10557_v24  ;;  %v647_v22 = vld [vmem:[%s16227_s1 + $0x12a0] sm:$0xff]  ;;  %v644_v24 = vld [vmem:[%s16227_s1 + $0x1288] sm:$0xff] }
 0x10f   :  { %6495 = vmatprep.subr.bf16.mxu0 %v10564_v25  ;;  %6839 = vmatprep.subr.bf16.mxu1 %v10566_v26  ;;  %v648_v25 = vld [vmem:[%s16227_s1 + $0x12a8] sm:$0xff]  ;;  %v10611_v26 = vcombine.low %v635_v12, %v639_v13  ;;  %v10620_v31 = vcombine.high %v643_v21, %v647_v22 }
 0x110   :  { %v10622_v17 = vcombine.high %v644_v24, %v648_v25  ;;  %v10621_v37 = vcombine.low %v644_v24, %v648_v25  ;;  %v699_v25 = vld [vmem:[%s16227_s1 + $0x1440] sm:$0xff] }
 0x112   :  { %6496 = vmatpush1.bf16.msra.mxu0 %v10563_v32  ;;  %6840 = vmatpush1.bf16.msra.mxu1 %v10565_v33  ;;  %v655_v32 = vld [vmem:[%s16227_s1 + $0x12e0] sm:$0xff]  ;;  %v652_v33 = vld [vmem:[%s16227_s1 + $0x12c8] sm:$0xff] }
 0x113   :  { %6497 = vmatprep.subr.bf16.mxu0 %v10572_v34  ;;  %6841 = vmatprep.subr.bf16.mxu1 %v10574_v36  ;;  %v656_v34 = vld [vmem:[%s16227_s1 + $0x12e8] sm:$0xff]  ;;  %v10619_v36 = vcombine.low %v643_v21, %v647_v22  ;;  %v10628_v38 = vcombine.high %v651_v18, %v655_v32 }
 0x114   :  { %v10630_v39 = vcombine.high %v652_v33, %v656_v34  ;;  %v10629_v29 = vcombine.low %v652_v33, %v656_v34 }
 0x116   :  { %6498 = vmatpush1.bf16.msra.mxu0 %v10571_v41  ;;  %6842 = vmatpush1.bf16.msra.mxu1 %v10573_v42  ;;  %v663_v41 = vld [vmem:[%s16227_s1 + $0x1320] sm:$0xff]  ;;  %v660_v42 = vld [vmem:[%s16227_s1 + $0x1308] sm:$0xff] }
 0x117   :  { %6499 = vmatprep.subr.bf16.mxu0 %v10580_v44  ;;  %6843 = vmatprep.subr.bf16.mxu1 %v10582_v47  ;;  %v664_v44 = vld [vmem:[%s16227_s1 + $0x1328] sm:$0xff]  ;;  %v10627_v47 = vcombine.low %v651_v18, %v655_v32  ;;  %v10636_v30 = vcombine.high %v659_v40, %v663_v41 }
 0x118   :  { %v10638_v48 = vcombine.high %v660_v42, %v664_v44  ;;  %v10637_v57 = vcombine.low %v660_v42, %v664_v44  ;;  %v13108_v18 = vld [vmem:[%s16228_s0 + $0x28] sm:$0xff] }
 0x119   :  { %v13113_v32 = vld [vmem:[%s16228_s0 + $0x68] sm:$0xff] }
 0x11a   :  { %6500 = vmatpush1.bf16.msra.mxu0 %v10579_v50  ;;  %6844 = vmatpush1.bf16.msra.mxu1 %v10581_v52  ;;  %v671_v50 = vld [vmem:[%s16227_s1 + $0x1360] sm:$0xff]  ;;  %v668_v52 = vld [vmem:[%s16227_s1 + $0x1348] sm:$0xff] }
 0x11b   :  { %6501 = vmatprep.subr.bf16.mxu0 %v10588_v55  ;;  %6845 = vmatprep.subr.bf16.mxu1 %v10590_v56  ;;  %v672_v55 = vld [vmem:[%s16227_s1 + $0x1368] sm:$0xff]  ;;  %v10635_v56 = vcombine.low %v659_v40, %v663_v41  ;;  %v10644_v59 = vcombine.high %v667_v49, %v671_v50 }
 0x11c   :  { %v10646_v60 = vcombine.high %v668_v52, %v672_v55  ;;  %v10645_v3 = vcombine.low %v668_v52, %v672_v55  ;;  %v712_v40 = vld [vmem:[%s16227_s1 + $0x14a8] sm:$0xff] }
 0x11e   :  { %6502 = vmatpush1.bf16.msra.mxu0 %v10587_v62  ;;  %6846 = vmatpush1.bf16.msra.mxu1 %v10589_v63  ;;  %v679_v62 = vld [vmem:[%s16227_s1 + $0x13a0] sm:$0xff]  ;;  %v676_v63 = vld [vmem:[%s16227_s1 + $0x1388] sm:$0xff] }
 0x11f   :  { %6503 = vmatprep.subr.bf16.mxu0 %v10596_v0  ;;  %6847 = vmatprep.subr.bf16.mxu1 %v10598_v1  ;;  %v680_v0 = vld [vmem:[%s16227_s1 + $0x13a8] sm:$0xff]  ;;  %v10643_v1 = vcombine.low %v667_v49, %v671_v50  ;;  %v10652_v6 = vcombine.high %v675_v61, %v679_v62 }
 0x120   :  { %v10654_v45 = vcombine.high %v676_v63, %v680_v0  ;;  %v10653_v12 = vcombine.low %v676_v63, %v680_v0  ;;  %v720_v49 = vld [vmem:[%s16227_s1 + $0x14e8] sm:$0xff] }
 0x122   :  { %6504 = vmatpush1.bf16.msra.mxu0 %v10595_v7  ;;  %6848 = vmatpush1.bf16.msra.mxu1 %v10597_v8  ;;  %v687_v7 = vld [vmem:[%s16227_s1 + $0x13e0] sm:$0xff]  ;;  %v684_v8 = vld [vmem:[%s16227_s1 + $0x13c8] sm:$0xff] }
 0x123   :  { %6505 = vmatprep.subr.bf16.mxu0 %v10604_v9  ;;  %6849 = vmatprep.subr.bf16.mxu1 %v10606_v11  ;;  %v688_v9 = vld [vmem:[%s16227_s1 + $0x13e8] sm:$0xff]  ;;  %v10651_v11 = vcombine.low %v675_v61, %v679_v62  ;;  %v10660_v13 = vcombine.high %v683_v46, %v687_v7 }
 0x124   :  { %v10662_v14 = vcombine.high %v684_v8, %v688_v9  ;;  %v10661_v21 = vcombine.low %v684_v8, %v688_v9  ;;  %v728_v61 = vld [vmem:[%s16227_s1 + $0x1528] sm:$0xff] }
 0x126   :  { %6506 = vmatpush1.bf16.msra.mxu0 %v10603_v19  ;;  %6850 = vmatpush1.bf16.msra.mxu1 %v10605_v53  ;;  %v695_v19 = vld [vmem:[%s16227_s1 + $0x1420] sm:$0xff]  ;;  %v692_v53 = vld [vmem:[%s16227_s1 + $0x1408] sm:$0xff] }
 0x127   :  { %6507 = vmatprep.subr.bf16.mxu0 %v10612_v54  ;;  %6851 = vmatprep.subr.bf16.mxu1 %v10614_v20  ;;  %v696_v54 = vld [vmem:[%s16227_s1 + $0x1428] sm:$0xff]  ;;  %v10659_v20 = vcombine.low %v683_v46, %v687_v7  ;;  %v10668_v22 = vcombine.high %v691_v16, %v695_v19  ;;  %v10667_v33 = vcombine.low %v691_v16, %v695_v19 }
 0x128   :  { %v10670_v24 = vcombine.high %v692_v53, %v696_v54  ;;  %v736_v46 = vld [vmem:[%s16227_s1 + $0x1568] sm:$0xff] }
 0x129   :  { %v744_v16 = vld [vmem:[%s16227_s1 + $0x15a8] sm:$0xff] }
 0x12a   :  { %6508 = vmatpush1.bf16.msra.mxu0 %v10611_v26  ;;  %6852 = vmatpush1.bf16.msra.mxu1 %v10613_v28  ;;  %v703_v26 = vld [vmem:[%s16227_s1 + $0x1460] sm:$0xff]  ;;  %v700_v28 = vld [vmem:[%s16227_s1 + $0x1448] sm:$0xff] }
 0x12b   :  { %6509 = vmatprep.subr.bf16.mxu0 %v10620_v31  ;;  %6853 = vmatprep.subr.bf16.mxu1 %v10622_v17  ;;  %v13100_v31 = vcombine.low %v12894_v4, %v12899_v5  ;;  %v704_v17 = vld [vmem:[%s16227_s1 + $0x1468] sm:$0xff]  ;;  %v10669_v4 = vcombine.low %v692_v53, %v696_v54  ;;  %v10676_v5 = vcombine.high %v699_v25, %v703_v26 }
 0x12c   :  { %v10678_v34 = vcombine.high %v700_v28, %v704_v17  ;;  %v10675_v41 = vcombine.low %v699_v25, %v703_v26  ;;  %v10677_v42 = vcombine.low %v700_v28, %v704_v17  ;;  %v752_v25 = vld [vmem:[%s16227_s1 + $0x15e8] sm:$0xff] }
 0x12e   :  { %6510 = vmatpush1.bf16.msra.mxu0 %v10619_v36  ;;  %6854 = vmatpush1.bf16.msra.mxu1 %v10621_v37  ;;  %v707_v36 = vld [vmem:[%s16227_s1 + $0x1480] sm:$0xff] }
 0x12f   :  { %6511 = vmatprep.subr.bf16.mxu0 %v10628_v38  ;;  %6855 = vmatprep.subr.bf16.mxu1 %v10630_v39  ;;  %v711_v37 = vld [vmem:[%s16227_s1 + $0x14a0] sm:$0xff]  ;;  %v13123_v38 = vcombine.high %v13108_v18, %v13113_v32  ;;  %v708_v39 = vld [vmem:[%s16227_s1 + $0x1488] sm:$0xff] }
 0x130   :  { %v10684_v44 = vcombine.high %v707_v36, %v711_v37  ;;  %v10683_v50 = vcombine.low %v707_v36, %v711_v37  ;;  %v10685_v52 = vcombine.low %v708_v39, %v712_v40  ;;  %v760_v36 = vld [vmem:[%s16227_s1 + $0x1628] sm:$0xff] }
 0x132   :  { %6512 = vmatpush1.bf16.msra.mxu0 %v10627_v47  ;;  %6856 = vmatpush1.bf16.msra.mxu1 %v10629_v29  ;;  %v10686_v47 = vcombine.high %v708_v39, %v712_v40  ;;  %v715_v29 = vld [vmem:[%s16227_s1 + $0x14c0] sm:$0xff] }
 0x133   :  { %6513 = vmatprep.subr.bf16.mxu0 %v10636_v30  ;;  %6857 = vmatprep.subr.bf16.mxu1 %v10638_v48  ;;  %v719_v30 = vld [vmem:[%s16227_s1 + $0x14e0] sm:$0xff]  ;;  %v716_v48 = vld [vmem:[%s16227_s1 + $0x14c8] sm:$0xff] }
 0x134   :  { %v10692_v55 = vcombine.high %v715_v29, %v719_v30  ;;  %v10691_v62 = vcombine.low %v715_v29, %v719_v30  ;;  %v10693_v63 = vcombine.low %v716_v48, %v720_v49  ;;  %v768_v29 = vld [vmem:[%s16227_s1 + $0x1668] sm:$0xff] }
 0x136   :  { %6514 = vmatpush1.bf16.msra.mxu0 %v10635_v56  ;;  %6858 = vmatpush1.bf16.msra.mxu1 %v10637_v57  ;;  %v10694_v56 = vcombine.high %v716_v48, %v720_v49  ;;  %v723_v57 = vld [vmem:[%s16227_s1 + $0x1500] sm:$0xff] }
 0x137   :  { %6515 = vmatprep.subr.bf16.mxu0 %v10644_v59  ;;  %6859 = vmatprep.subr.bf16.mxu1 %v10646_v60  ;;  %v727_v59 = vld [vmem:[%s16227_s1 + $0x1520] sm:$0xff]  ;;  %v724_v60 = vld [vmem:[%s16227_s1 + $0x1508] sm:$0xff] }
 0x138   :  { %v10700_v0 = vcombine.high %v723_v57, %v727_v59  ;;  %v10699_v7 = vcombine.low %v723_v57, %v727_v59  ;;  %v10701_v8 = vcombine.low %v724_v60, %v728_v61  ;;  %v776_v57 = vld [vmem:[%s16227_s1 + $0x16a8] sm:$0xff] }
 0x13a   :  { %6516 = vmatpush1.bf16.msra.mxu0 %v10643_v1  ;;  %6860 = vmatpush1.bf16.msra.mxu1 %v10645_v3  ;;  %v10702_v1 = vcombine.high %v724_v60, %v728_v61  ;;  %v731_v3 = vld [vmem:[%s16227_s1 + $0x1540] sm:$0xff] }
 0x13b   :  { %6517 = vmatprep.subr.bf16.mxu0 %v10652_v6  ;;  %6861 = vmatprep.subr.bf16.mxu1 %v10654_v45  ;;  %v735_v6 = vld [vmem:[%s16227_s1 + $0x1560] sm:$0xff]  ;;  %v732_v45 = vld [vmem:[%s16227_s1 + $0x1548] sm:$0xff] }
 0x13c   :  { %v10708_v9 = vcombine.high %v731_v3, %v735_v6  ;;  %v10707_v19 = vcombine.low %v731_v3, %v735_v6  ;;  %v10709_v53 = vcombine.low %v732_v45, %v736_v46  ;;  %v784_v3 = vld [vmem:[%s16227_s1 + $0x16e8] sm:$0xff] }
 0x13e   :  { %6518 = vmatpush1.bf16.msra.mxu0 %v10651_v11  ;;  %6862 = vmatpush1.bf16.msra.mxu1 %v10653_v12  ;;  %v10710_v11 = vcombine.high %v732_v45, %v736_v46  ;;  %v739_v12 = vld [vmem:[%s16227_s1 + $0x1580] sm:$0xff] }
 0x13f   :  { %6519 = vmatprep.subr.bf16.mxu0 %v10660_v13  ;;  %6863 = vmatprep.subr.bf16.mxu1 %v10662_v14  ;;  %v743_v13 = vld [vmem:[%s16227_s1 + $0x15a0] sm:$0xff]  ;;  %v740_v14 = vld [vmem:[%s16227_s1 + $0x1588] sm:$0xff] }
 0x140   :  { %v10716_v54 = vcombine.high %v739_v12, %v743_v13  ;;  %v10715_v26 = vcombine.low %v739_v12, %v743_v13  ;;  %v10717_v28 = vcombine.low %v740_v14, %v744_v16  ;;  %v792_v12 = vld [vmem:[%s16227_s1 + $0x1728] sm:$0xff] }
 0x142   :  { %6520 = vmatpush1.bf16.msra.mxu0 %v10659_v20  ;;  %6864 = vmatpush1.bf16.msra.mxu1 %v10661_v21  ;;  %v10718_v20 = vcombine.high %v740_v14, %v744_v16  ;;  %v747_v21 = vld [vmem:[%s16227_s1 + $0x15c0] sm:$0xff] }
 0x143   :  { %6532 = vmatprep.subr.bf16.mxu0 %v10668_v22  ;;  %6876 = vmatprep.subr.bf16.mxu1 %v10670_v24  ;;  %v751_v22 = vld [vmem:[%s16227_s1 + $0x15e0] sm:$0xff]  ;;  %v748_v24 = vld [vmem:[%s16227_s1 + $0x15c8] sm:$0xff] }
 0x144   :  { %v10724_v17 = vcombine.high %v747_v21, %v751_v22  ;;  %v10723_v37 = vcombine.low %v747_v21, %v751_v22  ;;  %v10725_v39 = vcombine.low %v748_v24, %v752_v25  ;;  %v800_v21 = vld [vmem:[%s16227_s1 + $0x1768] sm:$0xff] }
 0x145   :  { %6522 = vmatmul.mubr.bf16.vlgmr.msra.gmra.mrb[0].mxu0 %v13100_v31  ;;  %6866 = vmatmul.mubr.bf16.vlgmr.msra.gmra.mrb[0].mxu1 %v13100_v31 }
 0x146   :  { %6533 = vmatpush1.bf16.msra.mxu0 %v10667_v33  ;;  %6877 = vmatpush1.bf16.msra.mxu1 %v10669_v4  ;;  %v10726_v33 = vcombine.high %v748_v24, %v752_v25  ;;  %v755_v4 = vld [vmem:[%s16227_s1 + $0x1600] sm:$0xff] }
 0x147   :  { %6534 = vmatprep.subr.bf16.mxu0 %v10676_v5  ;;  %6878 = vmatprep.subr.bf16.mxu1 %v10678_v34  ;;  %v759_v5 = vld [vmem:[%s16227_s1 + $0x1620] sm:$0xff]  ;;  %v756_v34 = vld [vmem:[%s16227_s1 + $0x1608] sm:$0xff] }
 0x148   :  { %6564 = vmatprep.mubr.bf16.mxu0 %v13123_v38  ;;  %6908 = vmatprep.mubr.bf16.mxu1 %v13123_v38  ;;  %v10732_v40 = vcombine.high %v755_v4, %v759_v5  ;;  %v10731_v30 = vcombine.low %v755_v4, %v759_v5  ;;  %v10733_v48 = vcombine.low %v756_v34, %v760_v36  ;;  %v808_v4 = vld [vmem:[%s16227_s1 + $0x17a8] sm:$0xff] }
 0x14a   :  { %6535 = vmatpush1.bf16.msra.mxu0 %v10675_v41  ;;  %6879 = vmatpush1.bf16.msra.mxu1 %v10677_v42  ;;  %v10734_v41 = vcombine.high %v756_v34, %v760_v36  ;;  %v763_v42 = vld [vmem:[%s16227_s1 + $0x1640] sm:$0xff] }
 0x14b   :  { %6536 = vmatprep.subr.bf16.mxu0 %v10684_v44  ;;  %6880 = vmatprep.subr.bf16.mxu1 %v10686_v47  ;;  %v767_v44 = vld [vmem:[%s16227_s1 + $0x1660] sm:$0xff]  ;;  %v764_v47 = vld [vmem:[%s16227_s1 + $0x1648] sm:$0xff] }
 0x14c   :  { %v10740_v49 = vcombine.high %v763_v42, %v767_v44  ;;  %v10739_v59 = vcombine.low %v763_v42, %v767_v44  ;;  %v10741_v60 = vcombine.low %v764_v47, %v768_v29  ;;  %v816_v42 = vld [vmem:[%s16227_s1 + $0x17e8] sm:$0xff] }
 0x14e   :  { %6537 = vmatpush1.bf16.msra.mxu0 %v10683_v50  ;;  %6881 = vmatpush1.bf16.msra.mxu1 %v10685_v52  ;;  %v10742_v50 = vcombine.high %v764_v47, %v768_v29  ;;  %v771_v52 = vld [vmem:[%s16227_s1 + $0x1680] sm:$0xff] }
 0x14f   :  { %6538 = vmatprep.subr.bf16.mxu0 %v10692_v55  ;;  %6882 = vmatprep.subr.bf16.mxu1 %v10694_v56  ;;  %v775_v55 = vld [vmem:[%s16227_s1 + $0x16a0] sm:$0xff]  ;;  %v772_v56 = vld [vmem:[%s16227_s1 + $0x1688] sm:$0xff] }
 0x150   :  { %v10748_v61 = vcombine.high %v771_v52, %v775_v55  ;;  %v10747_v6 = vcombine.low %v771_v52, %v775_v55  ;;  %v10749_v45 = vcombine.low %v772_v56, %v776_v57  ;;  %v824_v52 = vld [vmem:[%s16227_s1 + $0x1828] sm:$0xff] }
 0x152   :  { %6539 = vmatpush1.bf16.msra.mxu0 %v10691_v62  ;;  %6883 = vmatpush1.bf16.msra.mxu1 %v10693_v63  ;;  %v10750_v62 = vcombine.high %v772_v56, %v776_v57  ;;  %v779_v63 = vld [vmem:[%s16227_s1 + $0x16c0] sm:$0xff] }
 0x153   :  { %6540 = vmatprep.subr.bf16.mxu0 %v10700_v0  ;;  %6884 = vmatprep.subr.bf16.mxu1 %v10702_v1  ;;  %v783_v0 = vld [vmem:[%s16227_s1 + $0x16e0] sm:$0xff]  ;;  %v780_v1 = vld [vmem:[%s16227_s1 + $0x16c8] sm:$0xff] }
 0x154   :  { %v10756_v46 = vcombine.high %v779_v63, %v783_v0  ;;  %v10755_v13 = vcombine.low %v779_v63, %v783_v0  ;;  %v10757_v14 = vcombine.low %v780_v1, %v784_v3  ;;  %v13314_v63 = vcombine.low %v13108_v18, %v13113_v32  ;;  %v832_v0 = vld [vmem:[%s16227_s1 + $0x1868] sm:$0xff] }
 0x156   :  { %6541 = vmatpush1.bf16.msra.mxu0 %v10699_v7  ;;  %6885 = vmatpush1.bf16.msra.mxu1 %v10701_v8  ;;  %v10758_v7 = vcombine.high %v780_v1, %v784_v3  ;;  %v787_v8 = vld [vmem:[%s16227_s1 + $0x1700] sm:$0xff]  ;;  %v13322_v1 = vld [vmem:[%s16228_s0 + $0x30] sm:$0xff] }
 0x157   :  { %6542 = vmatprep.subr.bf16.mxu0 %v10708_v9  ;;  %6886 = vmatprep.subr.bf16.mxu1 %v10710_v11  ;;  %v791_v9 = vld [vmem:[%s16227_s1 + $0x1720] sm:$0xff]  ;;  %v788_v11 = vld [vmem:[%s16227_s1 + $0x1708] sm:$0xff]  ;;  %v13327_v3 = vld [vmem:[%s16228_s0 + $0x70] sm:$0xff] }
 0x158   :  { %v10764_v16 = vcombine.high %v787_v8, %v791_v9  ;;  %v10763_v22 = vcombine.low %v787_v8, %v791_v9  ;;  %v10765_v24 = vcombine.low %v788_v11, %v792_v12  ;;  %v13337_v8 = vcombine.high %v13322_v1, %v13327_v3  ;;  %v836_v9 = vld [vmem:[%s16227_s1 + $0x1888] sm:$0xff] }
 0x15a   :  { %6543 = vmatpush1.bf16.msra.mxu0 %v10707_v19  ;;  %6887 = vmatpush1.bf16.msra.mxu1 %v10709_v53  ;;  %v10766_v19 = vcombine.high %v788_v11, %v792_v12  ;;  %v795_v53 = vld [vmem:[%s16227_s1 + $0x1740] sm:$0xff]  ;;  %v840_v11 = vld [vmem:[%s16227_s1 + $0x18a8] sm:$0xff] }
 0x15b   :  { %6544 = vmatprep.subr.bf16.mxu0 %v10716_v54  ;;  %6888 = vmatprep.subr.bf16.mxu1 %v10718_v20  ;;  %v799_v54 = vld [vmem:[%s16227_s1 + $0x1760] sm:$0xff]  ;;  %v796_v20 = vld [vmem:[%s16227_s1 + $0x1748] sm:$0xff] }
 0x15c   :  { %v10772_v25 = vcombine.high %v795_v53, %v799_v54  ;;  %v10771_v5 = vcombine.low %v795_v53, %v799_v54  ;;  %v10773_v34 = vcombine.low %v796_v20, %v800_v21  ;;  %v847_v53 = vld [vmem:[%s16227_s1 + $0x18e0] sm:$0xff]  ;;  %v844_v54 = vld [vmem:[%s16227_s1 + $0x18c8] sm:$0xff] }
 0x15e   :  { %6545 = vmatpush1.bf16.msra.mxu0 %v10715_v26  ;;  %6889 = vmatpush1.bf16.msra.mxu1 %v10717_v28  ;;  %v10774_v26 = vcombine.high %v796_v20, %v800_v21  ;;  %v803_v28 = vld [vmem:[%s16227_s1 + $0x1780] sm:$0xff]  ;;  %v848_v20 = vld [vmem:[%s16227_s1 + $0x18e8] sm:$0xff] }
 0x15f   :  { %6546 = vmatprep.subr.bf16.mxu0 %v10724_v17  ;;  %6890 = vmatprep.subr.bf16.mxu1 %v10726_v33  ;;  %v807_v17 = vld [vmem:[%s16227_s1 + $0x17a0] sm:$0xff]  ;;  %v804_v33 = vld [vmem:[%s16227_s1 + $0x1788] sm:$0xff] }
 0x160   :  { %v10780_v36 = vcombine.high %v803_v28, %v807_v17  ;;  %v10779_v44 = vcombine.low %v803_v28, %v807_v17  ;;  %v10781_v47 = vcombine.low %v804_v33, %v808_v4  ;;  %v855_v28 = vld [vmem:[%s16227_s1 + $0x1920] sm:$0xff]  ;;  %v852_v17 = vld [vmem:[%s16227_s1 + $0x1908] sm:$0xff] }
 0x162   :  { %6547 = vmatpush1.bf16.msra.mxu0 %v10723_v37  ;;  %6891 = vmatpush1.bf16.msra.mxu1 %v10725_v39  ;;  %v10782_v37 = vcombine.high %v804_v33, %v808_v4  ;;  %v811_v39 = vld [vmem:[%s16227_s1 + $0x17c0] sm:$0xff]  ;;  %v856_v33 = vld [vmem:[%s16227_s1 + $0x1928] sm:$0xff] }
 0x163   :  { %6548 = vmatprep.subr.bf16.mxu0 %v10732_v40  ;;  %6892 = vmatprep.subr.bf16.mxu1 %v10734_v41  ;;  %v815_v40 = vld [vmem:[%s16227_s1 + $0x17e0] sm:$0xff]  ;;  %v812_v41 = vld [vmem:[%s16227_s1 + $0x17c8] sm:$0xff] }
 0x164   :  { %v10788_v29 = vcombine.high %v811_v39, %v815_v40  ;;  %v10787_v55 = vcombine.low %v811_v39, %v815_v40  ;;  %v10789_v56 = vcombine.low %v812_v41, %v816_v42  ;;  %v863_v39 = vld [vmem:[%s16227_s1 + $0x1960] sm:$0xff]  ;;  %v860_v40 = vld [vmem:[%s16227_s1 + $0x1948] sm:$0xff] }
 0x166   :  { %6549 = vmatpush1.bf16.msra.mxu0 %v10731_v30  ;;  %6893 = vmatpush1.bf16.msra.mxu1 %v10733_v48  ;;  %v10790_v30 = vcombine.high %v812_v41, %v816_v42  ;;  %v819_v48 = vld [vmem:[%s16227_s1 + $0x1800] sm:$0xff]  ;;  %v864_v41 = vld [vmem:[%s16227_s1 + $0x1968] sm:$0xff] }
 0x167   :  { %6550 = vmatprep.subr.bf16.mxu0 %v10740_v49  ;;  %6894 = vmatprep.subr.bf16.mxu1 %v10742_v50  ;;  %v823_v49 = vld [vmem:[%s16227_s1 + $0x1820] sm:$0xff]  ;;  %v820_v50 = vld [vmem:[%s16227_s1 + $0x1808] sm:$0xff] }
 0x168   :  { %v10796_v57 = vcombine.high %v819_v48, %v823_v49  ;;  %v10797_v18 = vcombine.low %v820_v50, %v824_v52 }
 0x16a   :  { %6551 = vmatpush1.bf16.msra.mxu0 %v10739_v59  ;;  %6895 = vmatpush1.bf16.msra.mxu1 %v10741_v60  ;;  %v10798_v59 = vcombine.high %v820_v50, %v824_v52  ;;  %v827_v60 = vld [vmem:[%s16227_s1 + $0x1840] sm:$0xff]  ;;  %v872_v50 = vld [vmem:[%s16227_s1 + $0x19a8] sm:$0xff] }
 0x16b   :  { %6552 = vmatprep.subr.bf16.mxu0 %v10748_v61  ;;  %6896 = vmatprep.subr.bf16.mxu1 %v10750_v62  ;;  %v831_v61 = vld [vmem:[%s16227_s1 + $0x1860] sm:$0xff]  ;;  %v828_v62 = vld [vmem:[%s16227_s1 + $0x1848] sm:$0xff] }
 0x16c   :  { %v10804_v32 = vcombine.high %v827_v60, %v831_v61  ;;  %v10803_v12 = vcombine.low %v827_v60, %v831_v61  ;;  %v879_v60 = vld [vmem:[%s16227_s1 + $0x19e0] sm:$0xff]  ;;  %v876_v61 = vld [vmem:[%s16227_s1 + $0x19c8] sm:$0xff] }
 0x16e   :  { %6553 = vmatpush1.bf16.msra.mxu0 %v10747_v6  ;;  %6897 = vmatpush1.bf16.msra.mxu1 %v10749_v45  ;;  %v10795_v6 = vcombine.low %v819_v48, %v823_v49  ;;  %v10806_v45 = vcombine.high %v828_v62, %v832_v0  ;;  %v871_v48 = vld [vmem:[%s16227_s1 + $0x19a0] sm:$0xff]  ;;  %v868_v49 = vld [vmem:[%s16227_s1 + $0x1988] sm:$0xff] }
 0x16f   :  { %6554 = vmatprep.subr.bf16.mxu0 %v10756_v46  ;;  %6898 = vmatprep.subr.bf16.mxu1 %v10758_v7  ;;  %v835_v46 = vld [vmem:[%s16227_s1 + $0x1880] sm:$0xff] }
 0x170   :  { %v839_v7 = vld [vmem:[%s16227_s1 + $0x18a0] sm:$0xff] }
 0x171   :  { %v10811_v21 = vcombine.low %v835_v46, %v839_v7 }
 0x172   :  { %6555 = vmatpush1.bf16.msra.mxu0 %v10755_v13  ;;  %6899 = vmatpush1.bf16.msra.mxu1 %v10757_v14  ;;  %v10805_v13 = vcombine.low %v828_v62, %v832_v0  ;;  %v10812_v14 = vcombine.high %v835_v46, %v839_v7  ;;  %v880_v62 = vld [vmem:[%s16227_s1 + $0x19e8] sm:$0xff]  ;;  %v887_v46 = vld [vmem:[%s16227_s1 + $0x1a20] sm:$0xff] }
 0x173   :  { %6556 = vmatprep.subr.bf16.mxu0 %v10764_v16  ;;  %6900 = vmatprep.subr.bf16.mxu1 %v10766_v19  ;;  %v10814_v16 = vcombine.high %v836_v9, %v840_v11  ;;  %v843_v19 = vld [vmem:[%s16227_s1 + $0x18c0] sm:$0xff]  ;;  %v884_v7 = vld [vmem:[%s16227_s1 + $0x1a08] sm:$0xff] }
 0x174   :  { %v10819_v4 = vcombine.low %v843_v19, %v847_v53 }
 0x176   :  { %6557 = vmatpush1.bf16.msra.mxu0 %v10763_v22  ;;  %6901 = vmatpush1.bf16.msra.mxu1 %v10765_v24  ;;  %v10813_v22 = vcombine.low %v836_v9, %v840_v11  ;;  %v10820_v24 = vcombine.high %v843_v19, %v847_v53  ;;  %v888_v9 = vld [vmem:[%s16227_s1 + $0x1a28] sm:$0xff]  ;;  %v895_v19 = vld [vmem:[%s16227_s1 + $0x1a60] sm:$0xff] }
 0x177   :  { %6558 = vmatprep.subr.bf16.mxu0 %v10772_v25  ;;  %6902 = vmatprep.subr.bf16.mxu1 %v10774_v26  ;;  %v10822_v25 = vcombine.high %v844_v54, %v848_v20  ;;  %v851_v26 = vld [vmem:[%s16227_s1 + $0x1900] sm:$0xff]  ;;  %v892_v53 = vld [vmem:[%s16227_s1 + $0x1a48] sm:$0xff] }
 0x178   :  { %v10827_v42 = vcombine.low %v851_v26, %v855_v28 }
 0x17a   :  { %6559 = vmatpush1.bf16.msra.mxu0 %v10771_v5  ;;  %6903 = vmatpush1.bf16.msra.mxu1 %v10773_v34  ;;  %v10821_v5 = vcombine.low %v844_v54, %v848_v20  ;;  %v10828_v34 = vcombine.high %v851_v26, %v855_v28  ;;  %v896_v54 = vld [vmem:[%s16227_s1 + $0x1a68] sm:$0xff]  ;;  %v903_v26 = vld [vmem:[%s16227_s1 + $0x1aa0] sm:$0xff] }
 0x17b   :  { %6560 = vmatprep.subr.bf16.mxu0 %v10780_v36  ;;  %6904 = vmatprep.subr.bf16.mxu1 %v10782_v37  ;;  %v10830_v36 = vcombine.high %v852_v17, %v856_v33  ;;  %v859_v37 = vld [vmem:[%s16227_s1 + $0x1940] sm:$0xff]  ;;  %v900_v28 = vld [vmem:[%s16227_s1 + $0x1a88] sm:$0xff] }
 0x17c   :  { %v10835_v52 = vcombine.low %v859_v37, %v863_v39 }
 0x17e   :  { %6561 = vmatpush1.bf16.msra.mxu0 %v10779_v44  ;;  %6905 = vmatpush1.bf16.msra.mxu1 %v10781_v47  ;;  %v10829_v44 = vcombine.low %v852_v17, %v856_v33  ;;  %v10836_v47 = vcombine.high %v859_v37, %v863_v39  ;;  %v904_v17 = vld [vmem:[%s16227_s1 + $0x1aa8] sm:$0xff]  ;;  %v911_v37 = vld [vmem:[%s16227_s1 + $0x1ae0] sm:$0xff] }
 0x17f   :  { %6562 = vmatprep.subr.bf16.mxu0 %v10788_v29  ;;  %6906 = vmatprep.subr.bf16.mxu1 %v10790_v30  ;;  %v10838_v29 = vcombine.high %v860_v40, %v864_v41  ;;  %v867_v30 = vld [vmem:[%s16227_s1 + $0x1980] sm:$0xff]  ;;  %v908_v39 = vld [vmem:[%s16227_s1 + $0x1ac8] sm:$0xff] }
 0x180   :  { %v10843_v0 = vcombine.low %v867_v30, %v871_v48 }
 0x182   :  { %6563 = vmatpush1.bf16.msra.mxu0 %v10787_v55  ;;  %6907 = vmatpush1.bf16.msra.mxu1 %v10789_v56  ;;  %v10837_v55 = vcombine.low %v860_v40, %v864_v41  ;;  %v10844_v56 = vcombine.high %v867_v30, %v871_v48  ;;  %v912_v40 = vld [vmem:[%s16227_s1 + $0x1ae8] sm:$0xff]  ;;  %v919_v30 = vld [vmem:[%s16227_s1 + $0x1b20] sm:$0xff] }
 0x183   :  { %6575 = vmatprep.subr.bf16.mxu0 %v10796_v57  ;;  %6919 = vmatprep.subr.bf16.mxu1 %v10798_v59  ;;  %v10846_v57 = vcombine.high %v868_v49, %v872_v50  ;;  %v875_v59 = vld [vmem:[%s16227_s1 + $0x19c0] sm:$0xff]  ;;  %v916_v48 = vld [vmem:[%s16227_s1 + $0x1b08] sm:$0xff] }
 0x184   :  { %v10851_v11 = vcombine.low %v875_v59, %v879_v60 }
 0x185   :  { %6565 = vmatmul.mubr.bf16.vlgmr.msra.gmra.mrb[0].mxu0 %v13314_v63  ;;  %6909 = vmatmul.mubr.bf16.vlgmr.msra.gmra.mrb[0].mxu1 %v13314_v63 }
 0x186   :  { %6576 = vmatpush1.bf16.msra.mxu0 %v10795_v6  ;;  %6920 = vmatpush1.bf16.msra.mxu1 %v10797_v18  ;;  %v10845_v6 = vcombine.low %v868_v49, %v872_v50  ;;  %v10852_v18 = vcombine.high %v875_v59, %v879_v60  ;;  %v920_v49 = vld [vmem:[%s16227_s1 + $0x1b28] sm:$0xff]  ;;  %v927_v59 = vld [vmem:[%s16227_s1 + $0x1b60] sm:$0xff] }
 0x187   :  { %6577 = vmatprep.subr.bf16.mxu0 %v10804_v32  ;;  %6921 = vmatprep.subr.bf16.mxu1 %v10806_v45  ;;  %v10854_v32 = vcombine.high %v876_v61, %v880_v62  ;;  %v883_v45 = vld [vmem:[%s16227_s1 + $0x1a00] sm:$0xff]  ;;  %v924_v60 = vld [vmem:[%s16227_s1 + $0x1b48] sm:$0xff] }
 0x188   :  { %6607 = vmatprep.mubr.bf16.mxu0 %v13337_v8  ;;  %6951 = vmatprep.mubr.bf16.mxu1 %v13337_v8  ;;  %v10859_v20 = vcombine.low %v883_v45, %v887_v46 }
 0x18a   :  { %6578 = vmatpush1.bf16.msra.mxu0 %v10803_v12  ;;  %6922 = vmatpush1.bf16.msra.mxu1 %v10805_v13  ;;  %v10853_v12 = vcombine.low %v876_v61, %v880_v62  ;;  %v10860_v13 = vcombine.high %v883_v45, %v887_v46  ;;  %v928_v61 = vld [vmem:[%s16227_s1 + $0x1b68] sm:$0xff]  ;;  %v935_v45 = vld [vmem:[%s16227_s1 + $0x1ba0] sm:$0xff] }
 0x18b   :  { %6579 = vmatprep.subr.bf16.mxu0 %v10812_v14  ;;  %6923 = vmatprep.subr.bf16.mxu1 %v10814_v16  ;;  %v10862_v14 = vcombine.high %v884_v7, %v888_v9  ;;  %v891_v16 = vld [vmem:[%s16227_s1 + $0x1a40] sm:$0xff]  ;;  %v932_v46 = vld [vmem:[%s16227_s1 + $0x1b88] sm:$0xff] }
 0x18c   :  { %v10867_v33 = vcombine.low %v891_v16, %v895_v19 }
 0x18e   :  { %6580 = vmatpush1.bf16.msra.mxu0 %v10811_v21  ;;  %6924 = vmatpush1.bf16.msra.mxu1 %v10813_v22  ;;  %v10861_v21 = vcombine.low %v884_v7, %v888_v9  ;;  %v10868_v22 = vcombine.high %v891_v16, %v895_v19  ;;  %v936_v7 = vld [vmem:[%s16227_s1 + $0x1ba8] sm:$0xff]  ;;  %v943_v16 = vld [vmem:[%s16227_s1 + $0x1be0] sm:$0xff] }
 0x18f   :  { %6581 = vmatprep.subr.bf16.mxu0 %v10820_v24  ;;  %6925 = vmatprep.subr.bf16.mxu1 %v10822_v25  ;;  %v10870_v24 = vcombine.high %v892_v53, %v896_v54  ;;  %v899_v25 = vld [vmem:[%s16227_s1 + $0x1a80] sm:$0xff]  ;;  %v940_v19 = vld [vmem:[%s16227_s1 + $0x1bc8] sm:$0xff] }
 0x190   :  { %v10875_v41 = vcombine.low %v899_v25, %v903_v26 }
 0x192   :  { %6582 = vmatpush1.bf16.msra.mxu0 %v10819_v4  ;;  %6926 = vmatpush1.bf16.msra.mxu1 %v10821_v5  ;;  %v10869_v4 = vcombine.low %v892_v53, %v896_v54  ;;  %v10876_v5 = vcombine.high %v899_v25, %v903_v26  ;;  %v944_v53 = vld [vmem:[%s16227_s1 + $0x1be8] sm:$0xff]  ;;  %v951_v25 = vld [vmem:[%s16227_s1 + $0x1c20] sm:$0xff] }
 0x193   :  { %6583 = vmatprep.subr.bf16.mxu0 %v10828_v34  ;;  %6927 = vmatprep.subr.bf16.mxu1 %v10830_v36  ;;  %v10878_v34 = vcombine.high %v900_v28, %v904_v17  ;;  %v907_v36 = vld [vmem:[%s16227_s1 + $0x1ac0] sm:$0xff]  ;;  %v948_v26 = vld [vmem:[%s16227_s1 + $0x1c08] sm:$0xff] }
 0x194   :  { %v10883_v50 = vcombine.low %v907_v36, %v911_v37 }
 0x196   :  { %6584 = vmatpush1.bf16.msra.mxu0 %v10827_v42  ;;  %6928 = vmatpush1.bf16.msra.mxu1 %v10829_v44  ;;  %v10877_v42 = vcombine.low %v900_v28, %v904_v17  ;;  %v10884_v44 = vcombine.high %v907_v36, %v911_v37  ;;  %v952_v28 = vld [vmem:[%s16227_s1 + $0x1c28] sm:$0xff]  ;;  %v959_v36 = vld [vmem:[%s16227_s1 + $0x1c60] sm:$0xff] }
 0x197   :  { %6585 = vmatprep.subr.bf16.mxu0 %v10836_v47  ;;  %6929 = vmatprep.subr.bf16.mxu1 %v10838_v29  ;;  %v10886_v47 = vcombine.high %v908_v39, %v912_v40  ;;  %v915_v29 = vld [vmem:[%s16227_s1 + $0x1b00] sm:$0xff]  ;;  %v956_v37 = vld [vmem:[%s16227_s1 + $0x1c48] sm:$0xff] }
 0x198   :  { %v10891_v62 = vcombine.low %v915_v29, %v919_v30 }
 0x19a   :  { %6586 = vmatpush1.bf16.msra.mxu0 %v10835_v52  ;;  %6930 = vmatpush1.bf16.msra.mxu1 %v10837_v55  ;;  %v10885_v52 = vcombine.low %v908_v39, %v912_v40  ;;  %v10892_v55 = vcombine.high %v915_v29, %v919_v30  ;;  %v13528_v39 = vcombine.low %v13322_v1, %v13327_v3  ;;  %v960_v40 = vld [vmem:[%s16227_s1 + $0x1c68] sm:$0xff]  ;;  %v963_v29 = vld [vmem:[%s16227_s1 + $0x1c80] sm:$0xff] }
 0x19b   :  { %6587 = vmatprep.subr.bf16.mxu0 %v10844_v56  ;;  %6931 = vmatprep.subr.bf16.mxu1 %v10846_v57  ;;  %v10894_v56 = vcombine.high %v916_v48, %v920_v49  ;;  %v923_v57 = vld [vmem:[%s16227_s1 + $0x1b40] sm:$0xff]  ;;  %v10925_v1 = vcombine.low %v948_v26, %v952_v28 }
 0x19c   :  { %v10899_v9 = vcombine.low %v923_v57, %v927_v59  ;;  %v967_v30 = vld [vmem:[%s16227_s1 + $0x1ca0] sm:$0xff] }
 0x19e   :  { %6588 = vmatpush1.bf16.msra.mxu0 %v10843_v0  ;;  %6932 = vmatpush1.bf16.msra.mxu1 %v10845_v6  ;;  %v10893_v0 = vcombine.low %v916_v48, %v920_v49  ;;  %v10900_v6 = vcombine.high %v923_v57, %v927_v59  ;;  %v964_v49 = vld [vmem:[%s16227_s1 + $0x1c88] sm:$0xff]  ;;  %v971_v59 = vld [vmem:[%s16227_s1 + $0x1cc0] sm:$0xff] }
 0x19f   :  { %6589 = vmatprep.subr.bf16.mxu0 %v10852_v18  ;;  %6933 = vmatprep.subr.bf16.mxu1 %v10854_v32  ;;  %v10902_v18 = vcombine.high %v924_v60, %v928_v61  ;;  %v931_v32 = vld [vmem:[%s16227_s1 + $0x1b80] sm:$0xff] }
 0x1a0   :  { %v10907_v54 = vcombine.low %v931_v32, %v935_v45 }
 0x1a2   :  { %6590 = vmatpush1.bf16.msra.mxu0 %v10851_v11  ;;  %6934 = vmatpush1.bf16.msra.mxu1 %v10853_v12  ;;  %v10901_v11 = vcombine.low %v924_v60, %v928_v61  ;;  %v10908_v12 = vcombine.high %v931_v32, %v935_v45  ;;  %v975_v60 = vld [vmem:[%s16227_s1 + $0x1ce0] sm:$0xff]  ;;  %v972_v61 = vld [vmem:[%s16227_s1 + $0x1cc8] sm:$0xff] }
 0x1a3   :  { %6591 = vmatprep.subr.bf16.mxu0 %v10860_v13  ;;  %6935 = vmatprep.subr.bf16.mxu1 %v10862_v14  ;;  %v10910_v13 = vcombine.high %v932_v46, %v936_v7  ;;  %v939_v14 = vld [vmem:[%s16227_s1 + $0x1bc0] sm:$0xff] }
 0x1a4   :  { %v10915_v17 = vcombine.low %v939_v14, %v943_v16  ;;  %v979_v45 = vld [vmem:[%s16227_s1 + $0x1d00] sm:$0xff] }
 0x1a6   :  { %6592 = vmatpush1.bf16.msra.mxu0 %v10859_v20  ;;  %6936 = vmatpush1.bf16.msra.mxu1 %v10861_v21  ;;  %v10909_v20 = vcombine.low %v932_v46, %v936_v7  ;;  %v10916_v21 = vcombine.high %v939_v14, %v943_v16  ;;  %v983_v46 = vld [vmem:[%s16227_s1 + $0x1d20] sm:$0xff]  ;;  %v980_v7 = vld [vmem:[%s16227_s1 + $0x1d08] sm:$0xff] }
 0x1a7   :  { %6593 = vmatprep.subr.bf16.mxu0 %v10868_v22  ;;  %6937 = vmatprep.subr.bf16.mxu1 %v10870_v24  ;;  %v10918_v22 = vcombine.high %v940_v19, %v944_v53  ;;  %v947_v24 = vld [vmem:[%s16227_s1 + $0x1c00] sm:$0xff] }
 0x1a8   :  { %v987_v16 = vld [vmem:[%s16227_s1 + $0x1d40] sm:$0xff] }
 0x1aa   :  { %6594 = vmatpush1.bf16.msra.mxu0 %v10867_v33  ;;  %6938 = vmatpush1.bf16.msra.mxu1 %v10869_v4  ;;  %v10917_v33 = vcombine.low %v940_v19, %v944_v53  ;;  %v10924_v4 = vcombine.high %v947_v24, %v951_v25  ;;  %v991_v19 = vld [vmem:[%s16227_s1 + $0x1d60] sm:$0xff]  ;;  %v988_v53 = vld [vmem:[%s16227_s1 + $0x1d48] sm:$0xff] }
 0x1ab   :  { %6595 = vmatprep.subr.bf16.mxu0 %v10876_v5  ;;  %6939 = vmatprep.subr.bf16.mxu1 %v10878_v34  ;;  %v10926_v5 = vcombine.high %v948_v26, %v952_v28  ;;  %v955_v34 = vld [vmem:[%s16227_s1 + $0x1c40] sm:$0xff]  ;;  %v996_v28 = vld [vmem:[%s16227_s1 + $0x1d88] sm:$0xff] }
 0x1ac   :  { %v10932_v3 = vcombine.high %v955_v34, %v959_v36  ;;  %v999_v26 = vld [vmem:[%s16227_s1 + $0x1da0] sm:$0xff] }
 0x1ae   :  { %6596 = vmatpush1.bf16.msra.mxu0 %v10875_v41  ;;  %6940 = vmatpush1.bf16.msra.mxu1 %v10877_v42  ;;  %v13536_v41 = vld [vmem:[%s16228_s0 + $0x38] sm:$0xff] }
 0x1af   :  { %6597 = vmatprep.subr.bf16.mxu0 %v10884_v44  ;;  %6941 = vmatprep.subr.bf16.mxu1 %v10886_v47  ;;  %v13541_v42 = vld [vmem:[%s16228_s0 + $0x78] sm:$0xff]  ;;  %v10923_v44 = vcombine.low %v947_v24, %v951_v25  ;;  %v10934_v47 = vcombine.high %v956_v37, %v960_v40  ;;  %v995_v25 = vld [vmem:[%s16227_s1 + $0x1d80] sm:$0xff] }
 0x1b0   :  { %v13551_v48 = vcombine.high %v13536_v41, %v13541_v42 }
 0x1b2   :  { %6598 = vmatpush1.bf16.msra.mxu0 %v10883_v50  ;;  %6942 = vmatpush1.bf16.msra.mxu1 %v10885_v52  ;;  %v968_v50 = vld [vmem:[%s16227_s1 + $0x1ca8] sm:$0xff]  ;;  %v10931_v52 = vcombine.low %v955_v34, %v959_v36  ;;  %v1003_v36 = vld [vmem:[%s16227_s1 + $0x1dc0] sm:$0xff] }
 0x1b3   :  { %6599 = vmatprep.subr.bf16.mxu0 %v10892_v55  ;;  %6943 = vmatprep.subr.bf16.mxu1 %v10894_v56  ;;  %v10933_v55 = vcombine.low %v956_v37, %v960_v40  ;;  %v10940_v56 = vcombine.high %v963_v29, %v967_v30  ;;  %v10942_v57 = vcombine.high %v964_v49, %v968_v50  ;;  %v1007_v37 = vld [vmem:[%s16227_s1 + $0x1de0] sm:$0xff]  ;;  %v1004_v40 = vld [vmem:[%s16227_s1 + $0x1dc8] sm:$0xff] }
 0x1b6   :  { %6600 = vmatpush1.bf16.msra.mxu0 %v10891_v62  ;;  %6944 = vmatpush1.bf16.msra.mxu1 %v10893_v0  ;;  %v976_v62 = vld [vmem:[%s16227_s1 + $0x1ce8] sm:$0xff]  ;;  %v10939_v0 = vcombine.low %v963_v29, %v967_v30  ;;  %v1011_v30 = vld [vmem:[%s16227_s1 + $0x1e00] sm:$0xff] }
 0x1b7   :  { %6601 = vmatprep.subr.bf16.mxu0 %v10900_v6  ;;  %6945 = vmatprep.subr.bf16.mxu1 %v10902_v18  ;;  %v10941_v6 = vcombine.low %v964_v49, %v968_v50  ;;  %v10948_v18 = vcombine.high %v971_v59, %v975_v60  ;;  %v10950_v32 = vcombine.high %v972_v61, %v976_v62  ;;  %v1015_v49 = vld [vmem:[%s16227_s1 + $0x1e20] sm:$0xff]  ;;  %v1012_v50 = vld [vmem:[%s16227_s1 + $0x1e08] sm:$0xff] }
 0x1ba   :  { %6602 = vmatpush1.bf16.msra.mxu0 %v10899_v9  ;;  %6946 = vmatpush1.bf16.msra.mxu1 %v10901_v11  ;;  %v984_v9 = vld [vmem:[%s16227_s1 + $0x1d28] sm:$0xff]  ;;  %v10947_v11 = vcombine.low %v971_v59, %v975_v60  ;;  %v1019_v60 = vld [vmem:[%s16227_s1 + $0x1e40] sm:$0xff] }
 0x1bb   :  { %6603 = vmatprep.subr.bf16.mxu0 %v10908_v12  ;;  %6947 = vmatprep.subr.bf16.mxu1 %v10910_v13  ;;  %v10949_v12 = vcombine.low %v972_v61, %v976_v62  ;;  %v10956_v13 = vcombine.high %v979_v45, %v983_v46  ;;  %v10958_v14 = vcombine.high %v980_v7, %v984_v9  ;;  %v1023_v61 = vld [vmem:[%s16227_s1 + $0x1e60] sm:$0xff]  ;;  %v1020_v62 = vld [vmem:[%s16227_s1 + $0x1e48] sm:$0xff] }
 0x1be   :  { %6604 = vmatpush1.bf16.msra.mxu0 %v10907_v54  ;;  %6948 = vmatpush1.bf16.msra.mxu1 %v10909_v20  ;;  %v992_v54 = vld [vmem:[%s16227_s1 + $0x1d68] sm:$0xff]  ;;  %v10955_v20 = vcombine.low %v979_v45, %v983_v46  ;;  %v1027_v46 = vld [vmem:[%s16227_s1 + $0x1e80] sm:$0xff] }
 0x1bf   :  { %6605 = vmatprep.subr.bf16.mxu0 %v10916_v21  ;;  %6949 = vmatprep.subr.bf16.mxu1 %v10918_v22  ;;  %v10957_v21 = vcombine.low %v980_v7, %v984_v9  ;;  %v10964_v22 = vcombine.high %v987_v16, %v991_v19  ;;  %v10966_v24 = vcombine.high %v988_v53, %v992_v54  ;;  %v1031_v7 = vld [vmem:[%s16227_s1 + $0x1ea0] sm:$0xff]  ;;  %v1028_v9 = vld [vmem:[%s16227_s1 + $0x1e88] sm:$0xff] }
 0x1c2   :  { %6606 = vmatpush1.bf16.msra.mxu0 %v10915_v17  ;;  %6950 = vmatpush1.bf16.msra.mxu1 %v10917_v33  ;;  %v1000_v17 = vld [vmem:[%s16227_s1 + $0x1da8] sm:$0xff]  ;;  %v10963_v33 = vcombine.low %v987_v16, %v991_v19  ;;  %v1035_v19 = vld [vmem:[%s16227_s1 + $0x1ec0] sm:$0xff] }
 0x1c3   :  { %6618 = vmatprep.subr.bf16.mxu0 %v10924_v4  ;;  %6962 = vmatprep.subr.bf16.mxu1 %v10926_v5  ;;  %v10965_v4 = vcombine.low %v988_v53, %v992_v54  ;;  %v10972_v5 = vcombine.high %v995_v25, %v999_v26  ;;  %v10974_v34 = vcombine.high %v996_v28, %v1000_v17  ;;  %v1039_v53 = vld [vmem:[%s16227_s1 + $0x1ee0] sm:$0xff]  ;;  %v1036_v54 = vld [vmem:[%s16227_s1 + $0x1ec8] sm:$0xff] }
 0x1c5   :  { %6608 = vmatmul.mubr.bf16.vlgmr.msra.gmra.mrb[0].mxu0 %v13528_v39  ;;  %6952 = vmatmul.mubr.bf16.vlgmr.msra.gmra.mrb[0].mxu1 %v13528_v39 }
 0x1c6   :  { %6619 = vmatpush1.bf16.msra.mxu0 %v10923_v44  ;;  %6963 = vmatpush1.bf16.msra.mxu1 %v10925_v1  ;;  %v1008_v44 = vld [vmem:[%s16227_s1 + $0x1de8] sm:$0xff]  ;;  %v10971_v1 = vcombine.low %v995_v25, %v999_v26  ;;  %v1043_v26 = vld [vmem:[%s16227_s1 + $0x1f00] sm:$0xff] }
 0x1c7   :  { %6620 = vmatprep.subr.bf16.mxu0 %v10932_v3  ;;  %6964 = vmatprep.subr.bf16.mxu1 %v10934_v47  ;;  %v10973_v3 = vcombine.low %v996_v28, %v1000_v17  ;;  %v10980_v47 = vcombine.high %v1003_v36, %v1007_v37  ;;  %v10982_v29 = vcombine.high %v1004_v40, %v1008_v44  ;;  %v1047_v28 = vld [vmem:[%s16227_s1 + $0x1f20] sm:$0xff]  ;;  %v1044_v17 = vld [vmem:[%s16227_s1 + $0x1f08] sm:$0xff] }
 0x1c8   :  { %6650 = vmatprep.mubr.bf16.mxu0 %v13551_v48  ;;  %6994 = vmatprep.mubr.bf16.mxu1 %v13551_v48 }
 0x1ca   :  { %6621 = vmatpush1.bf16.msra.mxu0 %v10931_v52  ;;  %6965 = vmatpush1.bf16.msra.mxu1 %v10933_v55  ;;  %v1016_v52 = vld [vmem:[%s16227_s1 + $0x1e28] sm:$0xff]  ;;  %v10979_v55 = vcombine.low %v1003_v36, %v1007_v37  ;;  %v1051_v37 = vld [vmem:[%s16227_s1 + $0x1f40] sm:$0xff] }
 0x1cb   :  { %6622 = vmatprep.subr.bf16.mxu0 %v10940_v56  ;;  %6966 = vmatprep.subr.bf16.mxu1 %v10942_v57  ;;  %v10981_v56 = vcombine.low %v1004_v40, %v1008_v44  ;;  %v10988_v57 = vcombine.high %v1011_v30, %v1015_v49  ;;  %v10990_v59 = vcombine.high %v1012_v50, %v1016_v52  ;;  %v1055_v40 = vld [vmem:[%s16227_s1 + $0x1f60] sm:$0xff]  ;;  %v1052_v44 = vld [vmem:[%s16227_s1 + $0x1f48] sm:$0xff] }
 0x1ce   :  { %6623 = vmatpush1.bf16.msra.mxu0 %v10939_v0  ;;  %6967 = vmatpush1.bf16.msra.mxu1 %v10941_v6  ;;  %v1024_v0 = vld [vmem:[%s16227_s1 + $0x1e68] sm:$0xff]  ;;  %v10987_v6 = vcombine.low %v1011_v30, %v1015_v49  ;;  %v1059_v49 = vld [vmem:[%s16227_s1 + $0x1f80] sm:$0xff] }
 0x1cf   :  { %6624 = vmatprep.subr.bf16.mxu0 %v10948_v18  ;;  %6968 = vmatprep.subr.bf16.mxu1 %v10950_v32  ;;  %v10989_v18 = vcombine.low %v1012_v50, %v1016_v52  ;;  %v10996_v32 = vcombine.high %v1019_v60, %v1023_v61  ;;  %v10998_v45 = vcombine.high %v1020_v62, %v1024_v0  ;;  %v1063_v50 = vld [vmem:[%s16227_s1 + $0x1fa0] sm:$0xff]  ;;  %v1060_v52 = vld [vmem:[%s16227_s1 + $0x1f88] sm:$0xff] }
 0x1d2   :  { %6625 = vmatpush1.bf16.msra.mxu0 %v10947_v11  ;;  %6969 = vmatpush1.bf16.msra.mxu1 %v10949_v12  ;;  %v1032_v11 = vld [vmem:[%s16227_s1 + $0x1ea8] sm:$0xff]  ;;  %v10995_v12 = vcombine.low %v1019_v60, %v1023_v61  ;;  %v1067_v61 = vld [vmem:[%s16227_s1 + $0x1fc0] sm:$0xff] }
 0x1d3   :  { %6626 = vmatprep.subr.bf16.mxu0 %v10956_v13  ;;  %6970 = vmatprep.subr.bf16.mxu1 %v10958_v14  ;;  %v10997_v13 = vcombine.low %v1020_v62, %v1024_v0  ;;  %v11004_v14 = vcombine.high %v1027_v46, %v1031_v7  ;;  %v11006_v16 = vcombine.high %v1028_v9, %v1032_v11  ;;  %v1071_v62 = vld [vmem:[%s16227_s1 + $0x1fe0] sm:$0xff]  ;;  %v1068_v0 = vld [vmem:[%s16227_s1 + $0x1fc8] sm:$0xff] }
 0x1d6   :  { %6627 = vmatpush1.bf16.msra.mxu0 %v10955_v20  ;;  %6971 = vmatpush1.bf16.msra.mxu1 %v10957_v21  ;;  %v1040_v20 = vld [vmem:[%s16227_s1 + $0x1ee8] sm:$0xff]  ;;  %v11003_v21 = vcombine.low %v1027_v46, %v1031_v7  ;;  %v53_v7 = vld [vmem:[%s16227_s1 + $0x10] sm:$0xff] }
 0x1d7   :  { %6628 = vmatprep.subr.bf16.mxu0 %v10964_v22  ;;  %6972 = vmatprep.subr.bf16.mxu1 %v10966_v24  ;;  %v11005_v22 = vcombine.low %v1028_v9, %v1032_v11  ;;  %v11012_v24 = vcombine.high %v1035_v19, %v1039_v53  ;;  %v11014_v25 = vcombine.high %v1036_v54, %v1040_v20  ;;  %v57_v9 = vld [vmem:[%s16227_s1 + $0x30] sm:$0xff]  ;;  %v54_v11 = vld [vmem:[%s16227_s1 + $0x18] sm:$0xff] }
 0x1da   :  { %6629 = vmatpush1.bf16.msra.mxu0 %v10963_v33  ;;  %6973 = vmatpush1.bf16.msra.mxu1 %v10965_v4  ;;  %v1048_v33 = vld [vmem:[%s16227_s1 + $0x1f28] sm:$0xff]  ;;  %v11011_v4 = vcombine.low %v1035_v19, %v1039_v53  ;;  %v61_v53 = vld [vmem:[%s16227_s1 + $0x50] sm:$0xff] }
 0x1db   :  { %6630 = vmatprep.subr.bf16.mxu0 %v10972_v5  ;;  %6974 = vmatprep.subr.bf16.mxu1 %v10974_v34  ;;  %v11013_v5 = vcombine.low %v1036_v54, %v1040_v20  ;;  %v11020_v34 = vcombine.high %v1043_v26, %v1047_v28  ;;  %v11022_v36 = vcombine.high %v1044_v17, %v1048_v33  ;;  %v65_v54 = vld [vmem:[%s16227_s1 + $0x70] sm:$0xff] }
 0x1dc   :  { %v13739_v20 = vcombine.low %v13536_v41, %v13541_v42  ;;  %v69_v41 = vld [vmem:[%s16227_s1 + $0x90] sm:$0xff] }
 0x1dd   :  { %v73_v42 = vld [vmem:[%s16227_s1 + $0xb0] sm:$0xff] }
 0x1de   :  { %6631 = vmatpush1.bf16.msra.mxu0 %v10971_v1  ;;  %6975 = vmatpush1.bf16.msra.mxu1 %v10973_v3  ;;  %v1056_v1 = vld [vmem:[%s16227_s1 + $0x1f68] sm:$0xff]  ;;  %v11019_v3 = vcombine.low %v1043_v26, %v1047_v28  ;;  %v10040_v26 = vcombine.high %v61_v53, %v65_v54 }
 0x1df   :  { %6632 = vmatprep.subr.bf16.mxu0 %v10980_v47  ;;  %6976 = vmatprep.subr.bf16.mxu1 %v10982_v29  ;;  %v11021_v47 = vcombine.low %v1044_v17, %v1048_v33  ;;  %v11028_v29 = vcombine.high %v1051_v37, %v1055_v40  ;;  %v11030_v30 = vcombine.high %v1052_v44, %v1056_v1  ;;  %v70_v17 = vld [vmem:[%s16227_s1 + $0x98] sm:$0xff] }
 0x1e0   :  { %v74_v33 = vld [vmem:[%s16227_s1 + $0xb8] sm:$0xff] }
 0x1e2   :  { %6633 = vmatpush1.bf16.msra.mxu0 %v10979_v55  ;;  %6977 = vmatpush1.bf16.msra.mxu1 %v10981_v56  ;;  %v1064_v55 = vld [vmem:[%s16227_s1 + $0x1fa8] sm:$0xff]  ;;  %v11027_v56 = vcombine.low %v1051_v37, %v1055_v40  ;;  %v77_v37 = vld [vmem:[%s16227_s1 + $0xd0] sm:$0xff] }
 0x1e3   :  { %6634 = vmatprep.subr.bf16.mxu0 %v10988_v57  ;;  %6978 = vmatprep.subr.bf16.mxu1 %v10990_v59  ;;  %v11029_v57 = vcombine.low %v1052_v44, %v1056_v1  ;;  %v11036_v59 = vcombine.high %v1059_v49, %v1063_v50  ;;  %v11038_v60 = vcombine.high %v1060_v52, %v1064_v55  ;;  %v81_v40 = vld [vmem:[%s16227_s1 + $0xf0] sm:$0xff]  ;;  %v78_v44 = vld [vmem:[%s16227_s1 + $0xd8] sm:$0xff] }
 0x1e4   :  { %v82_v1 = vld [vmem:[%s16227_s1 + $0xf8] sm:$0xff] }
 0x1e6   :  { %6635 = vmatpush1.bf16.msra.mxu0 %v10987_v6  ;;  %6979 = vmatpush1.bf16.msra.mxu1 %v10989_v18  ;;  %v1072_v6 = vld [vmem:[%s16227_s1 + $0x1fe8] sm:$0xff]  ;;  %v11035_v18 = vcombine.low %v1059_v49, %v1063_v50  ;;  %v85_v49 = vld [vmem:[%s16227_s1 + $0x110] sm:$0xff] }
 0x1e7   :  { %6636 = vmatprep.subr.bf16.mxu0 %v10996_v32  ;;  %6980 = vmatprep.subr.bf16.mxu1 %v10998_v45  ;;  %v11037_v32 = vcombine.low %v1060_v52, %v1064_v55  ;;  %v11044_v45 = vcombine.high %v1067_v61, %v1071_v62  ;;  %v11046_v46 = vcombine.high %v1068_v0, %v1072_v6  ;;  %v89_v50 = vld [vmem:[%s16227_s1 + $0x130] sm:$0xff]  ;;  %v90_v52 = vld [vmem:[%s16227_s1 + $0x138] sm:$0xff] }
 0x1e8   :  { %v10055_v55 = vcombine.low %v77_v37, %v81_v40 }
 0x1ea   :  { %6637 = vmatpush1.bf16.msra.mxu0 %v10995_v12  ;;  %6981 = vmatpush1.bf16.msra.mxu1 %v10997_v13  ;;  %v58_v12 = vld [vmem:[%s16227_s1 + $0x38] sm:$0xff]  ;;  %v11043_v13 = vcombine.low %v1067_v61, %v1071_v62  ;;  %v97_v61 = vld [vmem:[%s16227_s1 + $0x170] sm:$0xff] }
 0x1eb   :  { %6638 = vmatprep.subr.bf16.mxu0 %v11004_v14  ;;  %6982 = vmatprep.subr.bf16.mxu1 %v11006_v16  ;;  %v11045_v14 = vcombine.low %v1068_v0, %v1072_v6  ;;  %v10032_v16 = vcombine.high %v53_v7, %v57_v9  ;;  %v10034_v19 = vcombine.high %v54_v11, %v58_v12  ;;  %v94_v62 = vld [vmem:[%s16227_s1 + $0x158] sm:$0xff] }
 0x1ec   :  { %v98_v0 = vld [vmem:[%s16227_s1 + $0x178] sm:$0xff]  ;;  %v10063_v6 = vcombine.low %v85_v49, %v89_v50 }
 0x1ee   :  { %6639 = vmatpush1.bf16.msra.mxu0 %v11003_v21  ;;  %6983 = vmatpush1.bf16.msra.mxu1 %v11005_v22  ;;  %v62_v21 = vld [vmem:[%s16227_s1 + $0x58] sm:$0xff] }
 0x1ef   :  { %6640 = vmatprep.subr.bf16.mxu0 %v11012_v24  ;;  %6984 = vmatprep.subr.bf16.mxu1 %v11014_v25  ;;  %v66_v22 = vld [vmem:[%s16227_s1 + $0x78] sm:$0xff]  ;;  %v10031_v24 = vcombine.low %v53_v7, %v57_v9  ;;  %v10033_v25 = vcombine.low %v54_v11, %v58_v12  ;;  %v105_v7 = vld [vmem:[%s16227_s1 + $0x1b0] sm:$0xff] }
 0x1f0   :  { %v10042_v28 = vcombine.high %v62_v21, %v66_v22  ;;  %v102_v9 = vld [vmem:[%s16227_s1 + $0x198] sm:$0xff] }
 0x1f1   :  { %v106_v11 = vld [vmem:[%s16227_s1 + $0x1b8] sm:$0xff] }
 0x1f2   :  { %6641 = vmatpush1.bf16.msra.mxu0 %v11011_v4  ;;  %6985 = vmatpush1.bf16.msra.mxu1 %v11013_v5  ;;  %v10039_v4 = vcombine.low %v61_v53, %v65_v54  ;;  %v10041_v5 = vcombine.low %v62_v21, %v66_v22  ;;  %v113_v53 = vld [vmem:[%s16227_s1 + $0x1f0] sm:$0xff]  ;;  %v110_v54 = vld [vmem:[%s16227_s1 + $0x1d8] sm:$0xff] }
 0x1f3   :  { %6642 = vmatprep.subr.bf16.mxu0 %v11020_v34  ;;  %6986 = vmatprep.subr.bf16.mxu1 %v11022_v36  ;;  %v10048_v34 = vcombine.high %v69_v41, %v73_v42  ;;  %v10050_v36 = vcombine.high %v70_v17, %v74_v33  ;;  %v114_v21 = vld [vmem:[%s16227_s1 + $0x1f8] sm:$0xff] }
 0x1f6   :  { %6643 = vmatpush1.bf16.msra.mxu0 %v11019_v3  ;;  %6987 = vmatpush1.bf16.msra.mxu1 %v11021_v47  ;;  %v10047_v3 = vcombine.low %v69_v41, %v73_v42  ;;  %v10049_v47 = vcombine.low %v70_v17, %v74_v33  ;;  %v121_v41 = vld [vmem:[%s16227_s1 + $0x230] sm:$0xff]  ;;  %v118_v42 = vld [vmem:[%s16227_s1 + $0x218] sm:$0xff] }
 0x1f7   :  { %6644 = vmatprep.subr.bf16.mxu0 %v11028_v29  ;;  %6988 = vmatprep.subr.bf16.mxu1 %v11030_v30  ;;  %v10056_v29 = vcombine.high %v77_v37, %v81_v40  ;;  %v10058_v30 = vcombine.high %v78_v44, %v82_v1  ;;  %v122_v17 = vld [vmem:[%s16227_s1 + $0x238] sm:$0xff]  ;;  %v129_v37 = vld [vmem:[%s16227_s1 + $0x270] sm:$0xff] }
 0x1f8   :  { %v126_v40 = vld [vmem:[%s16227_s1 + $0x258] sm:$0xff] }
 0x1fa   :  { %6645 = vmatpush1.bf16.msra.mxu0 %v11027_v56  ;;  %6989 = vmatpush1.bf16.msra.mxu1 %v11029_v57  ;;  %v10057_v56 = vcombine.low %v78_v44, %v82_v1  ;;  %v10064_v57 = vcombine.high %v85_v49, %v89_v50  ;;  %v130_v44 = vld [vmem:[%s16227_s1 + $0x278] sm:$0xff]  ;;  %v137_v49 = vld [vmem:[%s16227_s1 + $0x2b0] sm:$0xff] }
 0x1fb   :  { %6646 = vmatprep.subr.bf16.mxu0 %v11036_v59  ;;  %6990 = vmatprep.subr.bf16.mxu1 %v11038_v60  ;;  %v93_v60 = vld [vmem:[%s16227_s1 + $0x150] sm:$0xff]  ;;  %v134_v50 = vld [vmem:[%s16227_s1 + $0x298] sm:$0xff] }
 0x1fc   :  { %v10071_v12 = vcombine.low %v93_v60, %v97_v61 }
 0x1fe   :  { %6647 = vmatpush1.bf16.msra.mxu0 %v11035_v18  ;;  %6991 = vmatpush1.bf16.msra.mxu1 %v11037_v32  ;;  %v10072_v32 = vcombine.high %v93_v60, %v97_v61  ;;  %v145_v60 = vld [vmem:[%s16227_s1 + $0x2f0] sm:$0xff]  ;;  %v142_v61 = vld [vmem:[%s16227_s1 + $0x2d8] sm:$0xff] }
 0x1ff   :  { %6648 = vmatprep.subr.bf16.mxu0 %v11044_v45  ;;  %6992 = vmatprep.subr.bf16.mxu1 %v11046_v46  ;;  %v10074_v45 = vcombine.high %v94_v62, %v98_v0  ;;  %v101_v46 = vld [vmem:[%s16227_s1 + $0x190] sm:$0xff] }
 0x200   :  { %v10079_v22 = vcombine.low %v101_v46, %v105_v7 }
 0x202   :  { %6649 = vmatpush1.bf16.msra.mxu0 %v11043_v13  ;;  %6993 = vmatpush1.bf16.msra.mxu1 %v11045_v14  ;;  %v10073_v13 = vcombine.low %v94_v62, %v98_v0  ;;  %v10080_v14 = vcombine.high %v101_v46, %v105_v7  ;;  %v146_v62 = vld [vmem:[%s16227_s1 + $0x2f8] sm:$0xff]  ;;  %v153_v46 = vld [vmem:[%s16227_s1 + $0x330] sm:$0xff] }
 0x203   :  { %7005 = vmatprep.subr.bf16.mxu0 %v10032_v16  ;;  %7349 = vmatprep.subr.bf16.mxu1 %v10034_v19  ;;  %v10082_v16 = vcombine.high %v102_v9, %v106_v11  ;;  %v109_v19 = vld [vmem:[%s16227_s1 + $0x1d0] sm:$0xff]  ;;  %v150_v7 = vld [vmem:[%s16227_s1 + $0x318] sm:$0xff] }
 0x204   :  { %v10087_v33 = vcombine.low %v109_v19, %v113_v53 }
 0x205   :  { %6651 = vmatmul.mubr.bf16.vlgmr.msra.gmra.mrb[0].mxu0 %v13739_v20  ;;  %6995 = vmatmul.mubr.bf16.vlgmr.msra.gmra.mrb[0].mxu1 %v13739_v20 }
 0x206   :  { %7006 = vmatpush1.bf16.msra.mxu0 %v10031_v24  ;;  %7350 = vmatpush1.bf16.msra.mxu1 %v10033_v25  ;;  %v10081_v24 = vcombine.low %v102_v9, %v106_v11  ;;  %v10088_v25 = vcombine.high %v109_v19, %v113_v53  ;;  %v154_v9 = vld [vmem:[%s16227_s1 + $0x338] sm:$0xff]  ;;  %v161_v19 = vld [vmem:[%s16227_s1 + $0x370] sm:$0xff] }
 0x207   :  { %7007 = vmatprep.subr.bf16.mxu0 %v10040_v26  ;;  %7351 = vmatprep.subr.bf16.mxu1 %v10042_v28  ;;  %v10090_v26 = vcombine.high %v110_v54, %v114_v21  ;;  %v117_v28 = vld [vmem:[%s16227_s1 + $0x210] sm:$0xff]  ;;  %v158_v53 = vld [vmem:[%s16227_s1 + $0x358] sm:$0xff] }
 0x208   :  { %7037 = vmatprep.mubr.bf16.mxu0 %v12115_v58  ;;  %7381 = vmatprep.mubr.bf16.mxu1 %v12115_v58  ;;  %v86_v58 = vld [vmem:[%s16227_s1 + $0x118] sm:$0xff]  ;;  %v10095_v1 = vcombine.low %v117_v28, %v121_v41 }
 0x209   :  { %v10066_v59 = vcombine.high %v86_v58, %v90_v52  ;;  %v10065_v18 = vcombine.low %v86_v58, %v90_v52  ;;  %v138_v58 = vld [vmem:[%s16227_s1 + $0x2b8] sm:$0xff] }
 0x20a   :  { %7008 = vmatpush1.bf16.msra.mxu0 %v10039_v4  ;;  %7352 = vmatpush1.bf16.msra.mxu1 %v10041_v5  ;;  %v10089_v4 = vcombine.low %v110_v54, %v114_v21  ;;  %v10096_v5 = vcombine.high %v117_v28, %v121_v41  ;;  %v162_v54 = vld [vmem:[%s16227_s1 + $0x378] sm:$0xff]  ;;  %v169_v28 = vld [vmem:[%s16227_s1 + $0x3b0] sm:$0xff] }
 0x20b   :  { %7009 = vmatprep.subr.bf16.mxu0 %v10048_v34  ;;  %7353 = vmatprep.subr.bf16.mxu1 %v10050_v36  ;;  %v10098_v34 = vcombine.high %v118_v42, %v122_v17  ;;  %v125_v36 = vld [vmem:[%s16227_s1 + $0x250] sm:$0xff]  ;;  %v166_v41 = vld [vmem:[%s16227_s1 + $0x398] sm:$0xff] }
 0x20c   :  { %v10103_v52 = vcombine.low %v125_v36, %v129_v37 }
 0x20e   :  { %7010 = vmatpush1.bf16.msra.mxu0 %v10047_v3  ;;  %7354 = vmatpush1.bf16.msra.mxu1 %v10049_v47  ;;  %v10097_v3 = vcombine.low %v118_v42, %v122_v17  ;;  %v10104_v47 = vcombine.high %v125_v36, %v129_v37  ;;  %v170_v42 = vld [vmem:[%s16227_s1 + $0x3b8] sm:$0xff]  ;;  %v177_v36 = vld [vmem:[%s16227_s1 + $0x3f0] sm:$0xff] }
 0x20f   :  { %7011 = vmatprep.subr.bf16.mxu0 %v10056_v29  ;;  %7355 = vmatprep.subr.bf16.mxu1 %v10058_v30  ;;  %v10106_v29 = vcombine.high %v126_v40, %v130_v44  ;;  %v133_v30 = vld [vmem:[%s16227_s1 + $0x290] sm:$0xff]  ;;  %v174_v37 = vld [vmem:[%s16227_s1 + $0x3d8] sm:$0xff] }
 0x210   :  { %v10111_v0 = vcombine.low %v133_v30, %v137_v49 }
 0x212   :  { %7012 = vmatpush1.bf16.msra.mxu0 %v10055_v55  ;;  %7356 = vmatpush1.bf16.msra.mxu1 %v10057_v56  ;;  %v10105_v55 = vcombine.low %v126_v40, %v130_v44  ;;  %v10112_v56 = vcombine.high %v133_v30, %v137_v49  ;;  %v178_v40 = vld [vmem:[%s16227_s1 + $0x3f8] sm:$0xff]  ;;  %v185_v30 = vld [vmem:[%s16227_s1 + $0x430] sm:$0xff] }
 0x213   :  { %7013 = vmatprep.subr.bf16.mxu0 %v10064_v57  ;;  %7357 = vmatprep.subr.bf16.mxu1 %v10066_v59  ;;  %v10114_v57 = vcombine.high %v134_v50, %v138_v58  ;;  %v141_v59 = vld [vmem:[%s16227_s1 + $0x2d0] sm:$0xff]  ;;  %v182_v49 = vld [vmem:[%s16227_s1 + $0x418] sm:$0xff] }
 0x214   :  { %v10119_v11 = vcombine.low %v141_v59, %v145_v60 }
 0x216   :  { %7014 = vmatpush1.bf16.msra.mxu0 %v10063_v6  ;;  %7358 = vmatpush1.bf16.msra.mxu1 %v10065_v18  ;;  %v10113_v6 = vcombine.low %v134_v50, %v138_v58  ;;  %v10120_v18 = vcombine.high %v141_v59, %v145_v60  ;;  %v186_v50 = vld [vmem:[%s16227_s1 + $0x438] sm:$0xff]  ;;  %v193_v59 = vld [vmem:[%s16227_s1 + $0x470] sm:$0xff] }
 0x217   :  { %7015 = vmatprep.subr.bf16.mxu0 %v10072_v32  ;;  %7359 = vmatprep.subr.bf16.mxu1 %v10074_v45  ;;  %v10122_v32 = vcombine.high %v142_v61, %v146_v62  ;;  %v149_v45 = vld [vmem:[%s16227_s1 + $0x310] sm:$0xff]  ;;  %v190_v60 = vld [vmem:[%s16227_s1 + $0x458] sm:$0xff] }
 0x218   :  { %v10127_v21 = vcombine.low %v149_v45, %v153_v46 }
 0x21a   :  { %7016 = vmatpush1.bf16.msra.mxu0 %v10071_v12  ;;  %7360 = vmatpush1.bf16.msra.mxu1 %v10073_v13  ;;  %v10121_v12 = vcombine.low %v142_v61, %v146_v62  ;;  %v10128_v13 = vcombine.high %v149_v45, %v153_v46  ;;  %v194_v61 = vld [vmem:[%s16227_s1 + $0x478] sm:$0xff]  ;;  %v201_v45 = vld [vmem:[%s16227_s1 + $0x4b0] sm:$0xff] }
 0x21b   :  { %7017 = vmatprep.subr.bf16.mxu0 %v10080_v14  ;;  %7361 = vmatprep.subr.bf16.mxu1 %v10082_v16  ;;  %v10130_v14 = vcombine.high %v150_v7, %v154_v9  ;;  %v157_v16 = vld [vmem:[%s16227_s1 + $0x350] sm:$0xff]  ;;  %v198_v46 = vld [vmem:[%s16227_s1 + $0x498] sm:$0xff] }
 0x21c   :  { %v10135_v17 = vcombine.low %v157_v16, %v161_v19 }
 0x21e   :  { %7018 = vmatpush1.bf16.msra.mxu0 %v10079_v22  ;;  %7362 = vmatpush1.bf16.msra.mxu1 %v10081_v24  ;;  %v10129_v22 = vcombine.low %v150_v7, %v154_v9  ;;  %v10136_v24 = vcombine.high %v157_v16, %v161_v19  ;;  %v202_v7 = vld [vmem:[%s16227_s1 + $0x4b8] sm:$0xff]  ;;  %v209_v16 = vld [vmem:[%s16227_s1 + $0x4f0] sm:$0xff] }
 0x21f   :  { %7019 = vmatprep.subr.bf16.mxu0 %v10088_v25  ;;  %7363 = vmatprep.subr.bf16.mxu1 %v10090_v26  ;;  %v10138_v25 = vcombine.high %v158_v53, %v162_v54  ;;  %v165_v26 = vld [vmem:[%s16227_s1 + $0x390] sm:$0xff]  ;;  %v210_v19 = vld [vmem:[%s16227_s1 + $0x4f8] sm:$0xff] }
 0x220   :  { %v10143_v44 = vcombine.low %v165_v26, %v169_v28 }
 0x222   :  { %7020 = vmatpush1.bf16.msra.mxu0 %v10087_v33  ;;  %7364 = vmatpush1.bf16.msra.mxu1 %v10089_v4  ;;  %v10137_v33 = vcombine.low %v158_v53, %v162_v54  ;;  %v10144_v4 = vcombine.high %v165_v26, %v169_v28  ;;  %v10177_v54 = vcombine.low %v198_v46, %v202_v7  ;;  %v218_v26 = vld [vmem:[%s16227_s1 + $0x538] sm:$0xff] }
 0x223   :  { %7021 = vmatprep.subr.bf16.mxu0 %v10096_v5  ;;  %7365 = vmatprep.subr.bf16.mxu1 %v10098_v34  ;;  %v10146_v5 = vcombine.high %v166_v41, %v170_v42  ;;  %v173_v34 = vld [vmem:[%s16227_s1 + $0x3d0] sm:$0xff] }
 0x224   :  { %v10151_v58 = vcombine.low %v173_v34, %v177_v36 }
 0x226   :  { %7022 = vmatpush1.bf16.msra.mxu0 %v10095_v1  ;;  %7366 = vmatpush1.bf16.msra.mxu1 %v10097_v3  ;;  %v10145_v1 = vcombine.low %v166_v41, %v170_v42  ;;  %v10152_v3 = vcombine.high %v173_v34, %v177_v36  ;;  %v226_v34 = vld [vmem:[%s16227_s1 + $0x578] sm:$0xff] }
 0x227   :  { %7023 = vmatprep.subr.bf16.mxu0 %v10104_v47  ;;  %7367 = vmatprep.subr.bf16.mxu1 %v10106_v29  ;;  %v10154_v47 = vcombine.high %v174_v37, %v178_v40  ;;  %v181_v29 = vld [vmem:[%s16227_s1 + $0x410] sm:$0xff] }
 0x228   :  { %v10159_v62 = vcombine.low %v181_v29, %v185_v30 }
 0x22a   :  { %7024 = vmatpush1.bf16.msra.mxu0 %v10103_v52  ;;  %7368 = vmatpush1.bf16.msra.mxu1 %v10105_v55  ;;  %v10153_v52 = vcombine.low %v174_v37, %v178_v40  ;;  %v10160_v55 = vcombine.high %v181_v29, %v185_v30  ;;  %v234_v29 = vld [vmem:[%s16227_s1 + $0x5b8] sm:$0xff] }
 0x22b   :  { %7025 = vmatprep.subr.bf16.mxu0 %v10112_v56  ;;  %7369 = vmatprep.subr.bf16.mxu1 %v10114_v57  ;;  %v10162_v56 = vcombine.high %v182_v49, %v186_v50  ;;  %v189_v57 = vld [vmem:[%s16227_s1 + $0x450] sm:$0xff] }
 0x22c   :  { %v10167_v9 = vcombine.low %v189_v57, %v193_v59 }
 0x22e   :  { %7026 = vmatpush1.bf16.msra.mxu0 %v10111_v0  ;;  %7370 = vmatpush1.bf16.msra.mxu1 %v10113_v6  ;;  %v10161_v0 = vcombine.low %v182_v49, %v186_v50  ;;  %v10168_v6 = vcombine.high %v189_v57, %v193_v59  ;;  %v242_v57 = vld [vmem:[%s16227_s1 + $0x5f8] sm:$0xff] }
 0x22f   :  { %7027 = vmatprep.subr.bf16.mxu0 %v10120_v18  ;;  %7371 = vmatprep.subr.bf16.mxu1 %v10122_v32  ;;  %v10170_v18 = vcombine.high %v190_v60, %v194_v61  ;;  %v197_v32 = vld [vmem:[%s16227_s1 + $0x490] sm:$0xff] }
 0x230   :  { %v10175_v53 = vcombine.low %v197_v32, %v201_v45 }
 0x232   :  { %7028 = vmatpush1.bf16.msra.mxu0 %v10119_v11  ;;  %7372 = vmatpush1.bf16.msra.mxu1 %v10121_v12  ;;  %v10169_v11 = vcombine.low %v190_v60, %v194_v61  ;;  %v10176_v12 = vcombine.high %v197_v32, %v201_v45  ;;  %v250_v32 = vld [vmem:[%s16227_s1 + $0x638] sm:$0xff] }
 0x233   :  { %7029 = vmatprep.subr.bf16.mxu0 %v10128_v13  ;;  %7373 = vmatprep.subr.bf16.mxu1 %v10130_v14  ;;  %v10178_v13 = vcombine.high %v198_v46, %v202_v7  ;;  %v205_v14 = vld [vmem:[%s16227_s1 + $0x4d0] sm:$0xff] }
 0x234   :  { %v10183_v28 = vcombine.low %v205_v14, %v209_v16 }
 0x236   :  { %7030 = vmatpush1.bf16.msra.mxu0 %v10127_v21  ;;  %7374 = vmatpush1.bf16.msra.mxu1 %v10129_v22  ;;  %v10184_v21 = vcombine.high %v205_v14, %v209_v16  ;;  %v258_v14 = vld [vmem:[%s16227_s1 + $0x678] sm:$0xff] }
 0x237   :  { %7031 = vmatprep.subr.bf16.mxu0 %v10136_v24  ;;  %7375 = vmatprep.subr.bf16.mxu1 %v10138_v25  ;;  %v213_v24 = vld [vmem:[%s16227_s1 + $0x510] sm:$0xff] }
 0x238   :  { %v217_v25 = vld [vmem:[%s16227_s1 + $0x530] sm:$0xff] }
 0x239   :  { %v10192_v42 = vcombine.high %v213_v24, %v217_v25  ;;  %v10191_v36 = vcombine.low %v213_v24, %v217_v25  ;;  %v266_v24 = vld [vmem:[%s16227_s1 + $0x6b8] sm:$0xff] }
 0x23a   :  { %7032 = vmatpush1.bf16.msra.mxu0 %v10135_v17  ;;  %7376 = vmatpush1.bf16.msra.mxu1 %v10137_v33  ;;  %v221_v33 = vld [vmem:[%s16227_s1 + $0x550] sm:$0xff] }
 0x23b   :  { %7033 = vmatprep.subr.bf16.mxu0 %v10144_v4  ;;  %7377 = vmatprep.subr.bf16.mxu1 %v10146_v5  ;;  %v225_v4 = vld [vmem:[%s16227_s1 + $0x570] sm:$0xff]  ;;  %v222_v5 = vld [vmem:[%s16227_s1 + $0x558] sm:$0xff] }
 0x23c   :  { %v10200_v40 = vcombine.high %v221_v33, %v225_v4  ;;  %v10199_v30 = vcombine.low %v221_v33, %v225_v4  ;;  %v10201_v49 = vcombine.low %v222_v5, %v226_v34  ;;  %v274_v33 = vld [vmem:[%s16227_s1 + $0x6f8] sm:$0xff] }
 0x23e   :  { %7034 = vmatpush1.bf16.msra.mxu0 %v10143_v44  ;;  %7378 = vmatpush1.bf16.msra.mxu1 %v10145_v1  ;;  %v10202_v44 = vcombine.high %v222_v5, %v226_v34  ;;  %v229_v1 = vld [vmem:[%s16227_s1 + $0x590] sm:$0xff] }
 0x23f   :  { %7035 = vmatprep.subr.bf16.mxu0 %v10152_v3  ;;  %7379 = vmatprep.subr.bf16.mxu1 %v10154_v47  ;;  %v233_v3 = vld [vmem:[%s16227_s1 + $0x5b0] sm:$0xff]  ;;  %v230_v47 = vld [vmem:[%s16227_s1 + $0x598] sm:$0xff] }
 0x240   :  { %v10208_v50 = vcombine.high %v229_v1, %v233_v3  ;;  %v10207_v59 = vcombine.low %v229_v1, %v233_v3  ;;  %v10209_v60 = vcombine.low %v230_v47, %v234_v29  ;;  %v282_v1 = vld [vmem:[%s16227_s1 + $0x738] sm:$0xff] }
 0x242   :  { %7036 = vmatpush1.bf16.msra.mxu0 %v10151_v58  ;;  %7380 = vmatpush1.bf16.msra.mxu1 %v10153_v52  ;;  %v10210_v58 = vcombine.high %v230_v47, %v234_v29  ;;  %v237_v52 = vld [vmem:[%s16227_s1 + $0x5d0] sm:$0xff] }
 0x243   :  { %7048 = vmatprep.subr.bf16.mxu0 %v10160_v55  ;;  %7392 = vmatprep.subr.bf16.mxu1 %v10162_v56  ;;  %v241_v55 = vld [vmem:[%s16227_s1 + $0x5f0] sm:$0xff]  ;;  %v238_v56 = vld [vmem:[%s16227_s1 + $0x5d8] sm:$0xff] }
 0x244   :  { %v10216_v61 = vcombine.high %v237_v52, %v241_v55  ;;  %v10215_v45 = vcombine.low %v237_v52, %v241_v55  ;;  %v10217_v46 = vcombine.low %v238_v56, %v242_v57  ;;  %v290_v52 = vld [vmem:[%s16227_s1 + $0x778] sm:$0xff] }
 0x245   :  { %7038 = vmatmul.mubr.bf16.vlgmr.msra.gmra.mrb[4].mxu0 %v12244_v15  ;;  %7382 = vmatmul.mubr.bf16.vlgmr.msra.gmra.mrb[4].mxu1 %v12244_v15  ;;  %v206_v15 = vld [vmem:[%s16227_s1 + $0x4d8] sm:$0xff] }
 0x246   :  { %7049 = vmatpush1.bf16.msra.mxu0 %v10159_v62  ;;  %7393 = vmatpush1.bf16.msra.mxu1 %v10161_v0  ;;  %v10186_v22 = vcombine.high %v206_v15, %v210_v19  ;;  %v10185_v41 = vcombine.low %v206_v15, %v210_v19  ;;  %v10218_v62 = vcombine.high %v238_v56, %v242_v57  ;;  %v245_v0 = vld [vmem:[%s16227_s1 + $0x610] sm:$0xff] }
 0x247   :  { %7050 = vmatprep.subr.bf16.mxu0 %v10168_v6  ;;  %7394 = vmatprep.subr.bf16.mxu1 %v10170_v18  ;;  %v249_v6 = vld [vmem:[%s16227_s1 + $0x630] sm:$0xff]  ;;  %v246_v18 = vld [vmem:[%s16227_s1 + $0x618] sm:$0xff] }
 0x248   :  { %7080 = vmatprep.mubr.bf16.mxu0 %v12267_v23  ;;  %7424 = vmatprep.mubr.bf16.mxu1 %v12267_v23  ;;  %v214_v23 = vld [vmem:[%s16227_s1 + $0x518] sm:$0xff]  ;;  %v10224_v7 = vcombine.high %v245_v0, %v249_v6  ;;  %v10223_v16 = vcombine.low %v245_v0, %v249_v6  ;;  %v10225_v15 = vcombine.low %v246_v18, %v250_v32 }
 0x249   :  { %v10194_v17 = vcombine.high %v214_v23, %v218_v26  ;;  %v10193_v37 = vcombine.low %v214_v23, %v218_v26  ;;  %v298_v0 = vld [vmem:[%s16227_s1 + $0x7b8] sm:$0xff] }
 0x24a   :  { %7051 = vmatpush1.bf16.msra.mxu0 %v10167_v9  ;;  %7395 = vmatpush1.bf16.msra.mxu1 %v10169_v11  ;;  %v10226_v9 = vcombine.high %v246_v18, %v250_v32  ;;  %v253_v11 = vld [vmem:[%s16227_s1 + $0x650] sm:$0xff] }
 0x24b   :  { %7052 = vmatprep.subr.bf16.mxu0 %v10176_v12  ;;  %7396 = vmatprep.subr.bf16.mxu1 %v10178_v13  ;;  %v257_v12 = vld [vmem:[%s16227_s1 + $0x670] sm:$0xff]  ;;  %v254_v13 = vld [vmem:[%s16227_s1 + $0x658] sm:$0xff] }
 0x24c   :  { %v10232_v19 = vcombine.high %v253_v11, %v257_v12  ;;  %v10231_v25 = vcombine.low %v253_v11, %v257_v12  ;;  %v10233_v23 = vcombine.low %v254_v13, %v258_v14  ;;  %v306_v11 = vld [vmem:[%s16227_s1 + $0x7f8] sm:$0xff] }
 0x24e   :  { %7053 = vmatpush1.bf16.msra.mxu0 %v10175_v53  ;;  %7397 = vmatpush1.bf16.msra.mxu1 %v10177_v54  ;;  %v10234_v53 = vcombine.high %v254_v13, %v258_v14  ;;  %v261_v54 = vld [vmem:[%s16227_s1 + $0x690] sm:$0xff] }
 0x24f   :  { %7054 = vmatprep.subr.bf16.mxu0 %v10184_v21  ;;  %7398 = vmatprep.subr.bf16.mxu1 %v10186_v22  ;;  %v265_v21 = vld [vmem:[%s16227_s1 + $0x6b0] sm:$0xff]  ;;  %v262_v22 = vld [vmem:[%s16227_s1 + $0x698] sm:$0xff] }
 0x250   :  { %v10240_v26 = vcombine.high %v261_v54, %v265_v21  ;;  %v10239_v4 = vcombine.low %v261_v54, %v265_v21  ;;  %v10241_v5 = vcombine.low %v262_v22, %v266_v24  ;;  %v314_v54 = vld [vmem:[%s16227_s1 + $0x838] sm:$0xff] }
 0x252   :  { %7055 = vmatpush1.bf16.msra.mxu0 %v10183_v28  ;;  %7399 = vmatpush1.bf16.msra.mxu1 %v10185_v41  ;;  %v10242_v28 = vcombine.high %v262_v22, %v266_v24  ;;  %v269_v41 = vld [vmem:[%s16227_s1 + $0x6d0] sm:$0xff] }
 0x253   :  { %7056 = vmatprep.subr.bf16.mxu0 %v10192_v42  ;;  %7400 = vmatprep.subr.bf16.mxu1 %v10194_v17  ;;  %v273_v42 = vld [vmem:[%s16227_s1 + $0x6f0] sm:$0xff]  ;;  %v270_v17 = vld [vmem:[%s16227_s1 + $0x6d8] sm:$0xff] }
 0x254   :  { %v10248_v34 = vcombine.high %v269_v41, %v273_v42  ;;  %v10247_v3 = vcombine.low %v269_v41, %v273_v42  ;;  %v10249_v47 = vcombine.low %v270_v17, %v274_v33  ;;  %v322_v41 = vld [vmem:[%s16227_s1 + $0x878] sm:$0xff] }
 0x256   :  { %7057 = vmatpush1.bf16.msra.mxu0 %v10191_v36  ;;  %7401 = vmatpush1.bf16.msra.mxu1 %v10193_v37  ;;  %v10250_v36 = vcombine.high %v270_v17, %v274_v33  ;;  %v277_v37 = vld [vmem:[%s16227_s1 + $0x710] sm:$0xff] }
 0x257   :  { %7058 = vmatprep.subr.bf16.mxu0 %v10200_v40  ;;  %7402 = vmatprep.subr.bf16.mxu1 %v10202_v44  ;;  %v281_v40 = vld [vmem:[%s16227_s1 + $0x730] sm:$0xff]  ;;  %v278_v44 = vld [vmem:[%s16227_s1 + $0x718] sm:$0xff] }
 0x258   :  { %v10256_v29 = vcombine.high %v277_v37, %v281_v40  ;;  %v10255_v55 = vcombine.low %v277_v37, %v281_v40  ;;  %v10257_v56 = vcombine.low %v278_v44, %v282_v1  ;;  %v330_v37 = vld [vmem:[%s16227_s1 + $0x8b8] sm:$0xff] }
 0x25a   :  { %7059 = vmatpush1.bf16.msra.mxu0 %v10199_v30  ;;  %7403 = vmatpush1.bf16.msra.mxu1 %v10201_v49  ;;  %v10258_v30 = vcombine.high %v278_v44, %v282_v1  ;;  %v285_v49 = vld [vmem:[%s16227_s1 + $0x750] sm:$0xff] }
 0x25b   :  { %7060 = vmatprep.subr.bf16.mxu0 %v10208_v50  ;;  %7404 = vmatprep.subr.bf16.mxu1 %v10210_v58  ;;  %v289_v50 = vld [vmem:[%s16227_s1 + $0x770] sm:$0xff]  ;;  %v286_v58 = vld [vmem:[%s16227_s1 + $0x758] sm:$0xff] }
 0x25c   :  { %v10264_v57 = vcombine.high %v285_v49, %v289_v50  ;;  %v10263_v6 = vcombine.low %v285_v49, %v289_v50  ;;  %v10265_v18 = vcombine.low %v286_v58, %v290_v52 }
 0x25e   :  { %7061 = vmatpush1.bf16.msra.mxu0 %v10207_v59  ;;  %7405 = vmatpush1.bf16.msra.mxu1 %v10209_v60  ;;  %v10266_v59 = vcombine.high %v286_v58, %v290_v52  ;;  %v293_v60 = vld [vmem:[%s16227_s1 + $0x790] sm:$0xff] }
 0x25f   :  { %7062 = vmatprep.subr.bf16.mxu0 %v10216_v61  ;;  %7406 = vmatprep.subr.bf16.mxu1 %v10218_v62  ;;  %v297_v61 = vld [vmem:[%s16227_s1 + $0x7b0] sm:$0xff]  ;;  %v294_v62 = vld [vmem:[%s16227_s1 + $0x798] sm:$0xff] }
 0x260   :  { %v10272_v32 = vcombine.high %v293_v60, %v297_v61  ;;  %v10271_v12 = vcombine.low %v293_v60, %v297_v61  ;;  %v10273_v13 = vcombine.low %v294_v62, %v298_v0 }
 0x262   :  { %7063 = vmatpush1.bf16.msra.mxu0 %v10215_v45  ;;  %7407 = vmatpush1.bf16.msra.mxu1 %v10217_v46  ;;  %v10274_v45 = vcombine.high %v294_v62, %v298_v0  ;;  %v301_v46 = vld [vmem:[%s16227_s1 + $0x7d0] sm:$0xff] }
 0x263   :  { %7064 = vmatprep.subr.bf16.mxu0 %v10224_v7  ;;  %7408 = vmatprep.subr.bf16.mxu1 %v10226_v9  ;;  %v305_v7 = vld [vmem:[%s16227_s1 + $0x7f0] sm:$0xff]  ;;  %v302_v9 = vld [vmem:[%s16227_s1 + $0x7d8] sm:$0xff] }
 0x264   :  { %v10280_v14 = vcombine.high %v301_v46, %v305_v7  ;;  %v10279_v21 = vcombine.low %v301_v46, %v305_v7  ;;  %v10281_v22 = vcombine.low %v302_v9, %v306_v11  ;;  %v349_v0 = vld [vmem:[%s16227_s1 + $0x950] sm:$0xff] }
 0x266   :  { %7065 = vmatpush1.bf16.msra.mxu0 %v10223_v16  ;;  %7409 = vmatpush1.bf16.msra.mxu1 %v10225_v15  ;;  %v10282_v16 = vcombine.high %v302_v9, %v306_v11  ;;  %v309_v15 = vld [vmem:[%s16227_s1 + $0x810] sm:$0xff] }
 0x267   :  { %7066 = vmatprep.subr.bf16.mxu0 %v10232_v19  ;;  %7410 = vmatprep.subr.bf16.mxu1 %v10234_v53  ;;  %v313_v19 = vld [vmem:[%s16227_s1 + $0x830] sm:$0xff]  ;;  %v310_v53 = vld [vmem:[%s16227_s1 + $0x818] sm:$0xff] }
 0x268   :  { %v10288_v24 = vcombine.high %v309_v15, %v313_v19  ;;  %v10287_v42 = vcombine.low %v309_v15, %v313_v19  ;;  %v10289_v17 = vcombine.low %v310_v53, %v314_v54  ;;  %v357_v11 = vld [vmem:[%s16227_s1 + $0x990] sm:$0xff] }
 0x26a   :  { %7067 = vmatpush1.bf16.msra.mxu0 %v10231_v25  ;;  %7411 = vmatpush1.bf16.msra.mxu1 %v10233_v23  ;;  %v10290_v25 = vcombine.high %v310_v53, %v314_v54  ;;  %v317_v23 = vld [vmem:[%s16227_s1 + $0x850] sm:$0xff] }
 0x26b   :  { %7068 = vmatprep.subr.bf16.mxu0 %v10240_v26  ;;  %7412 = vmatprep.subr.bf16.mxu1 %v10242_v28  ;;  %v321_v26 = vld [vmem:[%s16227_s1 + $0x870] sm:$0xff]  ;;  %v318_v28 = vld [vmem:[%s16227_s1 + $0x858] sm:$0xff] }
 0x26c   :  { %v10296_v33 = vcombine.high %v317_v23, %v321_v26  ;;  %v10295_v40 = vcombine.low %v317_v23, %v321_v26  ;;  %v10297_v44 = vcombine.low %v318_v28, %v322_v41  ;;  %v365_v54 = vld [vmem:[%s16227_s1 + $0x9d0] sm:$0xff] }
 0x26e   :  { %7069 = vmatpush1.bf16.msra.mxu0 %v10239_v4  ;;  %7413 = vmatpush1.bf16.msra.mxu1 %v10241_v5  ;;  %v10298_v4 = vcombine.high %v318_v28, %v322_v41  ;;  %v325_v5 = vld [vmem:[%s16227_s1 + $0x890] sm:$0xff] }
 0x26f   :  { %7070 = vmatprep.subr.bf16.mxu0 %v10248_v34  ;;  %7414 = vmatprep.subr.bf16.mxu1 %v10250_v36  ;;  %v329_v34 = vld [vmem:[%s16227_s1 + $0x8b0] sm:$0xff]  ;;  %v326_v36 = vld [vmem:[%s16227_s1 + $0x898] sm:$0xff] }
 0x270   :  { %v10304_v1 = vcombine.high %v325_v5, %v329_v34  ;;  %v10303_v49 = vcombine.low %v325_v5, %v329_v34  ;;  %v10305_v50 = vcombine.low %v326_v36, %v330_v37  ;;  %v373_v41 = vld [vmem:[%s16227_s1 + $0xa10] sm:$0xff] }
 0x272   :  { %7071 = vmatpush1.bf16.msra.mxu0 %v10247_v3  ;;  %7415 = vmatpush1.bf16.msra.mxu1 %v10249_v47  ;;  %v10306_v3 = vcombine.high %v326_v36, %v330_v37  ;;  %v333_v47 = vld [vmem:[%s16227_s1 + $0x8d0] sm:$0xff] }
 0x273   :  { %7072 = vmatprep.subr.bf16.mxu0 %v10256_v29  ;;  %7416 = vmatprep.subr.bf16.mxu1 %v10258_v30  ;;  %v337_v29 = vld [vmem:[%s16227_s1 + $0x8f0] sm:$0xff]  ;;  %v338_v30 = vld [vmem:[%s16227_s1 + $0x8f8] sm:$0xff] }
 0x274   :  { %v10312_v58 = vcombine.high %v333_v47, %v337_v29  ;;  %v381_v37 = vld [vmem:[%s16227_s1 + $0xa50] sm:$0xff] }
 0x276   :  { %7073 = vmatpush1.bf16.msra.mxu0 %v10255_v55  ;;  %7417 = vmatpush1.bf16.msra.mxu1 %v10257_v56  ;;  %v341_v55 = vld [vmem:[%s16227_s1 + $0x910] sm:$0xff] }
 0x277   :  { %7074 = vmatprep.subr.bf16.mxu0 %v10264_v57  ;;  %7418 = vmatprep.subr.bf16.mxu1 %v10266_v59  ;;  %v345_v56 = vld [vmem:[%s16227_s1 + $0x930] sm:$0xff]  ;;  %v346_v57 = vld [vmem:[%s16227_s1 + $0x938] sm:$0xff]  ;;  %v10311_v59 = vcombine.low %v333_v47, %v337_v29 }
 0x278   :  { %v10320_v61 = vcombine.high %v341_v55, %v345_v56 }
 0x27a   :  { %7075 = vmatpush1.bf16.msra.mxu0 %v10263_v6  ;;  %7419 = vmatpush1.bf16.msra.mxu1 %v10265_v18  ;;  %v353_v6 = vld [vmem:[%s16227_s1 + $0x970] sm:$0xff]  ;;  %v350_v18 = vld [vmem:[%s16227_s1 + $0x958] sm:$0xff] }
 0x27b   :  { %7076 = vmatprep.subr.bf16.mxu0 %v10272_v32  ;;  %7420 = vmatprep.subr.bf16.mxu1 %v10274_v45  ;;  %v354_v32 = vld [vmem:[%s16227_s1 + $0x978] sm:$0xff]  ;;  %v10319_v45 = vcombine.low %v341_v55, %v345_v56  ;;  %v10328_v7 = vcombine.high %v349_v0, %v353_v6 }
 0x27c   :  { %v10330_v9 = vcombine.high %v350_v18, %v354_v32  ;;  %v10329_v15 = vcombine.low %v350_v18, %v354_v32  ;;  %v405_v32 = vld [vmem:[%s16227_s1 + $0xb10] sm:$0xff] }
 0x27e   :  { %7077 = vmatpush1.bf16.msra.mxu0 %v10271_v12  ;;  %7421 = vmatpush1.bf16.msra.mxu1 %v10273_v13  ;;  %v361_v12 = vld [vmem:[%s16227_s1 + $0x9b0] sm:$0xff]  ;;  %v358_v13 = vld [vmem:[%s16227_s1 + $0x998] sm:$0xff] }
 0x27f   :  { %7078 = vmatprep.subr.bf16.mxu0 %v10280_v14  ;;  %7422 = vmatprep.subr.bf16.mxu1 %v10282_v16  ;;  %v362_v14 = vld [vmem:[%s16227_s1 + $0x9b8] sm:$0xff]  ;;  %v10327_v16 = vcombine.low %v349_v0, %v353_v6  ;;  %v10336_v19 = vcombine.high %v357_v11, %v361_v12 }
 0x280   :  { %v10338_v53 = vcombine.high %v358_v13, %v362_v14  ;;  %v10337_v23 = vcombine.low %v358_v13, %v362_v14  ;;  %v413_v14 = vld [vmem:[%s16227_s1 + $0xb50] sm:$0xff] }
 0x282   :  { %7079 = vmatpush1.bf16.msra.mxu0 %v10279_v21  ;;  %7423 = vmatpush1.bf16.msra.mxu1 %v10281_v22  ;;  %v369_v21 = vld [vmem:[%s16227_s1 + $0x9f0] sm:$0xff]  ;;  %v366_v22 = vld [vmem:[%s16227_s1 + $0x9d8] sm:$0xff] }
 0x283   :  { %7091 = vmatprep.subr.bf16.mxu0 %v10288_v24  ;;  %7435 = vmatprep.subr.bf16.mxu1 %v10290_v25  ;;  %v370_v24 = vld [vmem:[%s16227_s1 + $0x9f8] sm:$0xff]  ;;  %v10335_v25 = vcombine.low %v357_v11, %v361_v12  ;;  %v10344_v26 = vcombine.high %v365_v54, %v369_v21 }
 0x284   :  { %v10346_v28 = vcombine.high %v366_v22, %v370_v24  ;;  %v10345_v5 = vcombine.low %v366_v22, %v370_v24  ;;  %v421_v24 = vld [vmem:[%s16227_s1 + $0xb90] sm:$0xff] }
 0x285   :  { %7081 = vmatmul.mubr.bf16.vlgmr.msra.gmra.mrb[4].mxu0 %v12458_v27  ;;  %7425 = vmatmul.mubr.bf16.vlgmr.msra.gmra.mrb[4].mxu1 %v12458_v27  ;;  %v334_v27 = vld [vmem:[%s16227_s1 + $0x8d8] sm:$0xff] }
 0x286   :  { %7092 = vmatpush1.bf16.msra.mxu0 %v10287_v42  ;;  %7436 = vmatpush1.bf16.msra.mxu1 %v10289_v17  ;;  %v10314_v52 = vcombine.high %v334_v27, %v338_v30  ;;  %v10313_v60 = vcombine.low %v334_v27, %v338_v30  ;;  %v377_v42 = vld [vmem:[%s16227_s1 + $0xa30] sm:$0xff]  ;;  %v374_v17 = vld [vmem:[%s16227_s1 + $0xa18] sm:$0xff] }
 0x287   :  { %7093 = vmatprep.subr.bf16.mxu0 %v10296_v33  ;;  %7437 = vmatprep.subr.bf16.mxu1 %v10298_v4  ;;  %v378_v33 = vld [vmem:[%s16227_s1 + $0xa38] sm:$0xff]  ;;  %v10343_v4 = vcombine.low %v365_v54, %v369_v21  ;;  %v10352_v34 = vcombine.high %v373_v41, %v377_v42  ;;  %v389_v30 = vld [vmem:[%s16227_s1 + $0xa90] sm:$0xff] }
 0x288   :  { %7123 = vmatprep.mubr.bf16.mxu0 %v12481_v35  ;;  %7467 = vmatprep.mubr.bf16.mxu1 %v12481_v35  ;;  %v342_v35 = vld [vmem:[%s16227_s1 + $0x918] sm:$0xff]  ;;  %v10354_v36 = vcombine.high %v374_v17, %v378_v33  ;;  %v10353_v47 = vcombine.low %v374_v17, %v378_v33  ;;  %v429_v33 = vld [vmem:[%s16227_s1 + $0xbd0] sm:$0xff] }
 0x289   :  { %v10322_v62 = vcombine.high %v342_v35, %v346_v57  ;;  %v10321_v46 = vcombine.low %v342_v35, %v346_v57  ;;  %v397_v57 = vld [vmem:[%s16227_s1 + $0xad0] sm:$0xff] }
 0x28a   :  { %7094 = vmatpush1.bf16.msra.mxu0 %v10295_v40  ;;  %7438 = vmatpush1.bf16.msra.mxu1 %v10297_v44  ;;  %v385_v40 = vld [vmem:[%s16227_s1 + $0xa70] sm:$0xff]  ;;  %v382_v44 = vld [vmem:[%s16227_s1 + $0xa58] sm:$0xff] }
 0x28b   :  { %7095 = vmatprep.subr.bf16.mxu0 %v10304_v1  ;;  %7439 = vmatprep.subr.bf16.mxu1 %v10306_v3  ;;  %v386_v1 = vld [vmem:[%s16227_s1 + $0xa78] sm:$0xff]  ;;  %v10351_v3 = vcombine.low %v373_v41, %v377_v42  ;;  %v10360_v29 = vcombine.high %v381_v37, %v385_v40 }
 0x28c   :  { %v10362_v27 = vcombine.high %v382_v44, %v386_v1  ;;  %v10361_v55 = vcombine.low %v382_v44, %v386_v1  ;;  %v437_v1 = vld [vmem:[%s16227_s1 + $0xc10] sm:$0xff] }
 0x28e   :  { %7096 = vmatpush1.bf16.msra.mxu0 %v10303_v49  ;;  %7440 = vmatpush1.bf16.msra.mxu1 %v10305_v50  ;;  %v393_v49 = vld [vmem:[%s16227_s1 + $0xab0] sm:$0xff]  ;;  %v390_v50 = vld [vmem:[%s16227_s1 + $0xa98] sm:$0xff] }
 0x28f   :  { %7097 = vmatprep.subr.bf16.mxu0 %v10312_v58  ;;  %7441 = vmatprep.subr.bf16.mxu1 %v10314_v52  ;;  %v394_v58 = vld [vmem:[%s16227_s1 + $0xab8] sm:$0xff]  ;;  %v10359_v52 = vcombine.low %v381_v37, %v385_v40  ;;  %v10368_v56 = vcombine.high %v389_v30, %v393_v49 }
 0x290   :  { %v10370_v35 = vcombine.high %v390_v50, %v394_v58  ;;  %v10369_v0 = vcombine.low %v390_v50, %v394_v58  ;;  %v445_v58 = vld [vmem:[%s16227_s1 + $0xc50] sm:$0xff] }
 0x292   :  { %7098 = vmatpush1.bf16.msra.mxu0 %v10311_v59  ;;  %7442 = vmatpush1.bf16.msra.mxu1 %v10313_v60  ;;  %v401_v59 = vld [vmem:[%s16227_s1 + $0xaf0] sm:$0xff]  ;;  %v398_v60 = vld [vmem:[%s16227_s1 + $0xad8] sm:$0xff] }
 0x293   :  { %7099 = vmatprep.subr.bf16.mxu0 %v10320_v61  ;;  %7443 = vmatprep.subr.bf16.mxu1 %v10322_v62  ;;  %v402_v61 = vld [vmem:[%s16227_s1 + $0xaf8] sm:$0xff]  ;;  %v10367_v62 = vcombine.low %v389_v30, %v393_v49  ;;  %v10376_v6 = vcombine.high %v397_v57, %v401_v59 }
 0x294   :  { %v10378_v18 = vcombine.high %v398_v60, %v402_v61  ;;  %v10377_v11 = vcombine.low %v398_v60, %v402_v61  ;;  %v453_v61 = vld [vmem:[%s16227_s1 + $0xc90] sm:$0xff] }
 0x296   :  { %7100 = vmatpush1.bf16.msra.mxu0 %v10319_v45  ;;  %7444 = vmatpush1.bf16.msra.mxu1 %v10321_v46  ;;  %v409_v45 = vld [vmem:[%s16227_s1 + $0xb30] sm:$0xff]  ;;  %v406_v46 = vld [vmem:[%s16227_s1 + $0xb18] sm:$0xff] }
 0x297   :  { %7101 = vmatprep.subr.bf16.mxu0 %v10328_v7  ;;  %7445 = vmatprep.subr.bf16.mxu1 %v10330_v9  ;;  %v410_v7 = vld [vmem:[%s16227_s1 + $0xb38] sm:$0xff]  ;;  %v10375_v9 = vcombine.low %v397_v57, %v401_v59  ;;  %v10384_v12 = vcombine.high %v405_v32, %v409_v45 }
 0x298   :  { %v10386_v13 = vcombine.high %v406_v46, %v410_v7  ;;  %v10385_v54 = vcombine.low %v406_v46, %v410_v7  ;;  %v461_v7 = vld [vmem:[%s16227_s1 + $0xcd0] sm:$0xff] }
 0x29a   :  { %7102 = vmatpush1.bf16.msra.mxu0 %v10327_v16  ;;  %7446 = vmatpush1.bf16.msra.mxu1 %v10329_v15  ;;  %v417_v16 = vld [vmem:[%s16227_s1 + $0xb70] sm:$0xff]  ;;  %v414_v15 = vld [vmem:[%s16227_s1 + $0xb58] sm:$0xff] }
 0x29b   :  { %7103 = vmatprep.subr.bf16.mxu0 %v10336_v19  ;;  %7447 = vmatprep.subr.bf16.mxu1 %v10338_v53  ;;  %v418_v19 = vld [vmem:[%s16227_s1 + $0xb78] sm:$0xff]  ;;  %v10383_v53 = vcombine.low %v405_v32, %v409_v45  ;;  %v10392_v21 = vcombine.high %v413_v14, %v417_v16 }
 0x29c   :  { %v10394_v22 = vcombine.high %v414_v15, %v418_v19  ;;  %v10393_v41 = vcombine.low %v414_v15, %v418_v19  ;;  %v469_v19 = vld [vmem:[%s16227_s1 + $0xd10] sm:$0xff] }
 0x29e   :  { %7104 = vmatpush1.bf16.msra.mxu0 %v10335_v25  ;;  %7448 = vmatpush1.bf16.msra.mxu1 %v10337_v23  ;;  %v425_v25 = vld [vmem:[%s16227_s1 + $0xbb0] sm:$0xff]  ;;  %v422_v23 = vld [vmem:[%s16227_s1 + $0xb98] sm:$0xff] }
 0x29f   :  { %7105 = vmatprep.subr.bf16.mxu0 %v10344_v26  ;;  %7449 = vmatprep.subr.bf16.mxu1 %v10346_v28  ;;  %v426_v26 = vld [vmem:[%s16227_s1 + $0xbb8] sm:$0xff]  ;;  %v10391_v28 = vcombine.low %v413_v14, %v417_v16  ;;  %v10400_v42 = vcombine.high %v421_v24, %v425_v25 }
 0x2a0   :  { %v10402_v17 = vcombine.high %v422_v23, %v426_v26  ;;  %v10401_v37 = vcombine.low %v422_v23, %v426_v26  ;;  %v477_v26 = vld [vmem:[%s16227_s1 + $0xd50] sm:$0xff] }
 0x2a2   :  { %7106 = vmatpush1.bf16.msra.mxu0 %v10343_v4  ;;  %7450 = vmatpush1.bf16.msra.mxu1 %v10345_v5  ;;  %v433_v4 = vld [vmem:[%s16227_s1 + $0xbf0] sm:$0xff]  ;;  %v430_v5 = vld [vmem:[%s16227_s1 + $0xbd8] sm:$0xff] }
 0x2a3   :  { %7107 = vmatprep.subr.bf16.mxu0 %v10352_v34  ;;  %7451 = vmatprep.subr.bf16.mxu1 %v10354_v36  ;;  %v434_v34 = vld [vmem:[%s16227_s1 + $0xbf8] sm:$0xff]  ;;  %v10399_v36 = vcombine.low %v421_v24, %v425_v25  ;;  %v10408_v40 = vcombine.high %v429_v33, %v433_v4 }
 0x2a4   :  { %v10410_v44 = vcombine.high %v430_v5, %v434_v34  ;;  %v10409_v30 = vcombine.low %v430_v5, %v434_v34 }
 0x2a6   :  { %7108 = vmatpush1.bf16.msra.mxu0 %v10351_v3  ;;  %7452 = vmatpush1.bf16.msra.mxu1 %v10353_v47  ;;  %v441_v3 = vld [vmem:[%s16227_s1 + $0xc30] sm:$0xff]  ;;  %v438_v47 = vld [vmem:[%s16227_s1 + $0xc18] sm:$0xff] }
 0x2a7   :  { %7109 = vmatprep.subr.bf16.mxu0 %v10360_v29  ;;  %7453 = vmatprep.subr.bf16.mxu1 %v10362_v27  ;;  %v442_v29 = vld [vmem:[%s16227_s1 + $0xc38] sm:$0xff]  ;;  %v10407_v27 = vcombine.low %v429_v33, %v433_v4  ;;  %v10416_v49 = vcombine.high %v437_v1, %v441_v3  ;;  %v1075_v4 = vld [vmem:[%s16229_s2] sm:$0xff] }
 0x2a8   :  { %v10418_v50 = vcombine.high %v438_v47, %v442_v29  ;;  %v10417_v57 = vcombine.low %v438_v47, %v442_v29  ;;  %v486_v29 = vld [vmem:[%s16227_s1 + $0xd98] sm:$0xff] }
 0x2aa   :  { %7110 = vmatpush1.bf16.msra.mxu0 %v10359_v52  ;;  %7454 = vmatpush1.bf16.msra.mxu1 %v10361_v55  ;;  %v449_v52 = vld [vmem:[%s16227_s1 + $0xc70] sm:$0xff]  ;;  %v446_v55 = vld [vmem:[%s16227_s1 + $0xc58] sm:$0xff] }
 0x2ab   :  { %7111 = vmatprep.subr.bf16.mxu0 %v10368_v56  ;;  %7455 = vmatprep.subr.bf16.mxu1 %v10370_v35  ;;  %v450_v56 = vld [vmem:[%s16227_s1 + $0xc78] sm:$0xff]  ;;  %v10415_v35 = vcombine.low %v437_v1, %v441_v3  ;;  %v10424_v59 = vcombine.high %v445_v58, %v449_v52  ;;  %v485_v1 = vld [vmem:[%s16227_s1 + $0xd90] sm:$0xff] }
 0x2ac   :  { %v10426_v60 = vcombine.high %v446_v55, %v450_v56  ;;  %v10425_v32 = vcombine.low %v446_v55, %v450_v56  ;;  %v489_v3 = vld [vmem:[%s16227_s1 + $0xdb0] sm:$0xff] }
 0x2ad   :  { %v10464_v55 = vcombine.high %v485_v1, %v489_v3 }
 0x2ae   :  { %7112 = vmatpush1.bf16.msra.mxu0 %v10367_v62  ;;  %7456 = vmatpush1.bf16.msra.mxu1 %v10369_v0  ;;  %v457_v62 = vld [vmem:[%s16227_s1 + $0xcb0] sm:$0xff]  ;;  %v454_v0 = vld [vmem:[%s16227_s1 + $0xc98] sm:$0xff] }
 0x2af   :  { %7113 = vmatprep.subr.bf16.mxu0 %v10376_v6  ;;  %7457 = vmatprep.subr.bf16.mxu1 %v10378_v18  ;;  %v458_v6 = vld [vmem:[%s16227_s1 + $0xcb8] sm:$0xff]  ;;  %v10423_v18 = vcombine.low %v445_v58, %v449_v52  ;;  %v10432_v45 = vcombine.high %v453_v61, %v457_v62 }
 0x2b0   :  { %v10434_v46 = vcombine.high %v454_v0, %v458_v6  ;;  %v10433_v14 = vcombine.low %v454_v0, %v458_v6  ;;  %v494_v0 = vld [vmem:[%s16227_s1 + $0xdd8] sm:$0xff] }
 0x2b1   :  { %v498_v6 = vld [vmem:[%s16227_s1 + $0xdf8] sm:$0xff] }
 0x2b2   :  { %7114 = vmatpush1.bf16.msra.mxu0 %v10375_v9  ;;  %7458 = vmatpush1.bf16.msra.mxu1 %v10377_v11  ;;  %v465_v9 = vld [vmem:[%s16227_s1 + $0xcf0] sm:$0xff]  ;;  %v466_v11 = vld [vmem:[%s16227_s1 + $0xcf8] sm:$0xff] }
 0x2b3   :  { %7115 = vmatprep.subr.bf16.mxu0 %v10384_v12  ;;  %7459 = vmatprep.subr.bf16.mxu1 %v10386_v13  ;;  %v1077_v12 = vlaneseq  ;;  %v10431_v13 = vcombine.low %v453_v61, %v457_v62  ;;  %v10440_v16 = vcombine.high %v461_v7, %v465_v9 }
 0x2b6   :  { %7116 = vmatpush1.bf16.msra.mxu0 %v10383_v53  ;;  %7460 = vmatpush1.bf16.msra.mxu1 %v10385_v54  ;;  %v473_v53 = vld [vmem:[%s16227_s1 + $0xd30] sm:$0xff]  ;;  %v474_v54 = vld [vmem:[%s16227_s1 + $0xd38] sm:$0xff] }
 0x2b7   :  { %7117 = vmatprep.subr.bf16.mxu0 %v10392_v21  ;;  %7461 = vmatprep.subr.bf16.mxu1 %v10394_v22  ;;  %v14375_v21 = vshrl.u32 %v1077_v12, 7  ;;  %v10439_v22 = vcombine.low %v461_v7, %v465_v9  ;;  %v10448_v25 = vcombine.high %v469_v19, %v473_v53  ;;  %v10447_v33 = vcombine.low %v469_v19, %v473_v53 }
 0x2b8   :  { %v10463_v7 = vcombine.low %v485_v1, %v489_v3 }
 0x2b9   :  { %v1087_v5 = vsub.s32 2, %v14375_v21  ;;  %v1083_v34 = vsub.s32 1, %v14375_v21 }
 0x2ba   :  { %7118 = vmatpush1.bf16.msra.mxu0 %v10391_v28  ;;  %7462 = vmatpush1.bf16.msra.mxu1 %v10393_v41  ;;  %v481_v28 = vld [vmem:[%s16227_s1 + $0xd70] sm:$0xff]  ;;  %v1079_v41 = vsub.s32 0, %v14375_v21 }
 0x2bb   :  { %7119 = vmatprep.subr.bf16.mxu0 %v10400_v42  ;;  %7463 = vmatprep.subr.bf16.mxu1 %v10402_v17  ;;  %v478_v42 = vld [vmem:[%s16227_s1 + $0xd58] sm:$0xff] }
 0x2bc   :  { %v482_v17 = vld [vmem:[%s16227_s1 + $0xd78] sm:$0xff]  ;;  %v1080_v47 = vrot.slane %v1075_v4, %v1079_v41 }
 0x2bd   :  { %v10457_v52 = vcombine.low %v478_v42, %v482_v17 }
 0x2be   :  { %7120 = vmatpush1.bf16.msra.mxu0 %v10399_v36  ;;  %7464 = vmatpush1.bf16.msra.mxu1 %v10401_v37  ;;  %v1091_v37 = vsub.s32 3, %v14375_v21 }
 0x2bf   :  { %7121 = vmatprep.subr.bf16.mxu0 %v10408_v40  ;;  %7465 = vmatprep.subr.bf16.mxu1 %v10410_v44  ;;  %v10456_v40 = vcombine.high %v477_v26, %v481_v28  ;;  %v10458_v44 = vcombine.high %v478_v42, %v482_v17  ;;  %v506_v42 = vld [vmem:[%s16227_s1 + $0xe38] sm:$0xff] }
 0x2c0   :  { %v1092_v58 = vrot.slane %v1075_v4, %v1091_v37 }
 0x2c2   :  { %7122 = vmatpush1.bf16.msra.mxu0 %v10407_v27  ;;  %7466 = vmatpush1.bf16.msra.mxu1 %v10409_v30  ;;  %v490_v27 = vld [vmem:[%s16227_s1 + $0xdb8] sm:$0xff]  ;;  %v1088_v30 = vrot.slane %v1075_v4, %v1087_v5 }
 0x2c3   :  { %7134 = vmatprep.subr.bf16.mxu0 %v10416_v49  ;;  %7478 = vmatprep.subr.bf16.mxu1 %v10418_v50  ;;  %v1084_v49 = vrot.slane %v1075_v4, %v1083_v34  ;;  %v10455_v50 = vcombine.low %v477_v26, %v481_v28  ;;  %v10465_v9 = vcombine.low %v486_v29, %v490_v27  ;;  %v502_v28 = vld [vmem:[%s16227_s1 + $0xe18] sm:$0xff] }
 0x2c4   :  { %v10473_v26 = vcombine.low %v494_v0, %v498_v6 }
 0x2c5   :  { %7124 = vmatmul.mubr.bf16.vlgmr.msra.gmra.mrb[4].mxu0 %v12672_v43  ;;  %7468 = vmatmul.mubr.bf16.vlgmr.msra.gmra.mrb[4].mxu1 %v12672_v43  ;;  %v462_v43 = vld [vmem:[%s16227_s1 + $0xcd8] sm:$0xff] }
 0x2c6   :  { %7135 = vmatpush1.bf16.msra.mxu0 %v10415_v35  ;;  %7479 = vmatpush1.bf16.msra.mxu1 %v10417_v57  ;;  %v10442_v15 = vcombine.high %v462_v43, %v466_v11  ;;  %v10441_v24 = vcombine.low %v462_v43, %v466_v11  ;;  %v10466_v35 = vcombine.high %v486_v29, %v490_v27  ;;  %v493_v57 = vld [vmem:[%s16227_s1 + $0xdd0] sm:$0xff] }
 0x2c7   :  { %7136 = vmatprep.subr.bf16.mxu0 %v10424_v59  ;;  %7480 = vmatprep.subr.bf16.mxu1 %v10426_v60  ;;  %v497_v59 = vld [vmem:[%s16227_s1 + $0xdf0] sm:$0xff]  ;;  %v10482_v27 = vcombine.high %v502_v28, %v506_v42 }
 0x2c8   :  { %7166 = vmatprep.mubr.bf16.mxu0 %v12695_v51  ;;  %7510 = vmatprep.mubr.bf16.mxu1 %v12695_v51  ;;  %v470_v51 = vld [vmem:[%s16227_s1 + $0xd18] sm:$0xff]  ;;  %v10471_v53 = vcombine.low %v493_v57, %v497_v59 }
 0x2c9   :  { %v10450_v23 = vcombine.high %v470_v51, %v474_v54  ;;  %v10449_v36 = vcombine.low %v470_v51, %v474_v54  ;;  %v10474_v51 = vcombine.high %v494_v0, %v498_v6  ;;  %v501_v54 = vld [vmem:[%s16227_s1 + $0xe10] sm:$0xff] }
 0x2ca   :  { %7137 = vmatpush1.bf16.msra.mxu0 %v10423_v18  ;;  %7481 = vmatpush1.bf16.msra.mxu1 %v10425_v32 }
 0x2cb   :  { %7138 = vmatprep.subr.bf16.mxu0 %v10432_v45  ;;  %7482 = vmatprep.subr.bf16.mxu1 %v10434_v46 }
 0x2ce   :  { %7139 = vmatpush1.bf16.msra.mxu0 %v10431_v13  ;;  %7483 = vmatpush1.bf16.msra.mxu1 %v10433_v14  ;;  %v10472_v14 = vcombine.high %v493_v57, %v497_v59  ;;  %v517_v59 = vld [vmem:[%s16227_s1 + $0xe90] sm:$0xff] }
 0x2cf   :  { %7140 = vmatprep.subr.bf16.mxu0 %v10440_v16  ;;  %7484 = vmatprep.subr.bf16.mxu1 %v10442_v15 }
 0x2d2   :  { %7141 = vmatpush1.bf16.msra.mxu0 %v10439_v22  ;;  %7485 = vmatpush1.bf16.msra.mxu1 %v10441_v24  ;;  %v505_v22 = vld [vmem:[%s16227_s1 + $0xe30] sm:$0xff] }
 0x2d3   :  { %7142 = vmatprep.subr.bf16.mxu0 %v10448_v25  ;;  %7486 = vmatprep.subr.bf16.mxu1 %v10450_v23  ;;  %v10480_v3 = vcombine.high %v501_v54, %v505_v22 }
 0x2d6   :  { %7143 = vmatpush1.bf16.msra.mxu0 %v10447_v33  ;;  %7487 = vmatpush1.bf16.msra.mxu1 %v10449_v36 }
 0x2d7   :  { %7144 = vmatprep.subr.bf16.mxu0 %v10456_v40  ;;  %7488 = vmatprep.subr.bf16.mxu1 %v10458_v44 }
 0x2d8   :  { %v6652_v56 = vpop.f32.mrb[0].mxu0  ;;  %v6996_v61 = vpop.f32.mrb[0].mxu1 }
 0x2d9   :  { %v11386_v60 = vadd.f32 %v6652_v56, %v1080_v47  ;;  %v6654_v62 = vpop.f32.mrb[1].mxu0  ;;  %v11390_v18 = vadd.f32 %v6996_v61, %v1088_v30  ;;  %v6998_v45 = vpop.f32.mrb[1].mxu1  ;;  %v10481_v56 = vcombine.low %v502_v28, %v506_v42  ;;  %v518_v61 = vld [vmem:[%s16227_s1 + $0xe98] sm:$0xff] }
 0x2da   :  { %v11387_v32 = vadd.f32 %v6654_v62, %v1084_v49  ;;  %v6656_v46 = vpop.f32.mrb[2].mxu0  ;;  %7145 = vmatpush1.bf16.msra.mxu0 %v10455_v50  ;;  %v11391_v43 = vadd.f32 %v6998_v45, %v1092_v58  ;;  %v7000_v12 = vpop.f32.mrb[2].mxu1  ;;  %7489 = vmatpush1.bf16.msra.mxu1 %v10457_v52  ;;  %v514_v52 = vld [vmem:[%s16227_s1 + $0xe78] sm:$0xff]  ;;  %v525_v45 = vld [vmem:[%s16227_s1 + $0xed0] sm:$0xff] }
 0x2db   :  { %v11388_v11 = vadd.f32 %v6656_v46, %v1080_v47  ;;  %v6658_v13 = vpop.f32.mrb[3].mxu0  ;;  %7146 = vmatprep.subr.bf16.mxu0 %v10464_v55  ;;  %v11392_v16 = vadd.f32 %v7000_v12, %v1088_v30  ;;  %v7002_v19 = vpop.f32.mrb[3].mxu1  ;;  %7490 = vmatprep.subr.bf16.mxu1 %v10466_v35  ;;  %v7693_v24 = vmax.f32 %v11386_v60, 0.0  ;;  %v7695_v17 = vmax.f32 %v11390_v18, 0.0  ;;  %v509_v30 = vld [vmem:[%s16227_s1 + $0xe50] sm:$0xff]  ;;  %v522_v62 = vld [vmem:[%s16227_s1 + $0xeb8] sm:$0xff] }
 0x2dc   :  { %v11389_v15 = vadd.f32 %v6658_v13, %v1084_v49  ;;  %v11393_v23 = vadd.f32 %v7002_v19, %v1092_v58  ;;  %v7694_v33 = vmax.f32 %v11387_v32, 0.0  ;;  %v7696_v40 = vmax.f32 %v11391_v43, 0.0  ;;  %v513_v49 = vld [vmem:[%s16227_s1 + $0xe70] sm:$0xff]  ;;  %v510_v58 = vld [vmem:[%s16227_s1 + $0xe58] sm:$0xff] }
 0x2dd   :  { %v7701_v25 = vmax.f32 %v11388_v11, 0.0  ;;  %v7703_v4 = vmax.f32 %v11392_v16, 0.0  ;;  %v10479_v55 = vcombine.low %v501_v54, %v505_v22  ;;  %v10488_v35 = vcombine.high %v509_v30, %v513_v49  ;;  %v521_v60 = vld [vmem:[%s16227_s1 + $0xeb0] sm:$0xff]  ;;  %v538_v19 = vld [vmem:[%s16227_s1 + $0xf38] sm:$0xff] }
 0x2de   :  { %v7702_v36 = vmax.f32 %v11389_v15, 0.0  ;;  %7147 = vmatpush1.bf16.msra.mxu0 %v10463_v7  ;;  %v7704_v1 = vmax.f32 %v11393_v23, 0.0  ;;  %7491 = vmatpush1.bf16.msra.mxu1 %v10465_v9  ;;  %v10490_v57 = vcombine.high %v510_v58, %v514_v52  ;;  %v10487_v0 = vcombine.low %v509_v30, %v513_v49  ;;  %v529_v46 = vld [vmem:[%s16227_s1 + $0xef0] sm:$0xff]  ;;  %v526_v7 = vld [vmem:[%s16227_s1 + $0xed8] sm:$0xff] }
 0x2df   :  { %v14440_v44 = vpack.c.bf16 %v7701_v25, %v7693_v24  ;;  %7148 = vmatprep.subr.bf16.mxu0 %v10472_v14  ;;  %v14442_v47 = vpack.c.bf16 %v7703_v4, %v7695_v17  ;;  %7492 = vmatprep.subr.bf16.mxu1 %v10474_v51  ;;  %v10489_v6 = vcombine.low %v510_v58, %v514_v52  ;;  %v530_v9 = vld [vmem:[%s16227_s1 + $0xef8] sm:$0xff]  ;;  %v533_v14 = vld [vmem:[%s16227_s1 + $0xf10] sm:$0xff] }
 0x2e0   :  { %v14444_v29 = vpack.c.bf16 %v7702_v36, %v7694_v33  ;;  %v14452_v50 = vpack.c.bf16 %v7704_v1, %v7696_v40  ;;  %v10496_v18 = vcombine.high %v517_v59, %v521_v60  ;;  %v10498_v32 = vcombine.high %v518_v61, %v522_v62  ;;  %v537_v16 = vld [vmem:[%s16227_s1 + $0xf30] sm:$0xff]  ;;  %v534_v15 = vld [vmem:[%s16227_s1 + $0xf18] sm:$0xff] }
 0x2e1   :  { %v10495_v43 = vcombine.low %v517_v59, %v521_v60  ;;  %v10497_v11 = vcombine.low %v518_v61, %v522_v62  ;;  %v10504_v12 = vcombine.high %v525_v45, %v529_v46  ;;  %v10506_v13 = vcombine.high %v526_v7, %v530_v9  ;;  %v541_v24 = vld [vmem:[%s16227_s1 + $0xf50] sm:$0xff]  ;;  %v542_v23 = vld [vmem:[%s16227_s1 + $0xf58] sm:$0xff] }
 0x2e2   :  { %7149 = vmatpush1.bf16.msra.mxu0 %v10471_v53  ;;  %7493 = vmatpush1.bf16.msra.mxu1 %v10473_v26  ;;  %v10503_v53 = vcombine.low %v525_v45, %v529_v46  ;;  %v10505_v51 = vcombine.low %v526_v7, %v530_v9  ;;  %v10512_v54 = vcombine.high %v533_v14, %v537_v16  ;;  %v545_v25 = vld [vmem:[%s16227_s1 + $0xf70] sm:$0xff]  ;;  %v546_v26 = vld [vmem:[%s16227_s1 + $0xf78] sm:$0xff] }
 0x2e3   :  { %7150 = vmatprep.subr.bf16.mxu0 %v10480_v3  ;;  %7494 = vmatprep.subr.bf16.mxu1 %v10482_v27  ;;  %v10514_v22 = vcombine.high %v534_v15, %v538_v19  ;;  %v10511_v28 = vcombine.low %v533_v14, %v537_v16  ;;  %v10513_v42 = vcombine.low %v534_v15, %v538_v19  ;;  %v549_v4 = vld [vmem:[%s16227_s1 + $0xf90] sm:$0xff]  ;;  %v550_v40 = vld [vmem:[%s16227_s1 + $0xf98] sm:$0xff] }
 0x2e4   :  { %v10520_v17 = vcombine.high %v541_v24, %v545_v25  ;;  %v10522_v33 = vcombine.high %v542_v23, %v546_v26  ;;  %v553_v36 = vld [vmem:[%s16227_s1 + $0xfb0] sm:$0xff]  ;;  %v554_v1 = vld [vmem:[%s16227_s1 + $0xfb8] sm:$0xff]  ;;  %v10519_v3 = vcombine.low %v541_v24, %v545_v25  ;;  %v10521_v27 = vcombine.low %v542_v23, %v546_v26 }
 0x2e5   :  { %v10528_v30 = vcombine.high %v549_v4, %v553_v36  ;;  %v10530_v49 = vcombine.high %v550_v40, %v554_v1  ;;  %v557_v58 = vld [vmem:[%s16227_s1 + $0xfd0] sm:$0xff] }
 0x2e6   :  { %7151 = vmatpush1.bf16.msra.mxu0 %v10479_v55  ;;  %7495 = vmatpush1.bf16.msra.mxu1 %v10481_v56  ;;  %v561_v52 = vld [vmem:[%s16227_s1 + $0xff0] sm:$0xff]  ;;  %v558_v55 = vld [vmem:[%s16227_s1 + $0xfd8] sm:$0xff] }
 0x2e7   :  { %7152 = vmatprep.subr.bf16.mxu0 %v10488_v35  ;;  %7496 = vmatprep.subr.bf16.mxu1 %v10490_v57  ;;  %v562_v56 = vld [vmem:[%s16227_s1 + $0xff8] sm:$0xff]  ;;  %v10527_v35 = vcombine.low %v549_v4, %v553_v36  ;;  %v10529_v57 = vcombine.low %v550_v40, %v554_v1  ;;  %v10536_v59 = vcombine.high %v557_v58, %v561_v52  ;;  %v565_v61 = vld [vmem:[%s16227_s1 + $0x1010] sm:$0xff] }
 0x2e8   :  { %v10538_v60 = vcombine.high %v558_v55, %v562_v56  ;;  %v569_v62 = vld [vmem:[%s16227_s1 + $0x1030] sm:$0xff]  ;;  %v602_v1 = vld [vmem:[%s16227_s1 + $0x1138] sm:$0xff] }
 0x2e9   :  { %v10544_v45 = vcombine.high %v565_v61, %v569_v62  ;;  %v573_v7 = vld [vmem:[%s16227_s1 + $0x1050] sm:$0xff] }
 0x2ea   :  { %7153 = vmatpush1.bf16.msra.mxu0 %v10487_v0  ;;  %7497 = vmatpush1.bf16.msra.mxu1 %v10489_v6  ;;  %v566_v0 = vld [vmem:[%s16227_s1 + $0x1018] sm:$0xff]  ;;  %v577_v9 = vld [vmem:[%s16227_s1 + $0x1070] sm:$0xff] }
 0x2eb   :  { %7154 = vmatprep.subr.bf16.mxu0 %v10496_v18  ;;  %7498 = vmatprep.subr.bf16.mxu1 %v10498_v32  ;;  %v570_v6 = vld [vmem:[%s16227_s1 + $0x1038] sm:$0xff]  ;;  %v10535_v18 = vcombine.low %v557_v58, %v561_v52  ;;  %v10537_v32 = vcombine.low %v558_v55, %v562_v56  ;;  %v10552_v14 = vcombine.high %v573_v7, %v577_v9  ;;  %v581_v15 = vld [vmem:[%s16227_s1 + $0x1090] sm:$0xff] }
 0x2ec   :  { %v10546_v46 = vcombine.high %v566_v0, %v570_v6  ;;  %v585_v19 = vld [vmem:[%s16227_s1 + $0x10b0] sm:$0xff]  ;;  %v606_v55 = vld [vmem:[%s16227_s1 + $0x1158] sm:$0xff] }
 0x2ed   :  { %v10560_v24 = vcombine.high %v581_v15, %v585_v19  ;;  %v589_v23 = vld [vmem:[%s16227_s1 + $0x10d0] sm:$0xff]  ;;  %v610_v56 = vld [vmem:[%s16227_s1 + $0x1178] sm:$0xff] }
 0x2ee   :  { %7155 = vmatpush1.bf16.msra.mxu0 %v10495_v43  ;;  %7499 = vmatpush1.bf16.msra.mxu1 %v10497_v11  ;;  %v574_v43 = vld [vmem:[%s16227_s1 + $0x1058] sm:$0xff]  ;;  %v593_v26 = vld [vmem:[%s16227_s1 + $0x10f0] sm:$0xff] }
 0x2ef   :  { %7156 = vmatprep.subr.bf16.mxu0 %v10504_v12  ;;  %7500 = vmatprep.subr.bf16.mxu1 %v10506_v13  ;;  %v578_v11 = vld [vmem:[%s16227_s1 + $0x1078] sm:$0xff]  ;;  %v10543_v12 = vcombine.low %v565_v61, %v569_v62  ;;  %v10545_v13 = vcombine.low %v566_v0, %v570_v6  ;;  %v597_v36 = vld [vmem:[%s16227_s1 + $0x1110] sm:$0xff] }
 0x2f0   :  { %v10554_v16 = vcombine.high %v574_v43, %v578_v11  ;;  %v601_v40 = vld [vmem:[%s16227_s1 + $0x1130] sm:$0xff]  ;;  %v614_v0 = vld [vmem:[%s16227_s1 + $0x1198] sm:$0xff] }
 0x2f1   :  { %v605_v58 = vld [vmem:[%s16227_s1 + $0x1150] sm:$0xff]  ;;  %v618_v6 = vld [vmem:[%s16227_s1 + $0x11b8] sm:$0xff] }
 0x2f2   :  { %7157 = vmatpush1.bf16.msra.mxu0 %v10503_v53  ;;  %7501 = vmatpush1.bf16.msra.mxu1 %v10505_v51  ;;  %v582_v53 = vld [vmem:[%s16227_s1 + $0x1098] sm:$0xff]  ;;  %v609_v52 = vld [vmem:[%s16227_s1 + $0x1170] sm:$0xff] }
 0x2f3   :  { %7158 = vmatprep.subr.bf16.mxu0 %v10512_v54  ;;  %7502 = vmatprep.subr.bf16.mxu1 %v10514_v22  ;;  %v586_v51 = vld [vmem:[%s16227_s1 + $0x10b8] sm:$0xff]  ;;  %v10551_v54 = vcombine.low %v573_v7, %v577_v9  ;;  %v10553_v22 = vcombine.low %v574_v43, %v578_v11  ;;  %v613_v61 = vld [vmem:[%s16227_s1 + $0x1190] sm:$0xff] }
 0x2f4   :  { %v10562_v25 = vcombine.high %v582_v53, %v586_v51  ;;  %v617_v62 = vld [vmem:[%s16227_s1 + $0x11b0] sm:$0xff]  ;;  %v622_v43 = vld [vmem:[%s16227_s1 + $0x11d8] sm:$0xff] }
 0x2f5   :  { %v621_v7 = vld [vmem:[%s16227_s1 + $0x11d0] sm:$0xff]  ;;  %v626_v11 = vld [vmem:[%s16227_s1 + $0x11f8] sm:$0xff] }
 0x2f6   :  { %7159 = vmatpush1.bf16.msra.mxu0 %v10511_v28  ;;  %7503 = vmatpush1.bf16.msra.mxu1 %v10513_v42  ;;  %v594_v28 = vld [vmem:[%s16227_s1 + $0x10f8] sm:$0xff]  ;;  %v10559_v42 = vcombine.low %v581_v15, %v585_v19  ;;  %v625_v9 = vld [vmem:[%s16227_s1 + $0x11f0] sm:$0xff] }
 0x2f7   :  { %7160 = vmatprep.subr.bf16.mxu0 %v10520_v17  ;;  %7504 = vmatprep.subr.bf16.mxu1 %v10522_v33  ;;  %v10561_v17 = vcombine.low %v582_v53, %v586_v51  ;;  %v10568_v33 = vcombine.high %v589_v23, %v593_v26  ;;  %v629_v15 = vld [vmem:[%s16227_s1 + $0x1210] sm:$0xff]  ;;  %v630_v53 = vld [vmem:[%s16227_s1 + $0x1218] sm:$0xff] }
 0x2f8   :  { %v633_v19 = vld [vmem:[%s16227_s1 + $0x1230] sm:$0xff]  ;;  %v634_v51 = vld [vmem:[%s16227_s1 + $0x1238] sm:$0xff] }
 0x2fa   :  { %7161 = vmatpush1.bf16.msra.mxu0 %v10519_v3  ;;  %7505 = vmatpush1.bf16.msra.mxu1 %v10521_v27  ;;  %v10567_v3 = vcombine.low %v589_v23, %v593_v26  ;;  %v637_v23 = vld [vmem:[%s16227_s1 + $0x1250] sm:$0xff] }
 0x2fb   :  { %7162 = vmatprep.subr.bf16.mxu0 %v10528_v30  ;;  %7506 = vmatprep.subr.bf16.mxu1 %v10530_v49  ;;  %v10576_v30 = vcombine.high %v597_v36, %v601_v40  ;;  %v641_v26 = vld [vmem:[%s16227_s1 + $0x1270] sm:$0xff] }
 0x2fe   :  { %7163 = vmatpush1.bf16.msra.mxu0 %v10527_v35  ;;  %7507 = vmatpush1.bf16.msra.mxu1 %v10529_v57  ;;  %v10575_v35 = vcombine.low %v597_v36, %v601_v40  ;;  %v645_v36 = vld [vmem:[%s16227_s1 + $0x1290] sm:$0xff] }
 0x2ff   :  { %7164 = vmatprep.subr.bf16.mxu0 %v10536_v59  ;;  %7508 = vmatprep.subr.bf16.mxu1 %v10538_v60  ;;  %v10584_v59 = vcombine.high %v605_v58, %v609_v52  ;;  %v10586_v60 = vcombine.high %v606_v55, %v610_v56  ;;  %v649_v40 = vld [vmem:[%s16227_s1 + $0x12b0] sm:$0xff] }
 0x302   :  { %7165 = vmatpush1.bf16.msra.mxu0 %v10535_v18  ;;  %7509 = vmatpush1.bf16.msra.mxu1 %v10537_v32  ;;  %v10583_v18 = vcombine.low %v605_v58, %v609_v52  ;;  %v10585_v32 = vcombine.low %v606_v55, %v610_v56  ;;  %v653_v58 = vld [vmem:[%s16227_s1 + $0x12d0] sm:$0xff]  ;;  %v654_v55 = vld [vmem:[%s16227_s1 + $0x12d8] sm:$0xff] }
 0x303   :  { %7177 = vmatprep.subr.bf16.mxu0 %v10544_v45  ;;  %7521 = vmatprep.subr.bf16.mxu1 %v10546_v46  ;;  %v10592_v45 = vcombine.high %v613_v61, %v617_v62  ;;  %v10594_v46 = vcombine.high %v614_v0, %v618_v6  ;;  %v657_v52 = vld [vmem:[%s16227_s1 + $0x12f0] sm:$0xff]  ;;  %v658_v56 = vld [vmem:[%s16227_s1 + $0x12f8] sm:$0xff] }
 0x305   :  { %7167 = vmatmul.mubr.bf16.vlgmr.msra.gmra.mrb[4].mxu0 %v12886_v2  ;;  %7511 = vmatmul.mubr.bf16.vlgmr.msra.gmra.mrb[4].mxu1 %v12886_v2  ;;  %v590_v2 = vld [vmem:[%s16227_s1 + $0x10d8] sm:$0xff] }
 0x306   :  { %7178 = vmatpush1.bf16.msra.mxu0 %v10543_v12  ;;  %7522 = vmatpush1.bf16.msra.mxu1 %v10545_v13  ;;  %v10570_v4 = vcombine.high %v590_v2, %v594_v28  ;;  %v10569_v27 = vcombine.low %v590_v2, %v594_v28  ;;  %v10591_v12 = vcombine.low %v613_v61, %v617_v62  ;;  %v638_v2 = vld [vmem:[%s16227_s1 + $0x1258] sm:$0xff]  ;;  %v661_v61 = vld [vmem:[%s16227_s1 + $0x1310] sm:$0xff] }
 0x307   :  { %7179 = vmatprep.subr.bf16.mxu0 %v10552_v14  ;;  %7523 = vmatprep.subr.bf16.mxu1 %v10554_v16  ;;  %v10593_v13 = vcombine.low %v614_v0, %v618_v6  ;;  %v10600_v14 = vcombine.high %v621_v7, %v625_v9  ;;  %v10602_v16 = vcombine.high %v622_v43, %v626_v11  ;;  %v642_v28 = vld [vmem:[%s16227_s1 + $0x1278] sm:$0xff]  ;;  %v665_v62 = vld [vmem:[%s16227_s1 + $0x1330] sm:$0xff] }
 0x308   :  { %7209 = vmatprep.mubr.bf16.mxu0 %v12909_v10  ;;  %7553 = vmatprep.mubr.bf16.mxu1 %v12909_v10  ;;  %v598_v10 = vld [vmem:[%s16227_s1 + $0x1118] sm:$0xff] }
 0x309   :  { %v10578_v49 = vcombine.high %v598_v10, %v602_v1  ;;  %v10577_v57 = vcombine.low %v598_v10, %v602_v1  ;;  %v646_v10 = vld [vmem:[%s16227_s1 + $0x1298] sm:$0xff] }
 0x30a   :  { %7180 = vmatpush1.bf16.msra.mxu0 %v10551_v54  ;;  %7524 = vmatpush1.bf16.msra.mxu1 %v10553_v22  ;;  %v10599_v54 = vcombine.low %v621_v7, %v625_v9  ;;  %v10601_v22 = vcombine.low %v622_v43, %v626_v11  ;;  %v650_v1 = vld [vmem:[%s16227_s1 + $0x12b8] sm:$0xff]  ;;  %v669_v7 = vld [vmem:[%s16227_s1 + $0x1350] sm:$0xff] }
 0x30b   :  { %7181 = vmatprep.subr.bf16.mxu0 %v10560_v24  ;;  %7525 = vmatprep.subr.bf16.mxu1 %v10562_v25  ;;  %v10608_v24 = vcombine.high %v629_v15, %v633_v19  ;;  %v10610_v25 = vcombine.high %v630_v53, %v634_v51  ;;  %v662_v0 = vld [vmem:[%s16227_s1 + $0x1318] sm:$0xff]  ;;  %v673_v9 = vld [vmem:[%s16227_s1 + $0x1370] sm:$0xff] }
 0x30c   :  { %v666_v6 = vld [vmem:[%s16227_s1 + $0x1338] sm:$0xff] }
 0x30d   :  { %v670_v43 = vld [vmem:[%s16227_s1 + $0x1358] sm:$0xff] }
 0x30e   :  { %7182 = vmatpush1.bf16.msra.mxu0 %v10559_v42  ;;  %7526 = vmatpush1.bf16.msra.mxu1 %v10561_v17  ;;  %v10607_v42 = vcombine.low %v629_v15, %v633_v19  ;;  %v10609_v17 = vcombine.low %v630_v53, %v634_v51  ;;  %v674_v11 = vld [vmem:[%s16227_s1 + $0x1378] sm:$0xff]  ;;  %v677_v15 = vld [vmem:[%s16227_s1 + $0x1390] sm:$0xff] }
 0x30f   :  { %7183 = vmatprep.subr.bf16.mxu0 %v10568_v33  ;;  %7527 = vmatprep.subr.bf16.mxu1 %v10570_v4  ;;  %v10616_v33 = vcombine.high %v637_v23, %v641_v26  ;;  %v10618_v4 = vcombine.high %v638_v2, %v642_v28  ;;  %v681_v19 = vld [vmem:[%s16227_s1 + $0x13b0] sm:$0xff]  ;;  %v678_v53 = vld [vmem:[%s16227_s1 + $0x1398] sm:$0xff] }
 0x310   :  { %v682_v51 = vld [vmem:[%s16227_s1 + $0x13b8] sm:$0xff] }
 0x312   :  { %7184 = vmatpush1.bf16.msra.mxu0 %v10567_v3  ;;  %7528 = vmatpush1.bf16.msra.mxu1 %v10569_v27  ;;  %v10615_v3 = vcombine.low %v637_v23, %v641_v26  ;;  %v10617_v27 = vcombine.low %v638_v2, %v642_v28  ;;  %v685_v23 = vld [vmem:[%s16227_s1 + $0x13d0] sm:$0xff]  ;;  %v686_v2 = vld [vmem:[%s16227_s1 + $0x13d8] sm:$0xff] }
 0x313   :  { %7185 = vmatprep.subr.bf16.mxu0 %v10576_v30  ;;  %7529 = vmatprep.subr.bf16.mxu1 %v10578_v49  ;;  %v10624_v30 = vcombine.high %v645_v36, %v649_v40  ;;  %v10626_v49 = vcombine.high %v646_v10, %v650_v1  ;;  %v689_v26 = vld [vmem:[%s16227_s1 + $0x13f0] sm:$0xff]  ;;  %v690_v28 = vld [vmem:[%s16227_s1 + $0x13f8] sm:$0xff] }
 0x316   :  { %7186 = vmatpush1.bf16.msra.mxu0 %v10575_v35  ;;  %7530 = vmatpush1.bf16.msra.mxu1 %v10577_v57  ;;  %v10623_v35 = vcombine.low %v645_v36, %v649_v40  ;;  %v10625_v57 = vcombine.low %v646_v10, %v650_v1  ;;  %v693_v36 = vld [vmem:[%s16227_s1 + $0x1410] sm:$0xff]  ;;  %v694_v10 = vld [vmem:[%s16227_s1 + $0x1418] sm:$0xff] }
 0x317   :  { %7187 = vmatprep.subr.bf16.mxu0 %v10584_v59  ;;  %7531 = vmatprep.subr.bf16.mxu1 %v10586_v60  ;;  %v10632_v59 = vcombine.high %v653_v58, %v657_v52  ;;  %v10634_v60 = vcombine.high %v654_v55, %v658_v56  ;;  %v697_v40 = vld [vmem:[%s16227_s1 + $0x1430] sm:$0xff]  ;;  %v698_v1 = vld [vmem:[%s16227_s1 + $0x1438] sm:$0xff] }
 0x31a   :  { %7188 = vmatpush1.bf16.msra.mxu0 %v10583_v18  ;;  %7532 = vmatpush1.bf16.msra.mxu1 %v10585_v32  ;;  %v10631_v18 = vcombine.low %v653_v58, %v657_v52  ;;  %v10633_v32 = vcombine.low %v654_v55, %v658_v56  ;;  %v701_v58 = vld [vmem:[%s16227_s1 + $0x1450] sm:$0xff]  ;;  %v702_v55 = vld [vmem:[%s16227_s1 + $0x1458] sm:$0xff] }
 0x31b   :  { %7189 = vmatprep.subr.bf16.mxu0 %v10592_v45  ;;  %7533 = vmatprep.subr.bf16.mxu1 %v10594_v46  ;;  %v10640_v45 = vcombine.high %v661_v61, %v665_v62  ;;  %v10642_v46 = vcombine.high %v662_v0, %v666_v6  ;;  %v705_v52 = vld [vmem:[%s16227_s1 + $0x1470] sm:$0xff]  ;;  %v706_v56 = vld [vmem:[%s16227_s1 + $0x1478] sm:$0xff] }
 0x31e   :  { %7190 = vmatpush1.bf16.msra.mxu0 %v10591_v12  ;;  %7534 = vmatpush1.bf16.msra.mxu1 %v10593_v13  ;;  %v10639_v12 = vcombine.low %v661_v61, %v665_v62  ;;  %v10641_v13 = vcombine.low %v662_v0, %v666_v6  ;;  %v709_v61 = vld [vmem:[%s16227_s1 + $0x1490] sm:$0xff]  ;;  %v710_v0 = vld [vmem:[%s16227_s1 + $0x1498] sm:$0xff] }
 0x31f   :  { %7191 = vmatprep.subr.bf16.mxu0 %v10600_v14  ;;  %7535 = vmatprep.subr.bf16.mxu1 %v10602_v16  ;;  %v10648_v14 = vcombine.high %v669_v7, %v673_v9  ;;  %v10650_v16 = vcombine.high %v670_v43, %v674_v11  ;;  %v713_v62 = vld [vmem:[%s16227_s1 + $0x14b0] sm:$0xff]  ;;  %v714_v6 = vld [vmem:[%s16227_s1 + $0x14b8] sm:$0xff] }
 0x322   :  { %7192 = vmatpush1.bf16.msra.mxu0 %v10599_v54  ;;  %7536 = vmatpush1.bf16.msra.mxu1 %v10601_v22  ;;  %v10647_v54 = vcombine.low %v669_v7, %v673_v9  ;;  %v10649_v22 = vcombine.low %v670_v43, %v674_v11  ;;  %v717_v7 = vld [vmem:[%s16227_s1 + $0x14d0] sm:$0xff]  ;;  %v722_v43 = vld [vmem:[%s16227_s1 + $0x14f8] sm:$0xff]  ;;  %v10687_v11 = vcombine.low %v709_v61, %v713_v62 }
 0x323   :  { %7193 = vmatprep.subr.bf16.mxu0 %v10608_v24  ;;  %7537 = vmatprep.subr.bf16.mxu1 %v10610_v25  ;;  %v10656_v24 = vcombine.high %v677_v15, %v681_v19  ;;  %v10658_v25 = vcombine.high %v678_v53, %v682_v51  ;;  %v721_v9 = vld [vmem:[%s16227_s1 + $0x14f0] sm:$0xff] }
 0x326   :  { %7194 = vmatpush1.bf16.msra.mxu0 %v10607_v42  ;;  %7538 = vmatpush1.bf16.msra.mxu1 %v10609_v17  ;;  %v10655_v42 = vcombine.low %v677_v15, %v681_v19  ;;  %v10657_v17 = vcombine.low %v678_v53, %v682_v51  ;;  %v729_v15 = vld [vmem:[%s16227_s1 + $0x1530] sm:$0xff]  ;;  %v730_v19 = vld [vmem:[%s16227_s1 + $0x1538] sm:$0xff]  ;;  %v10695_v53 = vcombine.low %v717_v7, %v721_v9 }
 0x327   :  { %7195 = vmatprep.subr.bf16.mxu0 %v10616_v33  ;;  %7539 = vmatprep.subr.bf16.mxu1 %v10618_v4  ;;  %v10664_v33 = vcombine.high %v685_v23, %v689_v26  ;;  %v10666_v4 = vcombine.high %v686_v2, %v690_v28 }
 0x32a   :  { %7196 = vmatpush1.bf16.msra.mxu0 %v10615_v3  ;;  %7540 = vmatpush1.bf16.msra.mxu1 %v10617_v27  ;;  %v10663_v3 = vcombine.low %v685_v23, %v689_v26  ;;  %v10665_v27 = vcombine.low %v686_v2, %v690_v28  ;;  %v734_v23 = vld [vmem:[%s16227_s1 + $0x1558] sm:$0xff] }
 0x32b   :  { %7197 = vmatprep.subr.bf16.mxu0 %v10624_v30  ;;  %7541 = vmatprep.subr.bf16.mxu1 %v10626_v49  ;;  %v10672_v30 = vcombine.high %v693_v36, %v697_v40  ;;  %v10674_v49 = vcombine.high %v694_v10, %v698_v1  ;;  %v738_v26 = vld [vmem:[%s16227_s1 + $0x1578] sm:$0xff] }
 0x32e   :  { %7198 = vmatpush1.bf16.msra.mxu0 %v10623_v35  ;;  %7542 = vmatpush1.bf16.msra.mxu1 %v10625_v57  ;;  %v10671_v35 = vcombine.low %v693_v36, %v697_v40  ;;  %v10673_v57 = vcombine.low %v694_v10, %v698_v1  ;;  %v742_v36 = vld [vmem:[%s16227_s1 + $0x1598] sm:$0xff]  ;;  %v10713_v1 = vcombine.low %v734_v23, %v738_v26 }
 0x32f   :  { %7199 = vmatprep.subr.bf16.mxu0 %v10632_v59  ;;  %7543 = vmatprep.subr.bf16.mxu1 %v10634_v60  ;;  %v10680_v59 = vcombine.high %v701_v58, %v705_v52  ;;  %v10682_v60 = vcombine.high %v702_v55, %v706_v56  ;;  %v746_v40 = vld [vmem:[%s16227_s1 + $0x15b8] sm:$0xff] }
 0x332   :  { %7200 = vmatpush1.bf16.msra.mxu0 %v10631_v18  ;;  %7544 = vmatpush1.bf16.msra.mxu1 %v10633_v32  ;;  %v10679_v18 = vcombine.low %v701_v58, %v705_v52  ;;  %v10681_v32 = vcombine.low %v702_v55, %v706_v56  ;;  %v750_v58 = vld [vmem:[%s16227_s1 + $0x15d8] sm:$0xff]  ;;  %v10721_v56 = vcombine.low %v742_v36, %v746_v40 }
 0x333   :  { %7201 = vmatprep.subr.bf16.mxu0 %v10640_v45  ;;  %7545 = vmatprep.subr.bf16.mxu1 %v10642_v46  ;;  %v10688_v45 = vcombine.high %v709_v61, %v713_v62  ;;  %v10690_v46 = vcombine.high %v710_v0, %v714_v6  ;;  %v754_v52 = vld [vmem:[%s16227_s1 + $0x15f8] sm:$0xff] }
 0x334   :  { %v758_v61 = vld [vmem:[%s16227_s1 + $0x1618] sm:$0xff] }
 0x335   :  { %v762_v62 = vld [vmem:[%s16227_s1 + $0x1638] sm:$0xff] }
 0x336   :  { %7202 = vmatpush1.bf16.msra.mxu0 %v10639_v12  ;;  %7546 = vmatpush1.bf16.msra.mxu1 %v10641_v13  ;;  %v10689_v12 = vcombine.low %v710_v0, %v714_v6  ;;  %v10696_v13 = vcombine.high %v717_v7, %v721_v9  ;;  %v10729_v6 = vcombine.low %v750_v58, %v754_v52  ;;  %v766_v7 = vld [vmem:[%s16227_s1 + $0x1658] sm:$0xff] }
 0x337   :  { %7203 = vmatprep.subr.bf16.mxu0 %v10648_v14  ;;  %7547 = vmatprep.subr.bf16.mxu1 %v10650_v16  ;;  %v725_v16 = vld [vmem:[%s16227_s1 + $0x1510] sm:$0xff]  ;;  %v770_v9 = vld [vmem:[%s16227_s1 + $0x1678] sm:$0xff] }
 0x338   :  { %v10703_v2 = vcombine.low %v725_v16, %v729_v15 }
 0x33a   :  { %7204 = vmatpush1.bf16.msra.mxu0 %v10647_v54  ;;  %7548 = vmatpush1.bf16.msra.mxu1 %v10649_v22  ;;  %v10704_v54 = vcombine.high %v725_v16, %v729_v15  ;;  %v774_v16 = vld [vmem:[%s16227_s1 + $0x1698] sm:$0xff] }
 0x33b   :  { %7205 = vmatprep.subr.bf16.mxu0 %v10656_v24  ;;  %7549 = vmatprep.subr.bf16.mxu1 %v10658_v25  ;;  %v733_v24 = vld [vmem:[%s16227_s1 + $0x1550] sm:$0xff]  ;;  %v778_v15 = vld [vmem:[%s16227_s1 + $0x16b8] sm:$0xff] }
 0x33c   :  { %v737_v25 = vld [vmem:[%s16227_s1 + $0x1570] sm:$0xff] }
 0x33d   :  { %v10711_v10 = vcombine.low %v733_v24, %v737_v25 }
 0x33e   :  { %7206 = vmatpush1.bf16.msra.mxu0 %v10655_v42  ;;  %7550 = vmatpush1.bf16.msra.mxu1 %v10657_v17  ;;  %v10712_v42 = vcombine.high %v733_v24, %v737_v25  ;;  %v10714_v17 = vcombine.high %v734_v23, %v738_v26  ;;  %v782_v24 = vld [vmem:[%s16227_s1 + $0x16d8] sm:$0xff]  ;;  %v10753_v26 = vcombine.low %v774_v16, %v778_v15 }
 0x33f   :  { %7207 = vmatprep.subr.bf16.mxu0 %v10664_v33  ;;  %7551 = vmatprep.subr.bf16.mxu1 %v10666_v4  ;;  %v741_v33 = vld [vmem:[%s16227_s1 + $0x1590] sm:$0xff]  ;;  %v786_v25 = vld [vmem:[%s16227_s1 + $0x16f8] sm:$0xff] }
 0x340   :  { %v745_v4 = vld [vmem:[%s16227_s1 + $0x15b0] sm:$0xff] }
 0x341   :  { %v10719_v55 = vcombine.low %v741_v33, %v745_v4 }
 0x342   :  { %7208 = vmatpush1.bf16.msra.mxu0 %v10663_v3  ;;  %7552 = vmatpush1.bf16.msra.mxu1 %v10665_v27  ;;  %v10720_v3 = vcombine.high %v741_v33, %v745_v4  ;;  %v10722_v27 = vcombine.high %v742_v36, %v746_v40  ;;  %v790_v33 = vld [vmem:[%s16227_s1 + $0x1718] sm:$0xff]  ;;  %v10761_v40 = vcombine.low %v782_v24, %v786_v25 }
 0x343   :  { %7220 = vmatprep.subr.bf16.mxu0 %v10672_v30  ;;  %7564 = vmatprep.subr.bf16.mxu1 %v10674_v49  ;;  %v749_v30 = vld [vmem:[%s16227_s1 + $0x15d0] sm:$0xff]  ;;  %v794_v4 = vld [vmem:[%s16227_s1 + $0x1738] sm:$0xff] }
 0x344   :  { %v753_v49 = vld [vmem:[%s16227_s1 + $0x15f0] sm:$0xff] }
 0x345   :  { %7210 = vmatmul.mubr.bf16.vlgmr.msra.gmra.mrb[4].mxu0 %v13100_v31  ;;  %7554 = vmatmul.mubr.bf16.vlgmr.msra.gmra.mrb[4].mxu1 %v13100_v31  ;;  %v718_v31 = vld [vmem:[%s16227_s1 + $0x14d8] sm:$0xff]  ;;  %v10727_v0 = vcombine.low %v749_v30, %v753_v49 }
 0x346   :  { %7221 = vmatpush1.bf16.msra.mxu0 %v10671_v35  ;;  %7565 = vmatpush1.bf16.msra.mxu1 %v10673_v57  ;;  %v10698_v14 = vcombine.high %v718_v31, %v722_v43  ;;  %v10697_v51 = vcombine.low %v718_v31, %v722_v43  ;;  %v10728_v35 = vcombine.high %v749_v30, %v753_v49  ;;  %v798_v30 = vld [vmem:[%s16227_s1 + $0x1758] sm:$0xff] }
 0x347   :  { %7222 = vmatprep.subr.bf16.mxu0 %v10680_v59  ;;  %7566 = vmatprep.subr.bf16.mxu1 %v10682_v60  ;;  %v10730_v57 = vcombine.high %v750_v58, %v754_v52  ;;  %v757_v59 = vld [vmem:[%s16227_s1 + $0x1610] sm:$0xff]  ;;  %v10737_v43 = vcombine.low %v758_v61, %v762_v62  ;;  %v802_v49 = vld [vmem:[%s16227_s1 + $0x1778] sm:$0xff]  ;;  %v10769_v52 = vcombine.low %v790_v33, %v794_v4 }
 0x348   :  { %7252 = vmatprep.mubr.bf16.mxu0 %v13123_v38  ;;  %7596 = vmatprep.mubr.bf16.mxu1 %v13123_v38  ;;  %v726_v38 = vld [vmem:[%s16227_s1 + $0x1518] sm:$0xff]  ;;  %v761_v60 = vld [vmem:[%s16227_s1 + $0x1630] sm:$0xff] }
 0x349   :  { %v10706_v22 = vcombine.high %v726_v38, %v730_v19  ;;  %v10705_v28 = vcombine.low %v726_v38, %v730_v19  ;;  %v10735_v31 = vcombine.low %v757_v59, %v761_v60  ;;  %v10745_v19 = vcombine.low %v766_v7, %v770_v9 }
 0x34a   :  { %7223 = vmatpush1.bf16.msra.mxu0 %v10679_v18  ;;  %7567 = vmatpush1.bf16.msra.mxu1 %v10681_v32  ;;  %v10736_v18 = vcombine.high %v757_v59, %v761_v60  ;;  %v10738_v32 = vcombine.high %v758_v61, %v762_v62  ;;  %v806_v59 = vld [vmem:[%s16227_s1 + $0x1798] sm:$0xff]  ;;  %v10777_v62 = vcombine.low %v798_v30, %v802_v49 }
 0x34b   :  { %7224 = vmatprep.subr.bf16.mxu0 %v10688_v45  ;;  %7568 = vmatprep.subr.bf16.mxu1 %v10690_v46  ;;  %v765_v45 = vld [vmem:[%s16227_s1 + $0x1650] sm:$0xff]  ;;  %v810_v60 = vld [vmem:[%s16227_s1 + $0x17b8] sm:$0xff] }
 0x34c   :  { %v769_v46 = vld [vmem:[%s16227_s1 + $0x1670] sm:$0xff] }
 0x34d   :  { %v10743_v38 = vcombine.low %v765_v45, %v769_v46 }
 0x34e   :  { %7225 = vmatpush1.bf16.msra.mxu0 %v10687_v11  ;;  %7569 = vmatpush1.bf16.msra.mxu1 %v10689_v12  ;;  %v10744_v11 = vcombine.high %v765_v45, %v769_v46  ;;  %v10746_v12 = vcombine.high %v766_v7, %v770_v9  ;;  %v814_v45 = vld [vmem:[%s16227_s1 + $0x17d8] sm:$0xff]  ;;  %v10785_v9 = vcombine.low %v806_v59, %v810_v60 }
 0x34f   :  { %7226 = vmatprep.subr.bf16.mxu0 %v10696_v13  ;;  %7570 = vmatprep.subr.bf16.mxu1 %v10698_v14  ;;  %v773_v13 = vld [vmem:[%s16227_s1 + $0x1690] sm:$0xff]  ;;  %v818_v46 = vld [vmem:[%s16227_s1 + $0x17f8] sm:$0xff] }
 0x350   :  { %v777_v14 = vld [vmem:[%s16227_s1 + $0x16b0] sm:$0xff] }
 0x351   :  { %v10751_v23 = vcombine.low %v773_v13, %v777_v14 }
 0x352   :  { %7227 = vmatpush1.bf16.msra.mxu0 %v10695_v53  ;;  %7571 = vmatpush1.bf16.msra.mxu1 %v10697_v51  ;;  %v10752_v53 = vcombine.high %v773_v13, %v777_v14  ;;  %v10754_v51 = vcombine.high %v774_v16, %v778_v15  ;;  %v822_v13 = vld [vmem:[%s16227_s1 + $0x1818] sm:$0xff]  ;;  %v10793_v15 = vcombine.low %v814_v45, %v818_v46 }
 0x353   :  { %7228 = vmatprep.subr.bf16.mxu0 %v10704_v54  ;;  %7572 = vmatprep.subr.bf16.mxu1 %v10706_v22  ;;  %v781_v54 = vld [vmem:[%s16227_s1 + $0x16d0] sm:$0xff]  ;;  %v826_v14 = vld [vmem:[%s16227_s1 + $0x1838] sm:$0xff] }
 0x354   :  { %v785_v22 = vld [vmem:[%s16227_s1 + $0x16f0] sm:$0xff] }
 0x355   :  { %v10759_v36 = vcombine.low %v781_v54, %v785_v22 }
 0x356   :  { %7229 = vmatpush1.bf16.msra.mxu0 %v10703_v2  ;;  %7573 = vmatpush1.bf16.msra.mxu1 %v10705_v28  ;;  %v10760_v2 = vcombine.high %v781_v54, %v785_v22  ;;  %v10762_v28 = vcombine.high %v782_v24, %v786_v25  ;;  %v830_v54 = vld [vmem:[%s16227_s1 + $0x1858] sm:$0xff]  ;;  %v10801_v25 = vcombine.low %v822_v13, %v826_v14 }
 0x357   :  { %7230 = vmatprep.subr.bf16.mxu0 %v10712_v42  ;;  %7574 = vmatprep.subr.bf16.mxu1 %v10714_v17  ;;  %v789_v42 = vld [vmem:[%s16227_s1 + $0x1710] sm:$0xff]  ;;  %v834_v22 = vld [vmem:[%s16227_s1 + $0x1878] sm:$0xff] }
 0x358   :  { %v793_v17 = vld [vmem:[%s16227_s1 + $0x1730] sm:$0xff] }
 0x359   :  { %v10767_v58 = vcombine.low %v789_v42, %v793_v17 }
 0x35a   :  { %7231 = vmatpush1.bf16.msra.mxu0 %v10711_v10  ;;  %7575 = vmatpush1.bf16.msra.mxu1 %v10713_v1  ;;  %v10768_v10 = vcombine.high %v789_v42, %v793_v17  ;;  %v10770_v1 = vcombine.high %v790_v33, %v794_v4  ;;  %v838_v42 = vld [vmem:[%s16227_s1 + $0x1898] sm:$0xff]  ;;  %v10809_v4 = vcombine.low %v830_v54, %v834_v22 }
 0x35b   :  { %7232 = vmatprep.subr.bf16.mxu0 %v10720_v3  ;;  %7576 = vmatprep.subr.bf16.mxu1 %v10722_v27  ;;  %v797_v3 = vld [vmem:[%s16227_s1 + $0x1750] sm:$0xff]  ;;  %v842_v17 = vld [vmem:[%s16227_s1 + $0x18b8] sm:$0xff] }
 0x35c   :  { %v801_v27 = vld [vmem:[%s16227_s1 + $0x1770] sm:$0xff] }
 0x35d   :  { %v10775_v61 = vcombine.low %v797_v3, %v801_v27 }
 0x35e   :  { %7233 = vmatpush1.bf16.msra.mxu0 %v10719_v55  ;;  %7577 = vmatpush1.bf16.msra.mxu1 %v10721_v56  ;;  %v10776_v55 = vcombine.high %v797_v3, %v801_v27  ;;  %v10778_v56 = vcombine.high %v798_v30, %v802_v49  ;;  %v846_v3 = vld [vmem:[%s16227_s1 + $0x18d8] sm:$0xff]  ;;  %v10817_v30 = vcombine.low %v838_v42, %v842_v17 }
 0x35f   :  { %7234 = vmatprep.subr.bf16.mxu0 %v10728_v35  ;;  %7578 = vmatprep.subr.bf16.mxu1 %v10730_v57  ;;  %v805_v35 = vld [vmem:[%s16227_s1 + $0x1790] sm:$0xff] }
 0x360   :  { %v809_v57 = vld [vmem:[%s16227_s1 + $0x17b0] sm:$0xff] }
 0x361   :  { %v10783_v7 = vcombine.low %v805_v35, %v809_v57 }
 0x362   :  { %7235 = vmatpush1.bf16.msra.mxu0 %v10727_v0  ;;  %7579 = vmatpush1.bf16.msra.mxu1 %v10729_v6  ;;  %v10784_v0 = vcombine.high %v805_v35, %v809_v57  ;;  %v10786_v6 = vcombine.high %v806_v59, %v810_v60  ;;  %v861_v60 = vld [vmem:[%s16227_s1 + $0x1950] sm:$0xff] }
 0x363   :  { %7236 = vmatprep.subr.bf16.mxu0 %v10736_v18  ;;  %7580 = vmatprep.subr.bf16.mxu1 %v10738_v32  ;;  %v813_v18 = vld [vmem:[%s16227_s1 + $0x17d0] sm:$0xff] }
 0x364   :  { %v817_v32 = vld [vmem:[%s16227_s1 + $0x17f0] sm:$0xff] }
 0x365   :  { %v10791_v16 = vcombine.low %v813_v18, %v817_v32 }
 0x366   :  { %7237 = vmatpush1.bf16.msra.mxu0 %v10735_v31  ;;  %7581 = vmatpush1.bf16.msra.mxu1 %v10737_v43  ;;  %v10792_v31 = vcombine.high %v813_v18, %v817_v32  ;;  %v10794_v43 = vcombine.high %v814_v45, %v818_v46  ;;  %v869_v46 = vld [vmem:[%s16227_s1 + $0x1990] sm:$0xff] }
 0x367   :  { %7238 = vmatprep.subr.bf16.mxu0 %v10744_v11  ;;  %7582 = vmatprep.subr.bf16.mxu1 %v10746_v12  ;;  %v821_v11 = vld [vmem:[%s16227_s1 + $0x1810] sm:$0xff] }
 0x368   :  { %v825_v12 = vld [vmem:[%s16227_s1 + $0x1830] sm:$0xff] }
 0x369   :  { %v10799_v24 = vcombine.low %v821_v11, %v825_v12 }
 0x36a   :  { %7239 = vmatpush1.bf16.msra.mxu0 %v10743_v38  ;;  %7583 = vmatpush1.bf16.msra.mxu1 %v10745_v19  ;;  %v10800_v38 = vcombine.high %v821_v11, %v825_v12  ;;  %v10802_v19 = vcombine.high %v822_v13, %v826_v14  ;;  %v877_v14 = vld [vmem:[%s16227_s1 + $0x19d0] sm:$0xff] }
 0x36b   :  { %7240 = vmatprep.subr.bf16.mxu0 %v10752_v53  ;;  %7584 = vmatprep.subr.bf16.mxu1 %v10754_v51  ;;  %v829_v53 = vld [vmem:[%s16227_s1 + $0x1850] sm:$0xff] }
 0x36c   :  { %v833_v51 = vld [vmem:[%s16227_s1 + $0x1870] sm:$0xff] }
 0x36d   :  { %v10807_v33 = vcombine.low %v829_v53, %v833_v51 }
 0x36e   :  { %7241 = vmatpush1.bf16.msra.mxu0 %v10751_v23  ;;  %7585 = vmatpush1.bf16.msra.mxu1 %v10753_v26  ;;  %v10808_v23 = vcombine.high %v829_v53, %v833_v51  ;;  %v837_v26 = vld [vmem:[%s16227_s1 + $0x1890] sm:$0xff] }
 0x36f   :  { %7242 = vmatprep.subr.bf16.mxu0 %v10760_v2  ;;  %7586 = vmatprep.subr.bf16.mxu1 %v10762_v28  ;;  %v841_v2 = vld [vmem:[%s16227_s1 + $0x18b0] sm:$0xff]  ;;  %v10810_v28 = vcombine.high %v830_v54, %v834_v22 }
 0x370   :  { %v10815_v27 = vcombine.low %v837_v26, %v841_v2  ;;  %v885_v22 = vld [vmem:[%s16227_s1 + $0x1a10] sm:$0xff] }
 0x372   :  { %7243 = vmatpush1.bf16.msra.mxu0 %v10759_v36  ;;  %7587 = vmatpush1.bf16.msra.mxu1 %v10761_v40  ;;  %v10816_v36 = vcombine.high %v837_v26, %v841_v2  ;;  %v10818_v40 = vcombine.high %v838_v42, %v842_v17  ;;  %v890_v26 = vld [vmem:[%s16227_s1 + $0x1a38] sm:$0xff]  ;;  %v893_v17 = vld [vmem:[%s16227_s1 + $0x1a50] sm:$0xff] }
 0x373   :  { %7244 = vmatprep.subr.bf16.mxu0 %v10768_v10  ;;  %7588 = vmatprep.subr.bf16.mxu1 %v10770_v1  ;;  %v845_v10 = vld [vmem:[%s16227_s1 + $0x18d0] sm:$0xff] }
 0x374   :  { %v849_v1 = vld [vmem:[%s16227_s1 + $0x18f0] sm:$0xff] }
 0x375   :  { %v10824_v49 = vcombine.high %v845_v10, %v849_v1  ;;  %v10823_v35 = vcombine.low %v845_v10, %v849_v1 }
 0x376   :  { %7245 = vmatpush1.bf16.msra.mxu0 %v10767_v58  ;;  %7589 = vmatpush1.bf16.msra.mxu1 %v10769_v52  ;;  %v853_v58 = vld [vmem:[%s16227_s1 + $0x1910] sm:$0xff] }
 0x377   :  { %7246 = vmatprep.subr.bf16.mxu0 %v10776_v55  ;;  %7590 = vmatprep.subr.bf16.mxu1 %v10778_v56  ;;  %v857_v52 = vld [vmem:[%s16227_s1 + $0x1930] sm:$0xff]  ;;  %v854_v55 = vld [vmem:[%s16227_s1 + $0x1918] sm:$0xff] }
 0x378   :  { %v858_v56 = vld [vmem:[%s16227_s1 + $0x1938] sm:$0xff]  ;;  %v10832_v59 = vcombine.high %v853_v58, %v857_v52  ;;  %v10831_v18 = vcombine.low %v853_v58, %v857_v52 }
 0x379   :  { %v10833_v32 = vcombine.low %v854_v55, %v858_v56  ;;  %v906_v58 = vld [vmem:[%s16227_s1 + $0x1ab8] sm:$0xff] }
 0x37a   :  { %7247 = vmatpush1.bf16.msra.mxu0 %v10775_v61  ;;  %7591 = vmatpush1.bf16.msra.mxu1 %v10777_v62  ;;  %v865_v61 = vld [vmem:[%s16227_s1 + $0x1970] sm:$0xff]  ;;  %v862_v62 = vld [vmem:[%s16227_s1 + $0x1958] sm:$0xff] }
 0x37b   :  { %7248 = vmatprep.subr.bf16.mxu0 %v10784_v0  ;;  %7592 = vmatprep.subr.bf16.mxu1 %v10786_v6  ;;  %v10834_v0 = vcombine.high %v854_v55, %v858_v56  ;;  %v866_v6 = vld [vmem:[%s16227_s1 + $0x1978] sm:$0xff]  ;;  %v10840_v45 = vcombine.high %v861_v60, %v865_v61  ;;  %v10839_v11 = vcombine.low %v861_v60, %v865_v61  ;;  %v909_v56 = vld [vmem:[%s16227_s1 + $0x1ad0] sm:$0xff] }
 0x37c   :  { %v10841_v12 = vcombine.low %v862_v62, %v866_v6  ;;  %v914_v60 = vld [vmem:[%s16227_s1 + $0x1af8] sm:$0xff] }
 0x37e   :  { %7249 = vmatpush1.bf16.msra.mxu0 %v10783_v7  ;;  %7593 = vmatpush1.bf16.msra.mxu1 %v10785_v9  ;;  %v873_v7 = vld [vmem:[%s16227_s1 + $0x19b0] sm:$0xff]  ;;  %v870_v9 = vld [vmem:[%s16227_s1 + $0x1998] sm:$0xff] }
 0x37f   :  { %7250 = vmatprep.subr.bf16.mxu0 %v10792_v31  ;;  %7594 = vmatprep.subr.bf16.mxu1 %v10794_v43  ;;  %v10842_v31 = vcombine.high %v862_v62, %v866_v6  ;;  %v874_v43 = vld [vmem:[%s16227_s1 + $0x19b8] sm:$0xff]  ;;  %v10848_v13 = vcombine.high %v869_v46, %v873_v7  ;;  %v10847_v53 = vcombine.low %v869_v46, %v873_v7  ;;  %v917_v6 = vld [vmem:[%s16227_s1 + $0x1b10] sm:$0xff] }
 0x380   :  { %v10849_v51 = vcombine.low %v870_v9, %v874_v43  ;;  %v922_v46 = vld [vmem:[%s16227_s1 + $0x1b38] sm:$0xff] }
 0x382   :  { %7251 = vmatpush1.bf16.msra.mxu0 %v10791_v16  ;;  %7595 = vmatpush1.bf16.msra.mxu1 %v10793_v15  ;;  %v881_v16 = vld [vmem:[%s16227_s1 + $0x19f0] sm:$0xff]  ;;  %v878_v15 = vld [vmem:[%s16227_s1 + $0x19d8] sm:$0xff] }
 0x383   :  { %7263 = vmatprep.subr.bf16.mxu0 %v10800_v38  ;;  %7607 = vmatprep.subr.bf16.mxu1 %v10802_v19  ;;  %v10850_v38 = vcombine.high %v870_v9, %v874_v43  ;;  %v882_v19 = vld [vmem:[%s16227_s1 + $0x19f8] sm:$0xff]  ;;  %v10856_v54 = vcombine.high %v877_v14, %v881_v16  ;;  %v10855_v2 = vcombine.low %v877_v14, %v881_v16  ;;  %v925_v43 = vld [vmem:[%s16227_s1 + $0x1b50] sm:$0xff] }
 0x384   :  { %v930_v14 = vld [vmem:[%s16227_s1 + $0x1b78] sm:$0xff] }
 0x385   :  { %7253 = vmatmul.mubr.bf16.vlgmr.msra.gmra.mrb[4].mxu0 %v13314_v63  ;;  %7597 = vmatmul.mubr.bf16.vlgmr.msra.gmra.mrb[4].mxu1 %v13314_v63  ;;  %v850_v63 = vld [vmem:[%s16227_s1 + $0x18f8] sm:$0xff] }
 0x386   :  { %7264 = vmatpush1.bf16.msra.mxu0 %v10799_v24  ;;  %7608 = vmatpush1.bf16.msra.mxu1 %v10801_v25  ;;  %v10825_v57 = vcombine.low %v846_v3, %v850_v63  ;;  %v889_v24 = vld [vmem:[%s16227_s1 + $0x1a30] sm:$0xff]  ;;  %v886_v25 = vld [vmem:[%s16227_s1 + $0x1a18] sm:$0xff] }
 0x387   :  { %7265 = vmatprep.subr.bf16.mxu0 %v10808_v23  ;;  %7609 = vmatprep.subr.bf16.mxu1 %v10810_v28  ;;  %v10858_v23 = vcombine.high %v878_v15, %v882_v19  ;;  %v10857_v28 = vcombine.low %v878_v15, %v882_v19  ;;  %v10864_v42 = vcombine.high %v885_v22, %v889_v24  ;;  %v933_v19 = vld [vmem:[%s16227_s1 + $0x1b90] sm:$0xff] }
 0x388   :  { %7295 = vmatprep.mubr.bf16.mxu0 %v13337_v8  ;;  %7639 = vmatprep.mubr.bf16.mxu1 %v13337_v8  ;;  %v10826_v8 = vcombine.high %v846_v3, %v850_v63  ;;  %v10863_v10 = vcombine.low %v885_v22, %v889_v24  ;;  %v10865_v1 = vcombine.low %v886_v25, %v890_v26  ;;  %v901_v63 = vld [vmem:[%s16227_s1 + $0x1a90] sm:$0xff]  ;;  %v938_v22 = vld [vmem:[%s16227_s1 + $0x1bb8] sm:$0xff] }
 0x38a   :  { %7266 = vmatpush1.bf16.msra.mxu0 %v10807_v33  ;;  %7610 = vmatpush1.bf16.msra.mxu1 %v10809_v4  ;;  %v897_v33 = vld [vmem:[%s16227_s1 + $0x1a70] sm:$0xff]  ;;  %v894_v4 = vld [vmem:[%s16227_s1 + $0x1a58] sm:$0xff] }
 0x38b   :  { %7267 = vmatprep.subr.bf16.mxu0 %v10816_v36  ;;  %7611 = vmatprep.subr.bf16.mxu1 %v10818_v40  ;;  %v10866_v36 = vcombine.high %v886_v25, %v890_v26  ;;  %v898_v40 = vld [vmem:[%s16227_s1 + $0x1a78] sm:$0xff]  ;;  %v10872_v3 = vcombine.high %v893_v17, %v897_v33  ;;  %v10871_v52 = vcombine.low %v893_v17, %v897_v33  ;;  %v941_v26 = vld [vmem:[%s16227_s1 + $0x1bd0] sm:$0xff] }
 0x38c   :  { %v10873_v55 = vcombine.low %v894_v4, %v898_v40  ;;  %v946_v17 = vld [vmem:[%s16227_s1 + $0x1bf8] sm:$0xff] }
 0x38e   :  { %7268 = vmatpush1.bf16.msra.mxu0 %v10815_v27  ;;  %7612 = vmatpush1.bf16.msra.mxu1 %v10817_v30  ;;  %v905_v27 = vld [vmem:[%s16227_s1 + $0x1ab0] sm:$0xff]  ;;  %v902_v30 = vld [vmem:[%s16227_s1 + $0x1a98] sm:$0xff] }
 0x38f   :  { %7269 = vmatprep.subr.bf16.mxu0 %v10824_v49  ;;  %7613 = vmatprep.subr.bf16.mxu1 %v10826_v8  ;;  %v10874_v49 = vcombine.high %v894_v4, %v898_v40  ;;  %v10880_v8 = vcombine.high %v901_v63, %v905_v27  ;;  %v10879_v61 = vcombine.low %v901_v63, %v905_v27  ;;  %v949_v40 = vld [vmem:[%s16227_s1 + $0x1c10] sm:$0xff]  ;;  %v954_v63 = vld [vmem:[%s16227_s1 + $0x1c38] sm:$0xff] }
 0x390   :  { %v10881_v62 = vcombine.low %v902_v30, %v906_v58 }
 0x392   :  { %7270 = vmatpush1.bf16.msra.mxu0 %v10823_v35  ;;  %7614 = vmatpush1.bf16.msra.mxu1 %v10825_v57  ;;  %v913_v35 = vld [vmem:[%s16227_s1 + $0x1af0] sm:$0xff]  ;;  %v910_v57 = vld [vmem:[%s16227_s1 + $0x1ad8] sm:$0xff] }
 0x393   :  { %7271 = vmatprep.subr.bf16.mxu0 %v10832_v59  ;;  %7615 = vmatprep.subr.bf16.mxu1 %v10834_v0  ;;  %v10882_v59 = vcombine.high %v902_v30, %v906_v58  ;;  %v10888_v0 = vcombine.high %v909_v56, %v913_v35  ;;  %v10887_v7 = vcombine.low %v909_v56, %v913_v35  ;;  %v957_v58 = vld [vmem:[%s16227_s1 + $0x1c50] sm:$0xff]  ;;  %v962_v56 = vld [vmem:[%s16227_s1 + $0x1c78] sm:$0xff] }
 0x394   :  { %v10889_v9 = vcombine.low %v910_v57, %v914_v60 }
 0x396   :  { %7272 = vmatpush1.bf16.msra.mxu0 %v10831_v18  ;;  %7616 = vmatpush1.bf16.msra.mxu1 %v10833_v32  ;;  %v921_v18 = vld [vmem:[%s16227_s1 + $0x1b30] sm:$0xff]  ;;  %v918_v32 = vld [vmem:[%s16227_s1 + $0x1b18] sm:$0xff] }
 0x397   :  { %7273 = vmatprep.subr.bf16.mxu0 %v10840_v45  ;;  %7617 = vmatprep.subr.bf16.mxu1 %v10842_v31  ;;  %v10890_v45 = vcombine.high %v910_v57, %v914_v60  ;;  %v10896_v31 = vcombine.high %v917_v6, %v921_v18  ;;  %v10895_v16 = vcombine.low %v917_v6, %v921_v18  ;;  %v965_v57 = vld [vmem:[%s16227_s1 + $0x1c90] sm:$0xff]  ;;  %v970_v6 = vld [vmem:[%s16227_s1 + $0x1cb8] sm:$0xff] }
 0x398   :  { %v10897_v15 = vcombine.low %v918_v32, %v922_v46 }
 0x39a   :  { %7274 = vmatpush1.bf16.msra.mxu0 %v10839_v11  ;;  %7618 = vmatpush1.bf16.msra.mxu1 %v10841_v12  ;;  %v929_v11 = vld [vmem:[%s16227_s1 + $0x1b70] sm:$0xff]  ;;  %v926_v12 = vld [vmem:[%s16227_s1 + $0x1b58] sm:$0xff] }
 0x39b   :  { %7275 = vmatprep.subr.bf16.mxu0 %v10848_v13  ;;  %7619 = vmatprep.subr.bf16.mxu1 %v10850_v38  ;;  %v10898_v13 = vcombine.high %v918_v32, %v922_v46  ;;  %v10904_v38 = vcombine.high %v925_v43, %v929_v11  ;;  %v10903_v24 = vcombine.low %v925_v43, %v929_v11 }
 0x39c   :  { %v10905_v25 = vcombine.low %v926_v12, %v930_v14 }
 0x39e   :  { %7276 = vmatpush1.bf16.msra.mxu0 %v10847_v53  ;;  %7620 = vmatpush1.bf16.msra.mxu1 %v10849_v51  ;;  %v937_v53 = vld [vmem:[%s16227_s1 + $0x1bb0] sm:$0xff]  ;;  %v934_v51 = vld [vmem:[%s16227_s1 + $0x1b98] sm:$0xff] }
 0x39f   :  { %7277 = vmatprep.subr.bf16.mxu0 %v10856_v54  ;;  %7621 = vmatprep.subr.bf16.mxu1 %v10858_v23  ;;  %v10906_v54 = vcombine.high %v926_v12, %v930_v14  ;;  %v10912_v23 = vcombine.high %v933_v19, %v937_v53  ;;  %v10911_v33 = vcombine.low %v933_v19, %v937_v53  ;;  %v985_v14 = vld [vmem:[%s16227_s1 + $0x1d30] sm:$0xff] }
 0x3a0   :  { %v10913_v4 = vcombine.low %v934_v51, %v938_v22 }
 0x3a2   :  { %7278 = vmatpush1.bf16.msra.mxu0 %v10855_v2  ;;  %7622 = vmatpush1.bf16.msra.mxu1 %v10857_v28  ;;  %v945_v2 = vld [vmem:[%s16227_s1 + $0x1bf0] sm:$0xff]  ;;  %v942_v28 = vld [vmem:[%s16227_s1 + $0x1bd8] sm:$0xff] }
 0x3a3   :  { %7279 = vmatprep.subr.bf16.mxu0 %v10864_v42  ;;  %7623 = vmatprep.subr.bf16.mxu1 %v10866_v36  ;;  %v10914_v42 = vcombine.high %v934_v51, %v938_v22  ;;  %v10920_v36 = vcombine.high %v941_v26, %v945_v2  ;;  %v10919_v27 = vcombine.low %v941_v26, %v945_v2  ;;  %v989_v51 = vld [vmem:[%s16227_s1 + $0x1d50] sm:$0xff]  ;;  %v990_v22 = vld [vmem:[%s16227_s1 + $0x1d58] sm:$0xff] }
 0x3a4   :  { %v10921_v30 = vcombine.low %v942_v28, %v946_v17 }
 0x3a6   :  { %7280 = vmatpush1.bf16.msra.mxu0 %v10863_v10  ;;  %7624 = vmatpush1.bf16.msra.mxu1 %v10865_v1  ;;  %v953_v10 = vld [vmem:[%s16227_s1 + $0x1c30] sm:$0xff]  ;;  %v950_v1 = vld [vmem:[%s16227_s1 + $0x1c18] sm:$0xff] }
 0x3a7   :  { %7281 = vmatprep.subr.bf16.mxu0 %v10872_v3  ;;  %7625 = vmatprep.subr.bf16.mxu1 %v10874_v49  ;;  %v10922_v3 = vcombine.high %v942_v28, %v946_v17  ;;  %v10928_v49 = vcombine.high %v949_v40, %v953_v10  ;;  %v10927_v35 = vcombine.low %v949_v40, %v953_v10  ;;  %v997_v28 = vld [vmem:[%s16227_s1 + $0x1d90] sm:$0xff]  ;;  %v998_v17 = vld [vmem:[%s16227_s1 + $0x1d98] sm:$0xff] }
 0x3a8   :  { %v10929_v60 = vcombine.low %v950_v1, %v954_v63 }
 0x3aa   :  { %7282 = vmatpush1.bf16.msra.mxu0 %v10871_v52  ;;  %7626 = vmatpush1.bf16.msra.mxu1 %v10873_v55  ;;  %v961_v52 = vld [vmem:[%s16227_s1 + $0x1c70] sm:$0xff]  ;;  %v958_v55 = vld [vmem:[%s16227_s1 + $0x1c58] sm:$0xff] }
 0x3ab   :  { %7283 = vmatprep.subr.bf16.mxu0 %v10880_v8  ;;  %7627 = vmatprep.subr.bf16.mxu1 %v10882_v59  ;;  %v10930_v8 = vcombine.high %v950_v1, %v954_v63  ;;  %v969_v59 = vld [vmem:[%s16227_s1 + $0x1cb0] sm:$0xff]  ;;  %v10935_v18 = vcombine.low %v957_v58, %v961_v52  ;;  %v10937_v32 = vcombine.low %v958_v55, %v962_v56  ;;  %v1006_v63 = vld [vmem:[%s16227_s1 + $0x1dd8] sm:$0xff] }
 0x3ac   :  { %v10943_v43 = vcombine.low %v965_v57, %v969_v59  ;;  %v1005_v1 = vld [vmem:[%s16227_s1 + $0x1dd0] sm:$0xff] }
 0x3ae   :  { %7284 = vmatpush1.bf16.msra.mxu0 %v10879_v61  ;;  %7628 = vmatpush1.bf16.msra.mxu1 %v10881_v62  ;;  %v10936_v61 = vcombine.high %v957_v58, %v961_v52  ;;  %v10938_v62 = vcombine.high %v958_v55, %v962_v56  ;;  %v1013_v55 = vld [vmem:[%s16227_s1 + $0x1e10] sm:$0xff]  ;;  %v1014_v56 = vld [vmem:[%s16227_s1 + $0x1e18] sm:$0xff] }
 0x3af   :  { %7285 = vmatprep.subr.bf16.mxu0 %v10888_v0  ;;  %7629 = vmatprep.subr.bf16.mxu1 %v10890_v45  ;;  %v966_v0 = vld [vmem:[%s16227_s1 + $0x1c98] sm:$0xff]  ;;  %v10944_v45 = vcombine.high %v965_v57, %v969_v59 }
 0x3b0   :  { %v10946_v46 = vcombine.high %v966_v0, %v970_v6  ;;  %v10945_v11 = vcombine.low %v966_v0, %v970_v6  ;;  %v1018_v57 = vld [vmem:[%s16227_s1 + $0x1e38] sm:$0xff]  ;;  %v1025_v0 = vld [vmem:[%s16227_s1 + $0x1e70] sm:$0xff] }
 0x3b1   :  { %v1022_v6 = vld [vmem:[%s16227_s1 + $0x1e58] sm:$0xff] }
 0x3b2   :  { %7286 = vmatpush1.bf16.msra.mxu0 %v10887_v7  ;;  %7630 = vmatpush1.bf16.msra.mxu1 %v10889_v9  ;;  %v973_v7 = vld [vmem:[%s16227_s1 + $0x1cd0] sm:$0xff] }
 0x3b3   :  { %7287 = vmatprep.subr.bf16.mxu0 %v10896_v31  ;;  %7631 = vmatprep.subr.bf16.mxu1 %v10898_v13  ;;  %v977_v9 = vld [vmem:[%s16227_s1 + $0x1cf0] sm:$0xff]  ;;  %v974_v31 = vld [vmem:[%s16227_s1 + $0x1cd8] sm:$0xff] }
 0x3b4   :  { %v10952_v12 = vcombine.high %v973_v7, %v977_v9  ;;  %v981_v13 = vld [vmem:[%s16227_s1 + $0x1d10] sm:$0xff] }
 0x3b5   :  { %v10960_v53 = vcombine.high %v981_v13, %v985_v14 }
 0x3b6   :  { %7288 = vmatpush1.bf16.msra.mxu0 %v10895_v16  ;;  %7632 = vmatpush1.bf16.msra.mxu1 %v10897_v15  ;;  %v982_v16 = vld [vmem:[%s16227_s1 + $0x1d18] sm:$0xff] }
 0x3b7   :  { %7289 = vmatprep.subr.bf16.mxu0 %v10904_v38  ;;  %7633 = vmatprep.subr.bf16.mxu1 %v10906_v54  ;;  %v986_v15 = vld [vmem:[%s16227_s1 + $0x1d38] sm:$0xff]  ;;  %v10951_v38 = vcombine.low %v973_v7, %v977_v9  ;;  %v993_v54 = vld [vmem:[%s16227_s1 + $0x1d70] sm:$0xff] }
 0x3b8   :  { %v10961_v26 = vcombine.low %v982_v16, %v986_v15  ;;  %v10968_v2 = vcombine.high %v989_v51, %v993_v54  ;;  %v1029_v9 = vld [vmem:[%s16227_s1 + $0x1e90] sm:$0xff] }
 0x3ba   :  { %7290 = vmatpush1.bf16.msra.mxu0 %v10903_v24  ;;  %7634 = vmatpush1.bf16.msra.mxu1 %v10905_v25  ;;  %v10962_v24 = vcombine.high %v982_v16, %v986_v15  ;;  %v994_v25 = vld [vmem:[%s16227_s1 + $0x1d78] sm:$0xff]  ;;  %v1037_v16 = vld [vmem:[%s16227_s1 + $0x1ed0] sm:$0xff] }
 0x3bb   :  { %7291 = vmatprep.subr.bf16.mxu0 %v10912_v23  ;;  %7635 = vmatprep.subr.bf16.mxu1 %v10914_v42  ;;  %v10959_v23 = vcombine.low %v981_v13, %v985_v14  ;;  %v1001_v42 = vld [vmem:[%s16227_s1 + $0x1db0] sm:$0xff]  ;;  %v10969_v40 = vcombine.low %v990_v22, %v994_v25  ;;  %v1038_v15 = vld [vmem:[%s16227_s1 + $0x1ed8] sm:$0xff] }
 0x3bc   :  { %v10976_v10 = vcombine.high %v997_v28, %v1001_v42 }
 0x3be   :  { %7292 = vmatpush1.bf16.msra.mxu0 %v10911_v33  ;;  %7636 = vmatpush1.bf16.msra.mxu1 %v10913_v4  ;;  %v10970_v33 = vcombine.high %v990_v22, %v994_v25  ;;  %v1002_v4 = vld [vmem:[%s16227_s1 + $0x1db8] sm:$0xff]  ;;  %v1045_v22 = vld [vmem:[%s16227_s1 + $0x1f10] sm:$0xff] }
 0x3bf   :  { %7293 = vmatprep.subr.bf16.mxu0 %v10920_v36  ;;  %7637 = vmatprep.subr.bf16.mxu1 %v10922_v3  ;;  %v10967_v36 = vcombine.low %v989_v51, %v993_v54  ;;  %v1009_v3 = vld [vmem:[%s16227_s1 + $0x1df0] sm:$0xff]  ;;  %v10977_v58 = vcombine.low %v998_v17, %v1002_v4  ;;  %v1046_v25 = vld [vmem:[%s16227_s1 + $0x1f18] sm:$0xff] }
 0x3c0   :  { %v10984_v52 = vcombine.high %v1005_v1, %v1009_v3  ;;  %v10983_v59 = vcombine.low %v1005_v1, %v1009_v3 }
 0x3c2   :  { %7294 = vmatpush1.bf16.msra.mxu0 %v10919_v27  ;;  %7638 = vmatpush1.bf16.msra.mxu1 %v10921_v30  ;;  %v10978_v27 = vcombine.high %v998_v17, %v1002_v4  ;;  %v1010_v30 = vld [vmem:[%s16227_s1 + $0x1df8] sm:$0xff]  ;;  %v1053_v17 = vld [vmem:[%s16227_s1 + $0x1f50] sm:$0xff] }
 0x3c3   :  { %7306 = vmatprep.subr.bf16.mxu0 %v10928_v49  ;;  %7650 = vmatprep.subr.bf16.mxu1 %v10930_v8  ;;  %v10975_v49 = vcombine.low %v997_v28, %v1001_v42  ;;  %v1017_v8 = vld [vmem:[%s16227_s1 + $0x1e30] sm:$0xff]  ;;  %v1054_v4 = vld [vmem:[%s16227_s1 + $0x1f58] sm:$0xff] }
 0x3c5   :  { %7296 = vmatmul.mubr.bf16.vlgmr.msra.gmra.mrb[4].mxu0 %v13528_v39  ;;  %7640 = vmatmul.mubr.bf16.vlgmr.msra.gmra.mrb[4].mxu1 %v13528_v39  ;;  %v978_v39 = vld [vmem:[%s16227_s1 + $0x1cf8] sm:$0xff] }
 0x3c6   :  { %7307 = vmatpush1.bf16.msra.mxu0 %v10927_v35  ;;  %7651 = vmatpush1.bf16.msra.mxu1 %v10929_v60  ;;  %v10953_v19 = vcombine.low %v974_v31, %v978_v39  ;;  %v10986_v35 = vcombine.high %v1006_v63, %v1010_v30  ;;  %v10985_v60 = vcombine.low %v1006_v63, %v1010_v30  ;;  %v1061_v63 = vld [vmem:[%s16227_s1 + $0x1f90] sm:$0xff]  ;;  %v1062_v30 = vld [vmem:[%s16227_s1 + $0x1f98] sm:$0xff] }
 0x3c7   :  { %7308 = vmatprep.subr.bf16.mxu0 %v10936_v61  ;;  %7652 = vmatprep.subr.bf16.mxu1 %v10938_v62  ;;  %v10992_v61 = vcombine.high %v1013_v55, %v1017_v8  ;;  %v1021_v62 = vld [vmem:[%s16227_s1 + $0x1e50] sm:$0xff] }
 0x3c8   :  { %7338 = vmatprep.mubr.bf16.mxu0 %v13551_v48  ;;  %7682 = vmatprep.mubr.bf16.mxu1 %v13551_v48  ;;  %v10954_v48 = vcombine.high %v974_v31, %v978_v39  ;;  %v11000_v7 = vcombine.high %v1021_v62, %v1025_v0  ;;  %v1033_v31 = vld [vmem:[%s16227_s1 + $0x1eb0] sm:$0xff]  ;;  %v1030_v39 = vld [vmem:[%s16227_s1 + $0x1e98] sm:$0xff] }
 0x3c9   :  { %v11008_v14 = vcombine.high %v1029_v9, %v1033_v31 }
 0x3ca   :  { %7309 = vmatpush1.bf16.msra.mxu0 %v10935_v18  ;;  %7653 = vmatpush1.bf16.msra.mxu1 %v10937_v32  ;;  %v10994_v18 = vcombine.high %v1014_v56, %v1018_v57  ;;  %v1026_v32 = vld [vmem:[%s16227_s1 + $0x1e78] sm:$0xff] }
 0x3cb   :  { %7310 = vmatprep.subr.bf16.mxu0 %v10944_v45  ;;  %7654 = vmatprep.subr.bf16.mxu1 %v10946_v46  ;;  %v10991_v45 = vcombine.low %v1013_v55, %v1017_v8  ;;  %v10993_v46 = vcombine.low %v1014_v56, %v1018_v57  ;;  %v11001_v13 = vcombine.low %v1022_v6, %v1026_v32  ;;  %v1069_v56 = vld [vmem:[%s16227_s1 + $0x1fd0] sm:$0xff]  ;;  %v1070_v57 = vld [vmem:[%s16227_s1 + $0x1fd8] sm:$0xff] }
 0x3ce   :  { %7311 = vmatpush1.bf16.msra.mxu0 %v10943_v43  ;;  %7655 = vmatpush1.bf16.msra.mxu1 %v10945_v11  ;;  %v11002_v43 = vcombine.high %v1022_v6, %v1026_v32  ;;  %v1034_v11 = vld [vmem:[%s16227_s1 + $0x1eb8] sm:$0xff] }
 0x3cf   :  { %7312 = vmatprep.subr.bf16.mxu0 %v10952_v12  ;;  %7656 = vmatprep.subr.bf16.mxu1 %v10954_v48  ;;  %v10999_v12 = vcombine.low %v1021_v62, %v1025_v0  ;;  %v1041_v48 = vld [vmem:[%s16227_s1 + $0x1ef0] sm:$0xff]  ;;  %v11009_v51 = vcombine.low %v1030_v39, %v1034_v11 }
 0x3d0   :  { %v11016_v54 = vcombine.high %v1037_v16, %v1041_v48 }
 0x3d2   :  { %7313 = vmatpush1.bf16.msra.mxu0 %v10951_v38  ;;  %7657 = vmatpush1.bf16.msra.mxu1 %v10953_v19  ;;  %v11010_v38 = vcombine.high %v1030_v39, %v1034_v11  ;;  %v1042_v19 = vld [vmem:[%s16227_s1 + $0x1ef8] sm:$0xff] }
 0x3d3   :  { %7314 = vmatprep.subr.bf16.mxu0 %v10960_v53  ;;  %7658 = vmatprep.subr.bf16.mxu1 %v10962_v24  ;;  %v11007_v53 = vcombine.low %v1029_v9, %v1033_v31  ;;  %v1049_v24 = vld [vmem:[%s16227_s1 + $0x1f30] sm:$0xff]  ;;  %v11017_v28 = vcombine.low %v1038_v15, %v1042_v19  ;;  %v11549_v9 = vld [vmem:[%s16230_s3 + $0x8] ss:$16 sps:$4 sm:$0xff]   ;;  %v11557_v39 = vld [vmem:[%s16230_s3 + $0x2c] ss:$16 sps:$4 sm:$0xff]  }
 0x3d4   :  { %v11024_v42 = vcombine.high %v1045_v22, %v1049_v24  ;;  %v11554_v31 = vld [vmem:[%s16230_s3 + $0x24] ss:$16 sps:$4 sm:$0xff]   ;;  %v11555_v11 = vld [vmem:[%s16230_s3 + $0x28] ss:$16 sps:$4 sm:$0xff]  }
 0x3d6   :  { %7315 = vmatpush1.bf16.msra.mxu0 %v10959_v23  ;;  %7659 = vmatpush1.bf16.msra.mxu1 %v10961_v26  ;;  %v11018_v23 = vcombine.high %v1038_v15, %v1042_v19  ;;  %v1050_v26 = vld [vmem:[%s16227_s1 + $0x1f38] sm:$0xff] }
 0x3d7   :  { %7316 = vmatprep.subr.bf16.mxu0 %v10968_v2  ;;  %7660 = vmatprep.subr.bf16.mxu1 %v10970_v33  ;;  %v11015_v2 = vcombine.low %v1037_v16, %v1041_v48  ;;  %v1057_v33 = vld [vmem:[%s16227_s1 + $0x1f70] sm:$0xff]  ;;  %v11025_v1 = vcombine.low %v1046_v25, %v1050_v26  ;;  %v11569_v16 = vld [vmem:[%s16230_s3 + $0x6c] ss:$16 sps:$4 sm:$0xff]   ;;  %v11567_v15 = vld [vmem:[%s16230_s3 + $0x68] ss:$16 sps:$4 sm:$0xff]  }
 0x3d8   :  { %v11032_v3 = vcombine.high %v1053_v17, %v1057_v33  ;;  %v11564_v48 = vld [vmem:[%s16230_s3 + $0x60] ss:$16 sps:$4 sm:$0xff]   ;;  %v11575_v19 = vld [vmem:[%s16230_s3 + $0x8c] ss:$16 sps:$4 sm:$0xff]  }
 0x3da   :  { %7317 = vmatpush1.bf16.msra.mxu0 %v10967_v36  ;;  %7661 = vmatpush1.bf16.msra.mxu1 %v10969_v40  ;;  %v11026_v36 = vcombine.high %v1046_v25, %v1050_v26  ;;  %v1058_v40 = vld [vmem:[%s16227_s1 + $0x1f78] sm:$0xff] }
 0x3db   :  { %7318 = vmatprep.subr.bf16.mxu0 %v10976_v10  ;;  %7662 = vmatprep.subr.bf16.mxu1 %v10978_v27  ;;  %v11023_v10 = vcombine.low %v1045_v22, %v1049_v24  ;;  %v1065_v27 = vld [vmem:[%s16227_s1 + $0x1fb0] sm:$0xff]  ;;  %v11033_v55 = vcombine.low %v1054_v4, %v1058_v40  ;;  %v11581_v22 = vld [vmem:[%s16230_s3 + $0xac] ss:$16 sps:$4 sm:$0xff]   ;;  %v11579_v25 = vld [vmem:[%s16230_s3 + $0xa8] ss:$16 sps:$4 sm:$0xff]  }
 0x3dc   :  { %v11040_v8 = vcombine.high %v1061_v63, %v1065_v27  ;;  %v11576_v24 = vld [vmem:[%s16230_s3 + $0xa0] ss:$16 sps:$4 sm:$0xff]   ;;  %v11587_v26 = vld [vmem:[%s16230_s3 + $0xcc] ss:$16 sps:$4 sm:$0xff]  }
 0x3de   :  { %7319 = vmatpush1.bf16.msra.mxu0 %v10975_v49  ;;  %7663 = vmatpush1.bf16.msra.mxu1 %v10977_v58  ;;  %v11034_v49 = vcombine.high %v1054_v4, %v1058_v40  ;;  %v1066_v58 = vld [vmem:[%s16227_s1 + $0x1fb8] sm:$0xff] }
 0x3df   :  { %7320 = vmatprep.subr.bf16.mxu0 %v10984_v52  ;;  %7664 = vmatprep.subr.bf16.mxu1 %v10986_v35  ;;  %v11031_v52 = vcombine.low %v1053_v17, %v1057_v33  ;;  %v1073_v35 = vld [vmem:[%s16227_s1 + $0x1ff0] sm:$0xff]  ;;  %v11041_v62 = vcombine.low %v1062_v30, %v1066_v58  ;;  %v11593_v17 = vld [vmem:[%s16230_s3 + $0xec] ss:$16 sps:$4 sm:$0xff]   ;;  %v11591_v4 = vld [vmem:[%s16230_s3 + $0xe8] ss:$16 sps:$4 sm:$0xff]  }
 0x3e0   :  { %v11048_v0 = vcombine.high %v1069_v56, %v1073_v35  ;;  %v11588_v33 = vld [vmem:[%s16230_s3 + $0xe0] ss:$16 sps:$4 sm:$0xff]   ;;  %v11599_v40 = vld [vmem:[%s16230_s3 + $0x10c] ss:$16 sps:$4 sm:$0xff]  }
 0x3e2   :  { %7321 = vmatpush1.bf16.msra.mxu0 %v10983_v59  ;;  %7665 = vmatpush1.bf16.msra.mxu1 %v10985_v60  ;;  %v11042_v59 = vcombine.high %v1062_v30, %v1066_v58  ;;  %v1074_v60 = vld [vmem:[%s16227_s1 + $0x1ff8] sm:$0xff] }
 0x3e3   :  { %7322 = vmatprep.subr.bf16.mxu0 %v10992_v61  ;;  %7666 = vmatprep.subr.bf16.mxu1 %v10994_v18  ;;  %v11039_v61 = vcombine.low %v1061_v63, %v1065_v27  ;;  %v11050_v6 = vcombine.high %v1070_v57, %v1074_v60  ;;  %v11047_v18 = vcombine.low %v1069_v56, %v1073_v35  ;;  %v11605_v63 = vld [vmem:[%s16230_s3 + $0x12c] ss:$16 sps:$4 sm:$0xff]   ;;  %v11600_v27 = vld [vmem:[%s16230_s3 + $0x120] ss:$16 sps:$4 sm:$0xff]   ;;  %v11603_v30 = vld [vmem:[%s16230_s3 + $0x128] ss:$16 sps:$4 sm:$0xff]  }
 0x3e4   :  { %v11049_v32 = vcombine.low %v1070_v57, %v1074_v60  ;;  %v11611_v58 = vld [vmem:[%s16230_s3 + $0x14c] ss:$16 sps:$4 sm:$0xff]   ;;  %v11612_v35 = vld [vmem:[%s16230_s3 + $0x160] ss:$16 sps:$4 sm:$0xff]   ;;  %v11615_v57 = vld [vmem:[%s16230_s3 + $0x168] ss:$16 sps:$4 sm:$0xff]  }
 0x3e5   :  { %v11617_v56 = vld [vmem:[%s16230_s3 + $0x16c] ss:$16 sps:$4 sm:$0xff]  }
 0x3e6   :  { %7323 = vmatpush1.bf16.msra.mxu0 %v10991_v45  ;;  %7667 = vmatpush1.bf16.msra.mxu1 %v10993_v46  ;;  %v11548_v45 = vld [vmem:[%s16230_s3 + $0x4] ss:$16 sps:$4 sm:$0xff]   ;;  %v11546_v46 = vld [vmem:[%s16230_s3] ss:$16 sps:$4 sm:$0xff]   ;;  %v11623_v60 = vld [vmem:[%s16230_s3 + $0x18c] ss:$16 sps:$4 sm:$0xff]  }
 0x3e7   :  { %7324 = vmatprep.subr.bf16.mxu0 %v11000_v7  ;;  %7668 = vmatprep.subr.bf16.mxu1 %v11002_v43  ;;  %v11551_v7 = vld [vmem:[%s16230_s3 + $0xc] ss:$16 sps:$4 sm:$0xff]   ;;  %v11552_v43 = vld [vmem:[%s16230_s3 + $0x20] ss:$16 sps:$4 sm:$0xff]  }
 0x3ea   :  { %7325 = vmatpush1.bf16.msra.mxu0 %v10999_v12  ;;  %7669 = vmatpush1.bf16.msra.mxu1 %v11001_v13  ;;  %v11560_v12 = vld [vmem:[%s16230_s3 + $0x44] ss:$16 sps:$4 sm:$0xff]   ;;  %v11558_v13 = vld [vmem:[%s16230_s3 + $0x40] ss:$16 sps:$4 sm:$0xff]  }
 0x3eb   :  { %7326 = vmatprep.subr.bf16.mxu0 %v11008_v14  ;;  %7670 = vmatprep.subr.bf16.mxu1 %v11010_v38  ;;  %v11561_v14 = vld [vmem:[%s16230_s3 + $0x48] ss:$16 sps:$4 sm:$0xff]   ;;  %v11572_v38 = vld [vmem:[%s16230_s3 + $0x84] ss:$16 sps:$4 sm:$0xff]  }
 0x3ee   :  { %7327 = vmatpush1.bf16.msra.mxu0 %v11007_v53  ;;  %7671 = vmatpush1.bf16.msra.mxu1 %v11009_v51  ;;  %v11570_v53 = vld [vmem:[%s16230_s3 + $0x80] ss:$16 sps:$4 sm:$0xff]   ;;  %v11573_v51 = vld [vmem:[%s16230_s3 + $0x88] ss:$16 sps:$4 sm:$0xff]  }
 0x3ef   :  { %7328 = vmatprep.subr.bf16.mxu0 %v11016_v54  ;;  %7672 = vmatprep.subr.bf16.mxu1 %v11018_v23  ;;  %v11578_v54 = vld [vmem:[%s16230_s3 + $0xa4] ss:$16 sps:$4 sm:$0xff]  }
 0x3f0   :  { %v11584_v23 = vld [vmem:[%s16230_s3 + $0xc4] ss:$16 sps:$4 sm:$0xff]  }
 0x3f2   :  { %7329 = vmatpush1.bf16.msra.mxu0 %v11015_v2  ;;  %7673 = vmatpush1.bf16.msra.mxu1 %v11017_v28  ;;  %v11582_v2 = vld [vmem:[%s16230_s3 + $0xc0] ss:$16 sps:$4 sm:$0xff]   ;;  %v11585_v28 = vld [vmem:[%s16230_s3 + $0xc8] ss:$16 sps:$4 sm:$0xff]  }
 0x3f3   :  { %7330 = vmatprep.subr.bf16.mxu0 %v11024_v42  ;;  %7674 = vmatprep.subr.bf16.mxu1 %v11026_v36  ;;  %v11590_v42 = vld [vmem:[%s16230_s3 + $0xe4] ss:$16 sps:$4 sm:$0xff]  }
 0x3f4   :  { %v11596_v36 = vld [vmem:[%s16230_s3 + $0x104] ss:$16 sps:$4 sm:$0xff]  }
 0x3f6   :  { %7331 = vmatpush1.bf16.msra.mxu0 %v11023_v10  ;;  %7675 = vmatpush1.bf16.msra.mxu1 %v11025_v1  ;;  %v11594_v10 = vld [vmem:[%s16230_s3 + $0x100] ss:$16 sps:$4 sm:$0xff]   ;;  %v11597_v1 = vld [vmem:[%s16230_s3 + $0x108] ss:$16 sps:$4 sm:$0xff]  }
 0x3f7   :  { %7332 = vmatprep.subr.bf16.mxu0 %v11032_v3  ;;  %7676 = vmatprep.subr.bf16.mxu1 %v11034_v49  ;;  %v11602_v3 = vld [vmem:[%s16230_s3 + $0x124] ss:$16 sps:$4 sm:$0xff]  }
 0x3f8   :  { %v11608_v49 = vld [vmem:[%s16230_s3 + $0x144] ss:$16 sps:$4 sm:$0xff]  }
 0x3fa   :  { %7333 = vmatpush1.bf16.msra.mxu0 %v11031_v52  ;;  %7677 = vmatpush1.bf16.msra.mxu1 %v11033_v55  ;;  %v11606_v52 = vld [vmem:[%s16230_s3 + $0x140] ss:$16 sps:$4 sm:$0xff]   ;;  %v11609_v55 = vld [vmem:[%s16230_s3 + $0x148] ss:$16 sps:$4 sm:$0xff]  }
 0x3fb   :  { %7334 = vmatprep.subr.bf16.mxu0 %v11040_v8  ;;  %7678 = vmatprep.subr.bf16.mxu1 %v11042_v59  ;;  %v11614_v8 = vld [vmem:[%s16230_s3 + $0x164] ss:$16 sps:$4 sm:$0xff]  }
 0x3fc   :  { %v11620_v59 = vld [vmem:[%s16230_s3 + $0x184] ss:$16 sps:$4 sm:$0xff]  }
 0x3fe   :  { %7335 = vmatpush1.bf16.msra.mxu0 %v11039_v61  ;;  %7679 = vmatpush1.bf16.msra.mxu1 %v11041_v62  ;;  %v11618_v61 = vld [vmem:[%s16230_s3 + $0x180] ss:$16 sps:$4 sm:$0xff]   ;;  %v11621_v62 = vld [vmem:[%s16230_s3 + $0x188] ss:$16 sps:$4 sm:$0xff]  }
 0x3ff   :  { %7336 = vmatprep.subr.bf16.mxu0 %v11048_v0  ;;  %7680 = vmatprep.subr.bf16.mxu1 %v11050_v6  ;;  %v11626_v0 = vld [vmem:[%s16230_s3 + $0x1a4] ss:$16 sps:$4 sm:$0xff]   ;;  %v11629_v6 = vld [vmem:[%s16230_s3 + $0x1ac] ss:$16 sps:$4 sm:$0xff]  }
 0x402   :  { %7337 = vmatpush1.bf16.msra.mxu0 %v11047_v18  ;;  %7681 = vmatpush1.bf16.msra.mxu1 %v11049_v32  ;;  %v11624_v18 = vld [vmem:[%s16230_s3 + $0x1a0] ss:$16 sps:$4 sm:$0xff]   ;;  %v11627_v32 = vld [vmem:[%s16230_s3 + $0x1a8] ss:$16 sps:$4 sm:$0xff]  }
 0x403   :  { %9275 = vmatprep.subr.bf16.mxu0 %v11548_v45  ;;  %9447 = vmatprep.subr.bf16.mxu1 %v11551_v7  ;;  %v11632_v45 = vld [vmem:[%s16230_s3 + $0x1c4] ss:$16 sps:$4 sm:$0xff]   ;;  %v11630_v7 = vld [vmem:[%s16230_s3 + $0x1c0] ss:$16 sps:$4 sm:$0xff]  }
 0x405   :  { %7339 = vmatmul.mubr.bf16.vlgmr.msra.gmra.mrb[4].mxu0 %v13739_v20  ;;  %7683 = vmatmul.mubr.bf16.vlgmr.msra.gmra.mrb[4].mxu1 %v13739_v20  ;;  %v11563_v20 = vld [vmem:[%s16230_s3 + $0x4c] ss:$16 sps:$4 sm:$0xff]  }
 0x406   :  { %9276 = vmatpush1.bf16.msra.mxu0 %v11546_v46  ;;  %9307 = vmatprep.mubr.bf16.mxu0 %v14444_v29  ;;  %v11635_v46 = vld [vmem:[%s16230_s3 + $0x1cc] ss:$16 sps:$4 sm:$0xff]  }
 0x407   :  { %9448 = vmatpush1.bf16.msra.mxu1 %v11549_v9  ;;  %9479 = vmatprep.mubr.bf16.mxu1 %v14444_v29  ;;  %v11566_v29 = vld [vmem:[%s16230_s3 + $0x64] ss:$16 sps:$4 sm:$0xff]   ;;  %v11633_v9 = vld [vmem:[%s16230_s3 + $0x1c8] ss:$16 sps:$4 sm:$0xff]  }
 0x408   :  { %9277 = vmatprep.subr.bf16.mxu0 %v11554_v31  ;;  %9449 = vmatprep.subr.bf16.mxu1 %v11557_v39  ;;  %v11638_v31 = vld [vmem:[%s16230_s3 + $0x1e4] ss:$16 sps:$4 sm:$0xff]   ;;  %v11641_v39 = vld [vmem:[%s16230_s3 + $0x1ec] ss:$16 sps:$4 sm:$0xff]  }
 0x40a   :  { %9278 = vmatpush1.bf16.msra.mxu0 %v11552_v43  ;;  %v11636_v43 = vld [vmem:[%s16230_s3 + $0x1e0] ss:$16 sps:$4 sm:$0xff]  }
 0x40b   :  { %9450 = vmatpush1.bf16.msra.mxu1 %v11555_v11  ;;  %9279 = vmatprep.subr.bf16.mxu0 %v11560_v12  ;;  %v11639_v11 = vld [vmem:[%s16230_s3 + $0x1e8] ss:$16 sps:$4 sm:$0xff]   ;;  %v11644_v12 = vld [vmem:[%s16230_s3 + $0x204] ss:$16 sps:$4 sm:$0xff]  }
 0x40c   :  { %9451 = vmatprep.subr.bf16.mxu1 %v11563_v20  ;;  %v11647_v20 = vld [vmem:[%s16230_s3 + $0x20c] ss:$16 sps:$4 sm:$0xff]  }
 0x40e   :  { %9280 = vmatpush1.bf16.msra.mxu0 %v11558_v13  ;;  %v11642_v13 = vld [vmem:[%s16230_s3 + $0x200] ss:$16 sps:$4 sm:$0xff]  }
 0x40f   :  { %9452 = vmatpush1.bf16.msra.mxu1 %v11561_v14  ;;  %9281 = vmatprep.subr.bf16.mxu0 %v11566_v29  ;;  %v11645_v14 = vld [vmem:[%s16230_s3 + $0x208] ss:$16 sps:$4 sm:$0xff]   ;;  %v11650_v29 = vld [vmem:[%s16230_s3 + $0x224] ss:$16 sps:$4 sm:$0xff]  }
 0x410   :  { %9453 = vmatprep.subr.bf16.mxu1 %v11569_v16  ;;  %v11653_v16 = vld [vmem:[%s16230_s3 + $0x22c] ss:$16 sps:$4 sm:$0xff]  }
 0x412   :  { %9282 = vmatpush1.bf16.msra.mxu0 %v11564_v48  ;;  %v11648_v48 = vld [vmem:[%s16230_s3 + $0x220] ss:$16 sps:$4 sm:$0xff]  }
 0x413   :  { %9454 = vmatpush1.bf16.msra.mxu1 %v11567_v15  ;;  %9283 = vmatprep.subr.bf16.mxu0 %v11572_v38  ;;  %v11651_v15 = vld [vmem:[%s16230_s3 + $0x228] ss:$16 sps:$4 sm:$0xff]   ;;  %v11656_v38 = vld [vmem:[%s16230_s3 + $0x244] ss:$16 sps:$4 sm:$0xff]  }
 0x414   :  { %9455 = vmatprep.subr.bf16.mxu1 %v11575_v19  ;;  %v11654_v19 = vld [vmem:[%s16230_s3 + $0x240] ss:$16 sps:$4 sm:$0xff]  }
 0x416   :  { %9284 = vmatpush1.bf16.msra.mxu0 %v11570_v53  ;;  %v11657_v53 = vld [vmem:[%s16230_s3 + $0x248] ss:$16 sps:$4 sm:$0xff]  }
 0x417   :  { %9456 = vmatpush1.bf16.msra.mxu1 %v11573_v51  ;;  %9285 = vmatprep.subr.bf16.mxu0 %v11578_v54  ;;  %v11665_v51 = vld [vmem:[%s16230_s3 + $0x26c] ss:$16 sps:$4 sm:$0xff]   ;;  %v11660_v54 = vld [vmem:[%s16230_s3 + $0x260] ss:$16 sps:$4 sm:$0xff]  }
 0x418   :  { %9457 = vmatprep.subr.bf16.mxu1 %v11581_v22  ;;  %v11663_v22 = vld [vmem:[%s16230_s3 + $0x268] ss:$16 sps:$4 sm:$0xff]  }
 0x41a   :  { %9286 = vmatpush1.bf16.msra.mxu0 %v11576_v24  ;;  %v11668_v24 = vld [vmem:[%s16230_s3 + $0x284] ss:$16 sps:$4 sm:$0xff]  }
 0x41b   :  { %9458 = vmatpush1.bf16.msra.mxu1 %v11579_v25  ;;  %9287 = vmatprep.subr.bf16.mxu0 %v11584_v23  ;;  %v11671_v25 = vld [vmem:[%s16230_s3 + $0x28c] ss:$16 sps:$4 sm:$0xff]   ;;  %v11666_v23 = vld [vmem:[%s16230_s3 + $0x280] ss:$16 sps:$4 sm:$0xff]  }
 0x41c   :  { %9459 = vmatprep.subr.bf16.mxu1 %v11587_v26  ;;  %v11669_v26 = vld [vmem:[%s16230_s3 + $0x288] ss:$16 sps:$4 sm:$0xff]  }
 0x41e   :  { %9288 = vmatpush1.bf16.msra.mxu0 %v11582_v2  ;;  %v11674_v2 = vld [vmem:[%s16230_s3 + $0x2a4] ss:$16 sps:$4 sm:$0xff]  }
 0x41f   :  { %9460 = vmatpush1.bf16.msra.mxu1 %v11585_v28  ;;  %9289 = vmatprep.subr.bf16.mxu0 %v11590_v42  ;;  %v11677_v28 = vld [vmem:[%s16230_s3 + $0x2ac] ss:$16 sps:$4 sm:$0xff]   ;;  %v11672_v42 = vld [vmem:[%s16230_s3 + $0x2a0] ss:$16 sps:$4 sm:$0xff]  }
 0x420   :  { %9461 = vmatprep.subr.bf16.mxu1 %v11593_v17  ;;  %v11675_v17 = vld [vmem:[%s16230_s3 + $0x2a8] ss:$16 sps:$4 sm:$0xff]  }
 0x422   :  { %9290 = vmatpush1.bf16.msra.mxu0 %v11588_v33  ;;  %v11680_v33 = vld [vmem:[%s16230_s3 + $0x2c4] ss:$16 sps:$4 sm:$0xff]  }
 0x423   :  { %9462 = vmatpush1.bf16.msra.mxu1 %v11591_v4  ;;  %9291 = vmatprep.subr.bf16.mxu0 %v11596_v36  ;;  %v11683_v4 = vld [vmem:[%s16230_s3 + $0x2cc] ss:$16 sps:$4 sm:$0xff]   ;;  %v11678_v36 = vld [vmem:[%s16230_s3 + $0x2c0] ss:$16 sps:$4 sm:$0xff]  }
 0x424   :  { %9463 = vmatprep.subr.bf16.mxu1 %v11599_v40  ;;  %v11681_v40 = vld [vmem:[%s16230_s3 + $0x2c8] ss:$16 sps:$4 sm:$0xff]  }
 0x426   :  { %9292 = vmatpush1.bf16.msra.mxu0 %v11594_v10  ;;  %v11686_v10 = vld [vmem:[%s16230_s3 + $0x2e4] ss:$16 sps:$4 sm:$0xff]  }
 0x427   :  { %9464 = vmatpush1.bf16.msra.mxu1 %v11597_v1  ;;  %9293 = vmatprep.subr.bf16.mxu0 %v11602_v3  ;;  %v11689_v1 = vld [vmem:[%s16230_s3 + $0x2ec] ss:$16 sps:$4 sm:$0xff]   ;;  %v11684_v3 = vld [vmem:[%s16230_s3 + $0x2e0] ss:$16 sps:$4 sm:$0xff]  }
 0x428   :  { %9465 = vmatprep.subr.bf16.mxu1 %v11605_v63  ;;  %v11687_v63 = vld [vmem:[%s16230_s3 + $0x2e8] ss:$16 sps:$4 sm:$0xff]  }
 0x42a   :  { %9294 = vmatpush1.bf16.msra.mxu0 %v11600_v27  ;;  %v11692_v27 = vld [vmem:[%s16230_s3 + $0x304] ss:$16 sps:$4 sm:$0xff]  }
 0x42b   :  { %9466 = vmatpush1.bf16.msra.mxu1 %v11603_v30  ;;  %9295 = vmatprep.subr.bf16.mxu0 %v11608_v49  ;;  %v11695_v30 = vld [vmem:[%s16230_s3 + $0x30c] ss:$16 sps:$4 sm:$0xff]   ;;  %v11690_v49 = vld [vmem:[%s16230_s3 + $0x300] ss:$16 sps:$4 sm:$0xff]  }
 0x42c   :  { %9467 = vmatprep.subr.bf16.mxu1 %v11611_v58  ;;  %v11693_v58 = vld [vmem:[%s16230_s3 + $0x308] ss:$16 sps:$4 sm:$0xff]  }
 0x42e   :  { %9296 = vmatpush1.bf16.msra.mxu0 %v11606_v52  ;;  %v11698_v52 = vld [vmem:[%s16230_s3 + $0x324] ss:$16 sps:$4 sm:$0xff]  }
 0x42f   :  { %9468 = vmatpush1.bf16.msra.mxu1 %v11609_v55  ;;  %9297 = vmatprep.subr.bf16.mxu0 %v11614_v8  ;;  %v11701_v55 = vld [vmem:[%s16230_s3 + $0x32c] ss:$16 sps:$4 sm:$0xff]   ;;  %v11696_v8 = vld [vmem:[%s16230_s3 + $0x320] ss:$16 sps:$4 sm:$0xff]  }
 0x430   :  { %9469 = vmatprep.subr.bf16.mxu1 %v11617_v56  ;;  %v11699_v56 = vld [vmem:[%s16230_s3 + $0x328] ss:$16 sps:$4 sm:$0xff]  }
 0x432   :  { %9298 = vmatpush1.bf16.msra.mxu0 %v11612_v35  ;;  %v11704_v35 = vld [vmem:[%s16230_s3 + $0x344] ss:$16 sps:$4 sm:$0xff]  }
 0x433   :  { %9470 = vmatpush1.bf16.msra.mxu1 %v11615_v57  ;;  %9299 = vmatprep.subr.bf16.mxu0 %v11620_v59  ;;  %v11707_v57 = vld [vmem:[%s16230_s3 + $0x34c] ss:$16 sps:$4 sm:$0xff]   ;;  %v11702_v59 = vld [vmem:[%s16230_s3 + $0x340] ss:$16 sps:$4 sm:$0xff]  }
 0x434   :  { %9471 = vmatprep.subr.bf16.mxu1 %v11623_v60  ;;  %v11705_v60 = vld [vmem:[%s16230_s3 + $0x348] ss:$16 sps:$4 sm:$0xff]  }
 0x436   :  { %9300 = vmatpush1.bf16.msra.mxu0 %v11618_v61  ;;  %v11710_v61 = vld [vmem:[%s16230_s3 + $0x364] ss:$16 sps:$4 sm:$0xff]  }
 0x437   :  { %9472 = vmatpush1.bf16.msra.mxu1 %v11621_v62  ;;  %9301 = vmatprep.subr.bf16.mxu0 %v11626_v0  ;;  %v11713_v62 = vld [vmem:[%s16230_s3 + $0x36c] ss:$16 sps:$4 sm:$0xff]   ;;  %v11708_v0 = vld [vmem:[%s16230_s3 + $0x360] ss:$16 sps:$4 sm:$0xff]  }
 0x438   :  { %9473 = vmatprep.subr.bf16.mxu1 %v11629_v6  ;;  %v11711_v6 = vld [vmem:[%s16230_s3 + $0x368] ss:$16 sps:$4 sm:$0xff]  }
 0x43a   :  { %9302 = vmatpush1.bf16.msra.mxu0 %v11624_v18  ;;  %v11716_v18 = vld [vmem:[%s16230_s3 + $0x384] ss:$16 sps:$4 sm:$0xff]  }
 0x43b   :  { %9474 = vmatpush1.bf16.msra.mxu1 %v11627_v32  ;;  %9303 = vmatprep.subr.bf16.mxu0 %v11632_v45  ;;  %v11719_v32 = vld [vmem:[%s16230_s3 + $0x38c] ss:$16 sps:$4 sm:$0xff]   ;;  %v11714_v45 = vld [vmem:[%s16230_s3 + $0x380] ss:$16 sps:$4 sm:$0xff]  }
 0x43c   :  { %9475 = vmatprep.subr.bf16.mxu1 %v11635_v46  ;;  %v11717_v46 = vld [vmem:[%s16230_s3 + $0x388] ss:$16 sps:$4 sm:$0xff]  }
 0x43e   :  { %9304 = vmatpush1.bf16.msra.mxu0 %v11630_v7  ;;  %v11722_v7 = vld [vmem:[%s16230_s3 + $0x3a4] ss:$16 sps:$4 sm:$0xff]  }
 0x43f   :  { %9476 = vmatpush1.bf16.msra.mxu1 %v11633_v9  ;;  %9305 = vmatprep.subr.bf16.mxu0 %v11638_v31  ;;  %v11725_v9 = vld [vmem:[%s16230_s3 + $0x3ac] ss:$16 sps:$4 sm:$0xff]   ;;  %v11720_v31 = vld [vmem:[%s16230_s3 + $0x3a0] ss:$16 sps:$4 sm:$0xff]  }
 0x440   :  { %9477 = vmatprep.subr.bf16.mxu1 %v11641_v39  ;;  %v11723_v39 = vld [vmem:[%s16230_s3 + $0x3a8] ss:$16 sps:$4 sm:$0xff]  }
 0x442   :  { %9306 = vmatpush1.bf16.msra.mxu0 %v11636_v43  ;;  %v11728_v43 = vld [vmem:[%s16230_s3 + $0x3c4] ss:$16 sps:$4 sm:$0xff]  }
 0x443   :  { %9478 = vmatpush1.bf16.msra.mxu1 %v11639_v11  ;;  %9318 = vmatprep.subr.bf16.mxu0 %v11644_v12  ;;  %v11731_v11 = vld [vmem:[%s16230_s3 + $0x3cc] ss:$16 sps:$4 sm:$0xff]   ;;  %v11726_v12 = vld [vmem:[%s16230_s3 + $0x3c0] ss:$16 sps:$4 sm:$0xff]  }
 0x444   :  { %9490 = vmatprep.subr.bf16.mxu1 %v11647_v20  ;;  %v11729_v20 = vld [vmem:[%s16230_s3 + $0x3c8] ss:$16 sps:$4 sm:$0xff]  }
 0x445   :  { %9308 = vmatmul.mubr.bf16.vlgmr.msra.gmra.mrb[8].mxu0 %v14440_v44 }
 0x446   :  { %9480 = vmatmul.mubr.bf16.vlgmr.msra.gmra.mrb[8].mxu1 %v14440_v44  ;;  %9319 = vmatpush1.bf16.msra.mxu0 %v11642_v13  ;;  %v11659_v44 = vld [vmem:[%s16230_s3 + $0x24c] ss:$16 sps:$4 sm:$0xff]   ;;  %v11734_v13 = vld [vmem:[%s16230_s3 + $0x3e4] ss:$16 sps:$4 sm:$0xff]  }
 0x447   :  { %9350 = vmatprep.mubr.bf16.mxu0 %v14452_v50  ;;  %9491 = vmatpush1.bf16.msra.mxu1 %v11645_v14  ;;  %v11737_v14 = vld [vmem:[%s16230_s3 + $0x3ec] ss:$16 sps:$4 sm:$0xff]  }
 0x448   :  { %9522 = vmatprep.mubr.bf16.mxu1 %v14452_v50  ;;  %9320 = vmatprep.subr.bf16.mxu0 %v11650_v29  ;;  %v11662_v50 = vld [vmem:[%s16230_s3 + $0x264] ss:$16 sps:$4 sm:$0xff]   ;;  %v11732_v29 = vld [vmem:[%s16230_s3 + $0x3e0] ss:$16 sps:$4 sm:$0xff]  }
 0x449   :  { %9492 = vmatprep.subr.bf16.mxu1 %v11653_v16  ;;  %v11735_v16 = vld [vmem:[%s16230_s3 + $0x3e8] ss:$16 sps:$4 sm:$0xff]  }
 0x44a   :  { %9321 = vmatpush1.bf16.msra.mxu0 %v11648_v48  ;;  %v11740_v48 = vld [vmem:[%s16230_s3 + $0x404] ss:$16 sps:$4 sm:$0xff]  }
 0x44b   :  { %9493 = vmatpush1.bf16.msra.mxu1 %v11651_v15  ;;  %9322 = vmatprep.subr.bf16.mxu0 %v11656_v38  ;;  %v11743_v15 = vld [vmem:[%s16230_s3 + $0x40c] ss:$16 sps:$4 sm:$0xff]   ;;  %v11738_v38 = vld [vmem:[%s16230_s3 + $0x400] ss:$16 sps:$4 sm:$0xff]  }
 0x44c   :  { %9494 = vmatprep.subr.bf16.mxu1 %v11659_v44  ;;  %v11741_v44 = vld [vmem:[%s16230_s3 + $0x408] ss:$16 sps:$4 sm:$0xff]  }
 0x44e   :  { %9323 = vmatpush1.bf16.msra.mxu0 %v11654_v19  ;;  %v11746_v19 = vld [vmem:[%s16230_s3 + $0x424] ss:$16 sps:$4 sm:$0xff]  }
 0x44f   :  { %9495 = vmatpush1.bf16.msra.mxu1 %v11657_v53  ;;  %9324 = vmatprep.subr.bf16.mxu0 %v11662_v50  ;;  %v11749_v53 = vld [vmem:[%s16230_s3 + $0x42c] ss:$16 sps:$4 sm:$0xff]   ;;  %v11744_v50 = vld [vmem:[%s16230_s3 + $0x420] ss:$16 sps:$4 sm:$0xff]  }
 0x450   :  { %9496 = vmatprep.subr.bf16.mxu1 %v11665_v51  ;;  %v11747_v51 = vld [vmem:[%s16230_s3 + $0x428] ss:$16 sps:$4 sm:$0xff]  }
 0x452   :  { %9325 = vmatpush1.bf16.msra.mxu0 %v11660_v54  ;;  %v11752_v54 = vld [vmem:[%s16230_s3 + $0x444] ss:$16 sps:$4 sm:$0xff]  }
 0x453   :  { %9497 = vmatpush1.bf16.msra.mxu1 %v11663_v22  ;;  %9326 = vmatprep.subr.bf16.mxu0 %v11668_v24  ;;  %v11750_v22 = vld [vmem:[%s16230_s3 + $0x440] ss:$16 sps:$4 sm:$0xff]   ;;  %v11753_v24 = vld [vmem:[%s16230_s3 + $0x448] ss:$16 sps:$4 sm:$0xff]  }
 0x454   :  { %9498 = vmatprep.subr.bf16.mxu1 %v11671_v25  ;;  %v11758_v25 = vld [vmem:[%s16230_s3 + $0x464] ss:$16 sps:$4 sm:$0xff]  }
 0x456   :  { %9327 = vmatpush1.bf16.msra.mxu0 %v11666_v23  ;;  %v11761_v23 = vld [vmem:[%s16230_s3 + $0x46c] ss:$16 sps:$4 sm:$0xff]  }
 0x457   :  { %9499 = vmatpush1.bf16.msra.mxu1 %v11669_v26  ;;  %9328 = vmatprep.subr.bf16.mxu0 %v11674_v2  ;;  %v11756_v26 = vld [vmem:[%s16230_s3 + $0x460] ss:$16 sps:$4 sm:$0xff]   ;;  %v11759_v2 = vld [vmem:[%s16230_s3 + $0x468] ss:$16 sps:$4 sm:$0xff]  }
 0x458   :  { %9500 = vmatprep.subr.bf16.mxu1 %v11677_v28  ;;  %v11764_v28 = vld [vmem:[%s16230_s3 + $0x484] ss:$16 sps:$4 sm:$0xff]  }
 0x45a   :  { %9329 = vmatpush1.bf16.msra.mxu0 %v11672_v42  ;;  %v11767_v42 = vld [vmem:[%s16230_s3 + $0x48c] ss:$16 sps:$4 sm:$0xff]  }
 0x45b   :  { %9501 = vmatpush1.bf16.msra.mxu1 %v11675_v17  ;;  %9330 = vmatprep.subr.bf16.mxu0 %v11680_v33  ;;  %v11762_v17 = vld [vmem:[%s16230_s3 + $0x480] ss:$16 sps:$4 sm:$0xff]   ;;  %v11765_v33 = vld [vmem:[%s16230_s3 + $0x488] ss:$16 sps:$4 sm:$0xff]  }
 0x45c   :  { %9502 = vmatprep.subr.bf16.mxu1 %v11683_v4  ;;  %v11770_v4 = vld [vmem:[%s16230_s3 + $0x4a4] ss:$16 sps:$4 sm:$0xff]  }
 0x45e   :  { %9331 = vmatpush1.bf16.msra.mxu0 %v11678_v36  ;;  %v11773_v36 = vld [vmem:[%s16230_s3 + $0x4ac] ss:$16 sps:$4 sm:$0xff]  }
 0x45f   :  { %9503 = vmatpush1.bf16.msra.mxu1 %v11681_v40  ;;  %9332 = vmatprep.subr.bf16.mxu0 %v11686_v10  ;;  %v11768_v40 = vld [vmem:[%s16230_s3 + $0x4a0] ss:$16 sps:$4 sm:$0xff]   ;;  %v11771_v10 = vld [vmem:[%s16230_s3 + $0x4a8] ss:$16 sps:$4 sm:$0xff]  }
 0x460   :  { %9504 = vmatprep.subr.bf16.mxu1 %v11689_v1  ;;  %v11776_v1 = vld [vmem:[%s16230_s3 + $0x4c4] ss:$16 sps:$4 sm:$0xff]  }
 0x462   :  { %9333 = vmatpush1.bf16.msra.mxu0 %v11684_v3  ;;  %v11779_v3 = vld [vmem:[%s16230_s3 + $0x4cc] ss:$16 sps:$4 sm:$0xff]  }
 0x463   :  { %9505 = vmatpush1.bf16.msra.mxu1 %v11687_v63  ;;  %9334 = vmatprep.subr.bf16.mxu0 %v11692_v27  ;;  %v11774_v63 = vld [vmem:[%s16230_s3 + $0x4c0] ss:$16 sps:$4 sm:$0xff]   ;;  %v11777_v27 = vld [vmem:[%s16230_s3 + $0x4c8] ss:$16 sps:$4 sm:$0xff]  }
 0x464   :  { %9506 = vmatprep.subr.bf16.mxu1 %v11695_v30  ;;  %v11782_v30 = vld [vmem:[%s16230_s3 + $0x4e4] ss:$16 sps:$4 sm:$0xff]  }
 0x466   :  { %9335 = vmatpush1.bf16.msra.mxu0 %v11690_v49  ;;  %v11785_v49 = vld [vmem:[%s16230_s3 + $0x4ec] ss:$16 sps:$4 sm:$0xff]  }
 0x467   :  { %9507 = vmatpush1.bf16.msra.mxu1 %v11693_v58  ;;  %9336 = vmatprep.subr.bf16.mxu0 %v11698_v52  ;;  %v11780_v58 = vld [vmem:[%s16230_s3 + $0x4e0] ss:$16 sps:$4 sm:$0xff]   ;;  %v11783_v52 = vld [vmem:[%s16230_s3 + $0x4e8] ss:$16 sps:$4 sm:$0xff]  }
 0x468   :  { %9508 = vmatprep.subr.bf16.mxu1 %v11701_v55  ;;  %v11788_v55 = vld [vmem:[%s16230_s3 + $0x504] ss:$16 sps:$4 sm:$0xff]  }
 0x46a   :  { %9337 = vmatpush1.bf16.msra.mxu0 %v11696_v8  ;;  %v11791_v8 = vld [vmem:[%s16230_s3 + $0x50c] ss:$16 sps:$4 sm:$0xff]  }
 0x46b   :  { %9509 = vmatpush1.bf16.msra.mxu1 %v11699_v56  ;;  %9338 = vmatprep.subr.bf16.mxu0 %v11704_v35  ;;  %v11786_v56 = vld [vmem:[%s16230_s3 + $0x500] ss:$16 sps:$4 sm:$0xff]   ;;  %v11789_v35 = vld [vmem:[%s16230_s3 + $0x508] ss:$16 sps:$4 sm:$0xff]  }
 0x46c   :  { %9510 = vmatprep.subr.bf16.mxu1 %v11707_v57  ;;  %v11794_v57 = vld [vmem:[%s16230_s3 + $0x524] ss:$16 sps:$4 sm:$0xff]  }
 0x46e   :  { %9339 = vmatpush1.bf16.msra.mxu0 %v11702_v59  ;;  %v11797_v59 = vld [vmem:[%s16230_s3 + $0x52c] ss:$16 sps:$4 sm:$0xff]  }
 0x46f   :  { %9511 = vmatpush1.bf16.msra.mxu1 %v11705_v60  ;;  %9340 = vmatprep.subr.bf16.mxu0 %v11710_v61  ;;  %v11792_v60 = vld [vmem:[%s16230_s3 + $0x520] ss:$16 sps:$4 sm:$0xff]   ;;  %v11795_v61 = vld [vmem:[%s16230_s3 + $0x528] ss:$16 sps:$4 sm:$0xff]  }
 0x470   :  { %9512 = vmatprep.subr.bf16.mxu1 %v11713_v62  ;;  %v11800_v62 = vld [vmem:[%s16230_s3 + $0x544] ss:$16 sps:$4 sm:$0xff]  }
 0x472   :  { %9341 = vmatpush1.bf16.msra.mxu0 %v11708_v0  ;;  %v11803_v0 = vld [vmem:[%s16230_s3 + $0x54c] ss:$16 sps:$4 sm:$0xff]  }
 0x473   :  { %9513 = vmatpush1.bf16.msra.mxu1 %v11711_v6  ;;  %9342 = vmatprep.subr.bf16.mxu0 %v11716_v18  ;;  %v11798_v6 = vld [vmem:[%s16230_s3 + $0x540] ss:$16 sps:$4 sm:$0xff]   ;;  %v11801_v18 = vld [vmem:[%s16230_s3 + $0x548] ss:$16 sps:$4 sm:$0xff]  }
 0x474   :  { %9514 = vmatprep.subr.bf16.mxu1 %v11719_v32  ;;  %v11806_v32 = vld [vmem:[%s16230_s3 + $0x564] ss:$16 sps:$4 sm:$0xff]  }
 0x476   :  { %9343 = vmatpush1.bf16.msra.mxu0 %v11714_v45  ;;  %v11809_v45 = vld [vmem:[%s16230_s3 + $0x56c] ss:$16 sps:$4 sm:$0xff]  }
 0x477   :  { %9515 = vmatpush1.bf16.msra.mxu1 %v11717_v46  ;;  %9344 = vmatprep.subr.bf16.mxu0 %v11722_v7  ;;  %v11804_v46 = vld [vmem:[%s16230_s3 + $0x560] ss:$16 sps:$4 sm:$0xff]   ;;  %v11807_v7 = vld [vmem:[%s16230_s3 + $0x568] ss:$16 sps:$4 sm:$0xff]  }
 0x478   :  { %9516 = vmatprep.subr.bf16.mxu1 %v11725_v9  ;;  %v11812_v9 = vld [vmem:[%s16230_s3 + $0x584] ss:$16 sps:$4 sm:$0xff]  }
 0x47a   :  { %9345 = vmatpush1.bf16.msra.mxu0 %v11720_v31  ;;  %v11815_v31 = vld [vmem:[%s16230_s3 + $0x58c] ss:$16 sps:$4 sm:$0xff]  }
 0x47b   :  { %9517 = vmatpush1.bf16.msra.mxu1 %v11723_v39  ;;  %9346 = vmatprep.subr.bf16.mxu0 %v11728_v43  ;;  %v11810_v39 = vld [vmem:[%s16230_s3 + $0x580] ss:$16 sps:$4 sm:$0xff]   ;;  %v11813_v43 = vld [vmem:[%s16230_s3 + $0x588] ss:$16 sps:$4 sm:$0xff]  }
 0x47c   :  { %9518 = vmatprep.subr.bf16.mxu1 %v11731_v11  ;;  %v11818_v11 = vld [vmem:[%s16230_s3 + $0x5a4] ss:$16 sps:$4 sm:$0xff]  }
 0x47e   :  { %9347 = vmatpush1.bf16.msra.mxu0 %v11726_v12  ;;  %v11816_v12 = vld [vmem:[%s16230_s3 + $0x5a0] ss:$16 sps:$4 sm:$0xff]  }
 0x47f   :  { %9519 = vmatpush1.bf16.msra.mxu1 %v11729_v20  ;;  %9348 = vmatprep.subr.bf16.mxu0 %v11734_v13  ;;  %v11821_v20 = vld [vmem:[%s16230_s3 + $0x5ac] ss:$16 sps:$4 sm:$0xff]   ;;  %v11819_v13 = vld [vmem:[%s16230_s3 + $0x5a8] ss:$16 sps:$4 sm:$0xff]  }
 0x480   :  { %9520 = vmatprep.subr.bf16.mxu1 %v11737_v14  ;;  %v11824_v14 = vld [vmem:[%s16230_s3 + $0x5c4] ss:$16 sps:$4 sm:$0xff]  }
 0x482   :  { %9349 = vmatpush1.bf16.msra.mxu0 %v11732_v29  ;;  %v11827_v29 = vld [vmem:[%s16230_s3 + $0x5cc] ss:$16 sps:$4 sm:$0xff]  }
 0x483   :  { %9521 = vmatpush1.bf16.msra.mxu1 %v11735_v16  ;;  %9361 = vmatprep.subr.bf16.mxu0 %v11740_v48  ;;  %v11822_v16 = vld [vmem:[%s16230_s3 + $0x5c0] ss:$16 sps:$4 sm:$0xff]   ;;  %v11825_v48 = vld [vmem:[%s16230_s3 + $0x5c8] ss:$16 sps:$4 sm:$0xff]  }
 0x484   :  { %9533 = vmatprep.subr.bf16.mxu1 %v11743_v15  ;;  %v11830_v15 = vld [vmem:[%s16230_s3 + $0x5e4] ss:$16 sps:$4 sm:$0xff]  }
 0x485   :  { %9351 = vmatmul.mubr.bf16.vlgmr.msra.gmra.mrb[8].mxu0 %v14442_v47 }
 0x486   :  { %9523 = vmatmul.mubr.bf16.vlgmr.msra.gmra.mrb[8].mxu1 %v14442_v47  ;;  %9362 = vmatpush1.bf16.msra.mxu0 %v11738_v38  ;;  %v11755_v47 = vld [vmem:[%s16230_s3 + $0x44c] ss:$16 sps:$4 sm:$0xff]  }
 0x487   :  { %9534 = vmatpush1.bf16.msra.mxu1 %v11741_v44  ;;  %9363 = vmatprep.subr.bf16.mxu0 %v11746_v19  ;;  %v11833_v38 = vld [vmem:[%s16230_s3 + $0x5ec] ss:$16 sps:$4 sm:$0xff]   ;;  %v11828_v44 = vld [vmem:[%s16230_s3 + $0x5e0] ss:$16 sps:$4 sm:$0xff]   ;;  %v11831_v19 = vld [vmem:[%s16230_s3 + $0x5e8] ss:$16 sps:$4 sm:$0xff]  }
 0x488   :  { %9535 = vmatprep.subr.bf16.mxu1 %v11749_v53  ;;  %v11836_v53 = vld [vmem:[%s16230_s3 + $0x604] ss:$16 sps:$4 sm:$0xff]  }
 0x48a   :  { %9364 = vmatpush1.bf16.msra.mxu0 %v11744_v50  ;;  %v11839_v50 = vld [vmem:[%s16230_s3 + $0x60c] ss:$16 sps:$4 sm:$0xff]  }
 0x48b   :  { %9536 = vmatpush1.bf16.msra.mxu1 %v11747_v51  ;;  %9365 = vmatprep.subr.bf16.mxu0 %v11752_v54  ;;  %v1095_v51 = vsub.s32 4, %v14375_v21  ;;  %v1103_v54 = vsub.s32 6, %v14375_v21 }
 0x48c   :  { %9537 = vmatprep.subr.bf16.mxu1 %v11755_v47  ;;  %v1099_v47 = vsub.s32 5, %v14375_v21 }
 0x48e   :  { %9366 = vmatpush1.bf16.msra.mxu0 %v11750_v22  ;;  %v1107_v22 = vsub.s32 7, %v14375_v21 }
 0x48f   :  { %9538 = vmatpush1.bf16.msra.mxu1 %v11753_v24  ;;  %9367 = vmatprep.subr.bf16.mxu0 %v11758_v25  ;;  %v11962_v24 = vld [vmem:[%s16229_s2] sm:$0xff] }
 0x490   :  { %9539 = vmatprep.subr.bf16.mxu1 %v11761_v23  ;;  %v1096_v25 = vrot.slane %v11962_v24, %v1095_v51  ;;  %v1104_v23 = vrot.slane %v11962_v24, %v1103_v54  ;;  %v11872_v51 = vld [vmem:[%s16230_s3 + $0x6c4] ss:$16 sps:$4 sm:$0xff]   ;;  %v11875_v54 = vld [vmem:[%s16230_s3 + $0x6cc] ss:$16 sps:$4 sm:$0xff]  }
 0x492   :  { %9368 = vmatpush1.bf16.msra.mxu0 %v11756_v26  ;;  %v1100_v26 = vrot.slane %v11962_v24, %v1099_v47  ;;  %v11870_v47 = vld [vmem:[%s16230_s3 + $0x6c0] ss:$16 sps:$4 sm:$0xff]  }
 0x493   :  { %9540 = vmatpush1.bf16.msra.mxu1 %v11759_v2  ;;  %9369 = vmatprep.subr.bf16.mxu0 %v11764_v28  ;;  %v1108_v2 = vrot.slane %v11962_v24, %v1107_v22  ;;  %v11873_v22 = vld [vmem:[%s16230_s3 + $0x6c8] ss:$16 sps:$4 sm:$0xff]   ;;  %v11878_v24 = vld [vmem:[%s16230_s3 + $0x6e4] ss:$16 sps:$4 sm:$0xff]  }
 0x494   :  { %9541 = vmatprep.subr.bf16.mxu1 %v11767_v42 }
 0x496   :  { %9370 = vmatpush1.bf16.msra.mxu0 %v11762_v17 }
 0x497   :  { %9542 = vmatpush1.bf16.msra.mxu1 %v11765_v33  ;;  %9371 = vmatprep.subr.bf16.mxu0 %v11770_v4 }
 0x498   :  { %9543 = vmatprep.subr.bf16.mxu1 %v11773_v36 }
 0x49a   :  { %9372 = vmatpush1.bf16.msra.mxu0 %v11768_v40 }
 0x49b   :  { %9544 = vmatpush1.bf16.msra.mxu1 %v11771_v10  ;;  %9373 = vmatprep.subr.bf16.mxu0 %v11776_v1 }
 0x49c   :  { %9545 = vmatprep.subr.bf16.mxu1 %v11779_v3 }
 0x49e   :  { %9374 = vmatpush1.bf16.msra.mxu0 %v11774_v63 }
 0x49f   :  { %9546 = vmatpush1.bf16.msra.mxu1 %v11777_v27  ;;  %9375 = vmatprep.subr.bf16.mxu0 %v11782_v30 }
 0x4a0   :  { %9547 = vmatprep.subr.bf16.mxu1 %v11785_v49 }
 0x4a2   :  { %9376 = vmatpush1.bf16.msra.mxu0 %v11780_v58 }
 0x4a3   :  { %9548 = vmatpush1.bf16.msra.mxu1 %v11783_v52  ;;  %9377 = vmatprep.subr.bf16.mxu0 %v11788_v55 }
 0x4a4   :  { %9549 = vmatprep.subr.bf16.mxu1 %v11791_v8 }
 0x4a6   :  { %9378 = vmatpush1.bf16.msra.mxu0 %v11786_v56 }
 0x4a7   :  { %9550 = vmatpush1.bf16.msra.mxu1 %v11789_v35  ;;  %9379 = vmatprep.subr.bf16.mxu0 %v11794_v57 }
 0x4a8   :  { %9551 = vmatprep.subr.bf16.mxu1 %v11797_v59 }
 0x4aa   :  { %9380 = vmatpush1.bf16.msra.mxu0 %v11792_v60 }
 0x4ab   :  { %9552 = vmatpush1.bf16.msra.mxu1 %v11795_v61  ;;  %9381 = vmatprep.subr.bf16.mxu0 %v11800_v62 }
 0x4ac   :  { %9553 = vmatprep.subr.bf16.mxu1 %v11803_v0 }
 0x4ae   :  { %9382 = vmatpush1.bf16.msra.mxu0 %v11798_v6 }
 0x4af   :  { %9554 = vmatpush1.bf16.msra.mxu1 %v11801_v18  ;;  %9383 = vmatprep.subr.bf16.mxu0 %v11806_v32  ;;  %v11834_v18 = vld [vmem:[%s16230_s3 + $0x600] ss:$16 sps:$4 sm:$0xff]   ;;  %v11837_v32 = vld [vmem:[%s16230_s3 + $0x608] ss:$16 sps:$4 sm:$0xff]  }
 0x4b0   :  { %9555 = vmatprep.subr.bf16.mxu1 %v11809_v45 }
 0x4b2   :  { %9384 = vmatpush1.bf16.msra.mxu0 %v11804_v46  ;;  %v11842_v46 = vld [vmem:[%s16230_s3 + $0x624] ss:$16 sps:$4 sm:$0xff]  }
 0x4b3   :  { %9556 = vmatpush1.bf16.msra.mxu1 %v11807_v7  ;;  %9385 = vmatprep.subr.bf16.mxu0 %v11812_v9  ;;  %v11845_v7 = vld [vmem:[%s16230_s3 + $0x62c] ss:$16 sps:$4 sm:$0xff]   ;;  %v11840_v9 = vld [vmem:[%s16230_s3 + $0x620] ss:$16 sps:$4 sm:$0xff]  }
 0x4b4   :  { %9557 = vmatprep.subr.bf16.mxu1 %v11815_v31  ;;  %v11843_v31 = vld [vmem:[%s16230_s3 + $0x628] ss:$16 sps:$4 sm:$0xff]  }
 0x4b6   :  { %9386 = vmatpush1.bf16.msra.mxu0 %v11810_v39  ;;  %v11848_v39 = vld [vmem:[%s16230_s3 + $0x644] ss:$16 sps:$4 sm:$0xff]  }
 0x4b7   :  { %9558 = vmatpush1.bf16.msra.mxu1 %v11813_v43  ;;  %9387 = vmatprep.subr.bf16.mxu0 %v11818_v11  ;;  %v11851_v43 = vld [vmem:[%s16230_s3 + $0x64c] ss:$16 sps:$4 sm:$0xff]   ;;  %v11846_v11 = vld [vmem:[%s16230_s3 + $0x640] ss:$16 sps:$4 sm:$0xff]  }
 0x4b8   :  { %9559 = vmatprep.subr.bf16.mxu1 %v11821_v20  ;;  %v11854_v20 = vld [vmem:[%s16230_s3 + $0x664] ss:$16 sps:$4 sm:$0xff]  }
 0x4ba   :  { %9388 = vmatpush1.bf16.msra.mxu0 %v11816_v12  ;;  %v11849_v12 = vld [vmem:[%s16230_s3 + $0x648] ss:$16 sps:$4 sm:$0xff]  }
 0x4bb   :  { %9560 = vmatpush1.bf16.msra.mxu1 %v11819_v13  ;;  %9389 = vmatprep.subr.bf16.mxu0 %v11824_v14  ;;  %v11857_v13 = vld [vmem:[%s16230_s3 + $0x66c] ss:$16 sps:$4 sm:$0xff]   ;;  %v11852_v14 = vld [vmem:[%s16230_s3 + $0x660] ss:$16 sps:$4 sm:$0xff]  }
 0x4bc   :  { %9561 = vmatprep.subr.bf16.mxu1 %v11827_v29  ;;  %v11855_v29 = vld [vmem:[%s16230_s3 + $0x668] ss:$16 sps:$4 sm:$0xff]  }
 0x4be   :  { %9390 = vmatpush1.bf16.msra.mxu0 %v11822_v16  ;;  %v11860_v16 = vld [vmem:[%s16230_s3 + $0x684] ss:$16 sps:$4 sm:$0xff]  }
 0x4bf   :  { %9562 = vmatpush1.bf16.msra.mxu1 %v11825_v48  ;;  %9391 = vmatprep.subr.bf16.mxu0 %v11830_v15  ;;  %v11863_v48 = vld [vmem:[%s16230_s3 + $0x68c] ss:$16 sps:$4 sm:$0xff]   ;;  %v11858_v15 = vld [vmem:[%s16230_s3 + $0x680] ss:$16 sps:$4 sm:$0xff]  }
 0x4c0   :  { %9563 = vmatprep.subr.bf16.mxu1 %v11833_v38  ;;  %v11861_v38 = vld [vmem:[%s16230_s3 + $0x688] ss:$16 sps:$4 sm:$0xff]  }
 0x4c2   :  { %9392 = vmatpush1.bf16.msra.mxu0 %v11828_v44  ;;  %v11866_v44 = vld [vmem:[%s16230_s3 + $0x6a4] ss:$16 sps:$4 sm:$0xff]  }
 0x4c3   :  { %9564 = vmatpush1.bf16.msra.mxu1 %v11831_v19  ;;  %9404 = vmatprep.subr.bf16.mxu0 %v11836_v53  ;;  %v11869_v19 = vld [vmem:[%s16230_s3 + $0x6ac] ss:$16 sps:$4 sm:$0xff]   ;;  %v11864_v53 = vld [vmem:[%s16230_s3 + $0x6a0] ss:$16 sps:$4 sm:$0xff]  }
 0x4c4   :  { %9576 = vmatprep.subr.bf16.mxu1 %v11839_v50  ;;  %v11867_v50 = vld [vmem:[%s16230_s3 + $0x6a8] ss:$16 sps:$4 sm:$0xff]  }
 0x4d8   :  { %v7340_v28 = vpop.f32.mrb[4].mxu0  ;;  %v7684_v17 = vpop.f32.mrb[4].mxu1 }
 0x4d9   :  { %v11394_v42 = vadd.f32 %v7340_v28, %v1096_v25  ;;  %v7342_v33 = vpop.f32.mrb[5].mxu0  ;;  %v11398_v4 = vadd.f32 %v7684_v17, %v1104_v23  ;;  %v7686_v40 = vpop.f32.mrb[5].mxu1  ;;  %v11887_v28 = vld [vmem:[%s16230_s3 + $0x70c] ss:$16 sps:$4 sm:$0xff]   ;;  %v11885_v17 = vld [vmem:[%s16230_s3 + $0x708] ss:$16 sps:$4 sm:$0xff]  }
 0x4da   :  { %v11395_v36 = vadd.f32 %v7342_v33, %v1100_v26  ;;  %v7344_v10 = vpop.f32.mrb[6].mxu0  ;;  %v11399_v1 = vadd.f32 %v7686_v40, %v1108_v2  ;;  %v7688_v63 = vpop.f32.mrb[6].mxu1  ;;  %v11890_v33 = vld [vmem:[%s16230_s3 + $0x724] ss:$16 sps:$4 sm:$0xff]   ;;  %v11891_v40 = vld [vmem:[%s16230_s3 + $0x728] ss:$16 sps:$4 sm:$0xff]  }
 0x4db   :  { %v11396_v3 = vadd.f32 %v7344_v10, %v1096_v25  ;;  %v7346_v27 = vpop.f32.mrb[7].mxu0  ;;  %v11400_v30 = vadd.f32 %v7688_v63, %v1104_v23  ;;  %v7690_v58 = vpop.f32.mrb[7].mxu1  ;;  %v7697_v52 = vmax.f32 %v11394_v42, 0.0  ;;  %v7699_v56 = vmax.f32 %v11398_v4, 0.0  ;;  %v11881_v25 = vld [vmem:[%s16230_s3 + $0x6ec] ss:$16 sps:$4 sm:$0xff]  }
 0x4dc   :  { %v11397_v49 = vadd.f32 %v7346_v27, %v1100_v26  ;;  %v11401_v8 = vadd.f32 %v7690_v58, %v1108_v2  ;;  %v7698_v35 = vmax.f32 %v11395_v36, 0.0  ;;  %v7700_v60 = vmax.f32 %v11399_v1, 0.0  ;;  %v11876_v23 = vld [vmem:[%s16230_s3 + $0x6e0] ss:$16 sps:$4 sm:$0xff]   ;;  %v11879_v26 = vld [vmem:[%s16230_s3 + $0x6e8] ss:$16 sps:$4 sm:$0xff]  }
 0x4dd   :  { %v7705_v55 = vmax.f32 %v11396_v3, 0.0  ;;  %v7707_v57 = vmax.f32 %v11400_v30, 0.0  ;;  %v11884_v2 = vld [vmem:[%s16230_s3 + $0x704] ss:$16 sps:$4 sm:$0xff]   ;;  %v11882_v42 = vld [vmem:[%s16230_s3 + $0x700] ss:$16 sps:$4 sm:$0xff]  }
 0x4de   :  { %v7706_v59 = vmax.f32 %v11397_v49, 0.0  ;;  %v7708_v62 = vmax.f32 %v11401_v8, 0.0  ;;  %v11893_v4 = vld [vmem:[%s16230_s3 + $0x72c] ss:$16 sps:$4 sm:$0xff]   ;;  %v11888_v36 = vld [vmem:[%s16230_s3 + $0x720] ss:$16 sps:$4 sm:$0xff]  }
 0x4df   :  { %v7713_v61 = vpack.c.bf16 %v7705_v55, %v7697_v52  ;;  %v15915_v0 = vpack.c.bf16 %v7707_v57, %v7699_v56  ;;  %v11896_v10 = vld [vmem:[%s16230_s3 + $0x744] ss:$16 sps:$4 sm:$0xff]   ;;  %v11899_v1 = vld [vmem:[%s16230_s3 + $0x74c] ss:$16 sps:$4 sm:$0xff]   ;;  %v11894_v3 = vld [vmem:[%s16230_s3 + $0x740] ss:$16 sps:$4 sm:$0xff]  }
 0x4e0   :  { %v7714_v6 = vpack.c.bf16 %v7706_v59, %v7698_v35  ;;  %v7716_v45 = vpack.c.bf16 %v7708_v62, %v7700_v60  ;;  %v11897_v63 = vld [vmem:[%s16230_s3 + $0x748] ss:$16 sps:$4 sm:$0xff]   ;;  %v11902_v27 = vld [vmem:[%s16230_s3 + $0x764] ss:$16 sps:$4 sm:$0xff]   ;;  %v11905_v30 = vld [vmem:[%s16230_s3 + $0x76c] ss:$16 sps:$4 sm:$0xff]  }
 0x4e1   :  { %v11900_v49 = vld [vmem:[%s16230_s3 + $0x760] ss:$16 sps:$4 sm:$0xff]   ;;  %v11903_v58 = vld [vmem:[%s16230_s3 + $0x768] ss:$16 sps:$4 sm:$0xff]   ;;  %v11908_v52 = vld [vmem:[%s16230_s3 + $0x784] ss:$16 sps:$4 sm:$0xff]  }
 0x4e2   :  { %9393 = vmatprep.mubr.bf16.mxu0 %v7714_v6  ;;  %9565 = vmatprep.mubr.bf16.mxu1 %v7714_v6  ;;  %v11911_v55 = vld [vmem:[%s16230_s3 + $0x78c] ss:$16 sps:$4 sm:$0xff]   ;;  %v11906_v8 = vld [vmem:[%s16230_s3 + $0x780] ss:$16 sps:$4 sm:$0xff]   ;;  %v11909_v56 = vld [vmem:[%s16230_s3 + $0x788] ss:$16 sps:$4 sm:$0xff]  }
 0x4e3   :  { %9394 = vmatmul.mubr.bf16.vlgmr.msra.gmra.mrb[8].mxu0 %v7713_v61  ;;  %9566 = vmatmul.mubr.bf16.vlgmr.msra.gmra.mrb[8].mxu1 %v7713_v61  ;;  %v11914_v35 = vld [vmem:[%s16230_s3 + $0x7a4] ss:$16 sps:$4 sm:$0xff]   ;;  %v11917_v57 = vld [vmem:[%s16230_s3 + $0x7ac] ss:$16 sps:$4 sm:$0xff]   ;;  %v11912_v59 = vld [vmem:[%s16230_s3 + $0x7a0] ss:$16 sps:$4 sm:$0xff]  }
 0x4e4   :  { %9405 = vmatpush1.bf16.msra.mxu0 %v11834_v18  ;;  %9577 = vmatpush1.bf16.msra.mxu1 %v11837_v32  ;;  %v11915_v60 = vld [vmem:[%s16230_s3 + $0x7a8] ss:$16 sps:$4 sm:$0xff]   ;;  %v11920_v61 = vld [vmem:[%s16230_s3 + $0x7c4] ss:$16 sps:$4 sm:$0xff]   ;;  %v11923_v62 = vld [vmem:[%s16230_s3 + $0x7cc] ss:$16 sps:$4 sm:$0xff]  }
 0x4e5   :  { %9436 = vmatprep.mubr.bf16.mxu0 %v7716_v45  ;;  %9608 = vmatprep.mubr.bf16.mxu1 %v7716_v45  ;;  %v11918_v6 = vld [vmem:[%s16230_s3 + $0x7c0] ss:$16 sps:$4 sm:$0xff]   ;;  %v11921_v18 = vld [vmem:[%s16230_s3 + $0x7c8] ss:$16 sps:$4 sm:$0xff]   ;;  %v11926_v32 = vld [vmem:[%s16230_s3 + $0x7e4] ss:$16 sps:$4 sm:$0xff]  }
 0x4e6   :  { %9406 = vmatprep.subr.bf16.mxu0 %v11842_v46  ;;  %9578 = vmatprep.subr.bf16.mxu1 %v11845_v7  ;;  %v11929_v45 = vld [vmem:[%s16230_s3 + $0x7ec] ss:$16 sps:$4 sm:$0xff]   ;;  %v11924_v46 = vld [vmem:[%s16230_s3 + $0x7e0] ss:$16 sps:$4 sm:$0xff]   ;;  %v11927_v7 = vld [vmem:[%s16230_s3 + $0x7e8] ss:$16 sps:$4 sm:$0xff]  }
 0x4e8   :  { %9407 = vmatpush1.bf16.msra.mxu0 %v11840_v9  ;;  %9579 = vmatpush1.bf16.msra.mxu1 %v11843_v31  ;;  %v11930_v9 = vld [vmem:[%s16231_s5 + $0x40] sm:$0xff]  }
 0x4e9   :  { %9408 = vmatprep.subr.bf16.mxu0 %v11848_v39  ;;  %9580 = vmatprep.subr.bf16.mxu1 %v11851_v43  ;;  %v11931_v31 = vld [vmem:[%s16231_s5 + $0xc0] sm:$0xff]  }
 0x4ea   :  { %v11932_v39 = vld [vmem:[%s16231_s5] sm:$0xff]  }
 0x4eb   :  { %v11933_v43 = vld [vmem:[%s16231_s5 + $0x80] sm:$0xff]  }
 0x4ec   :  { %9409 = vmatpush1.bf16.msra.mxu0 %v11846_v11  ;;  %9581 = vmatpush1.bf16.msra.mxu1 %v11849_v12  ;;  %v11934_v11 = vld [vmem:[%s16231_s5 + $0x48] sm:$0xff]  }
 0x4ed   :  { %9410 = vmatprep.subr.bf16.mxu0 %v11854_v20  ;;  %9582 = vmatprep.subr.bf16.mxu1 %v11857_v13  ;;  %v11935_v12 = vld [vmem:[%s16231_s5 + $0xc8] sm:$0xff]  }
 0x4ee   :  { %v11936_v20 = vld [vmem:[%s16231_s5 + $0x8] sm:$0xff]  }
 0x4ef   :  { %v11937_v13 = vld [vmem:[%s16231_s5 + $0x88] sm:$0xff]  }
 0x4f0   :  { %9411 = vmatpush1.bf16.msra.mxu0 %v11852_v14  ;;  %9583 = vmatpush1.bf16.msra.mxu1 %v11855_v29  ;;  %v11938_v14 = vld [vmem:[%s16231_s5 + $0x50] sm:$0xff]  }
 0x4f1   :  { %9412 = vmatprep.subr.bf16.mxu0 %v11860_v16  ;;  %9584 = vmatprep.subr.bf16.mxu1 %v11863_v48  ;;  %v11940_v29 = vld [vmem:[%s16231_s5 + $0x10] sm:$0xff]   ;;  %v11942_v48 = vld [vmem:[%s16231_s5 + $0x58] sm:$0xff]  }
 0x4f2   :  { %v11941_v16 = vld [vmem:[%s16231_s5 + $0x90] sm:$0xff]  }
 0x4f4   :  { %9413 = vmatpush1.bf16.msra.mxu0 %v11858_v15  ;;  %9585 = vmatpush1.bf16.msra.mxu1 %v11861_v38  ;;  %v11943_v15 = vld [vmem:[%s16231_s5 + $0xd8] sm:$0xff]  }
 0x4f5   :  { %9414 = vmatprep.subr.bf16.mxu0 %v11866_v44  ;;  %9586 = vmatprep.subr.bf16.mxu1 %v11869_v19  ;;  %v11944_v38 = vld [vmem:[%s16231_s5 + $0x18] sm:$0xff]   ;;  %v11946_v19 = vld [vmem:[%s16231_s5 + $0x60] sm:$0xff]  }
 0x4f6   :  { %v11945_v44 = vld [vmem:[%s16231_s5 + $0x98] sm:$0xff]  }
 0x4f8   :  { %9415 = vmatpush1.bf16.msra.mxu0 %v11864_v53  ;;  %9587 = vmatpush1.bf16.msra.mxu1 %v11867_v50  ;;  %v11947_v53 = vld [vmem:[%s16231_s5 + $0xe0] sm:$0xff]  }
 0x4f9   :  { %9416 = vmatprep.subr.bf16.mxu0 %v11872_v51  ;;  %9588 = vmatprep.subr.bf16.mxu1 %v11875_v54  ;;  %v11948_v50 = vld [vmem:[%s16231_s5 + $0x20] sm:$0xff]   ;;  %v11950_v54 = vld [vmem:[%s16231_s5 + $0x68] sm:$0xff]  }
 0x4fa   :  { %v11949_v51 = vld [vmem:[%s16231_s5 + $0xa0] sm:$0xff]  }
 0x4fc   :  { %9417 = vmatpush1.bf16.msra.mxu0 %v11870_v47  ;;  %9589 = vmatpush1.bf16.msra.mxu1 %v11873_v22  ;;  %v11951_v47 = vld [vmem:[%s16231_s5 + $0xe8] sm:$0xff]  }
 0x4fd   :  { %9418 = vmatprep.subr.bf16.mxu0 %v11878_v24  ;;  %9590 = vmatprep.subr.bf16.mxu1 %v11881_v25  ;;  %v11952_v22 = vld [vmem:[%s16231_s5 + $0x28] sm:$0xff]   ;;  %v11954_v25 = vld [vmem:[%s16231_s5 + $0x70] sm:$0xff]  }
 0x4fe   :  { %v11953_v24 = vld [vmem:[%s16231_s5 + $0xa8] sm:$0xff]  }
 0x500   :  { %9419 = vmatpush1.bf16.msra.mxu0 %v11876_v23  ;;  %9591 = vmatpush1.bf16.msra.mxu1 %v11879_v26  ;;  %v11955_v23 = vld [vmem:[%s16231_s5 + $0xf0] sm:$0xff]  }
 0x501   :  { %9420 = vmatprep.subr.bf16.mxu0 %v11884_v2  ;;  %9592 = vmatprep.subr.bf16.mxu1 %v11887_v28  ;;  %v11956_v26 = vld [vmem:[%s16231_s5 + $0x30] sm:$0xff]   ;;  %v11958_v28 = vld [vmem:[%s16231_s5 + $0x78] sm:$0xff]  }
 0x502   :  { %v11957_v2 = vld [vmem:[%s16231_s5 + $0xb0] sm:$0xff]  }
 0x504   :  { %9421 = vmatpush1.bf16.msra.mxu0 %v11882_v42  ;;  %9593 = vmatpush1.bf16.msra.mxu1 %v11885_v17  ;;  %v11959_v42 = vld [vmem:[%s16231_s5 + $0xf8] sm:$0xff]  }
 0x505   :  { %9422 = vmatprep.subr.bf16.mxu0 %v11890_v33  ;;  %9594 = vmatprep.subr.bf16.mxu1 %v11893_v4  ;;  %v11960_v17 = vld [vmem:[%s16231_s5 + $0x38] sm:$0xff]   ;;  %v7973_v4 = vld [vmem:[%s16232_s4] sm:$0xf] }
 0x506   :  { %v11961_v33 = vld [vmem:[%s16231_s5 + $0xb8] sm:$0xff]  }
 0x508   :  { %9423 = vmatpush1.bf16.msra.mxu0 %v11888_v36  ;;  %9595 = vmatpush1.bf16.msra.mxu1 %v11891_v40  ;;  %v7978_v36 = vrot.slane %v7973_v4, %v1079_v41  ;;  %v7986_v40 = vrot.slane %v7973_v4, %v1087_v5 }
 0x509   :  { %9424 = vmatprep.subr.bf16.mxu0 %v11896_v10  ;;  %9596 = vmatprep.subr.bf16.mxu1 %v11899_v1  ;;  %v7982_v10 = vrot.slane %v7973_v4, %v1083_v34  ;;  %v7990_v1 = vrot.slane %v7973_v4, %v1091_v37 }
 0x50c   :  { %9425 = vmatpush1.bf16.msra.mxu0 %v11894_v3  ;;  %9597 = vmatpush1.bf16.msra.mxu1 %v11897_v63 }
 0x50d   :  { %9426 = vmatprep.subr.bf16.mxu0 %v11902_v27  ;;  %9598 = vmatprep.subr.bf16.mxu1 %v11905_v30 }
 0x510   :  { %9427 = vmatpush1.bf16.msra.mxu0 %v11900_v49  ;;  %9599 = vmatpush1.bf16.msra.mxu1 %v11903_v58 }
 0x511   :  { %9428 = vmatprep.subr.bf16.mxu0 %v11908_v52  ;;  %9600 = vmatprep.subr.bf16.mxu1 %v11911_v55 }
 0x514   :  { %9429 = vmatpush1.bf16.msra.mxu0 %v11906_v8  ;;  %9601 = vmatpush1.bf16.msra.mxu1 %v11909_v56 }
 0x515   :  { %9430 = vmatprep.subr.bf16.mxu0 %v11914_v35  ;;  %9602 = vmatprep.subr.bf16.mxu1 %v11917_v57 }
 0x518   :  { %9431 = vmatpush1.bf16.msra.mxu0 %v11912_v59  ;;  %9603 = vmatpush1.bf16.msra.mxu1 %v11915_v60 }
 0x519   :  { %9432 = vmatprep.subr.bf16.mxu0 %v11920_v61  ;;  %9604 = vmatprep.subr.bf16.mxu1 %v11923_v62 }
 0x51c   :  { %9433 = vmatpush1.bf16.msra.mxu0 %v11918_v6  ;;  %9605 = vmatpush1.bf16.msra.mxu1 %v11921_v18 }
 0x51d   :  { %9434 = vmatprep.subr.bf16.mxu0 %v11926_v32  ;;  %9606 = vmatprep.subr.bf16.mxu1 %v11929_v45 }
 0x520   :  { %9435 = vmatpush1.bf16.msra.mxu0 %v11924_v46  ;;  %9607 = vmatpush1.bf16.msra.mxu1 %v11927_v7 }
 0x521   :  { %11342 = vmatprep.subr.bf16.mxu0 %v11930_v9  ;;  %11364 = vmatprep.subr.bf16.mxu1 %v11931_v31  ;;  %v14_v31 = vstv %s16233_s8 }
 0x522   :  { %15 = vst [vmem:[#allocation2] sm:$0x1] %v14_v31 }
 0x523   :  { %9437 = vmatmul.mubr.bf16.vlgmr.msra.gmra.mrb[8].mxu0 %v15915_v0  ;;  %9609 = vmatmul.mubr.bf16.vlgmr.msra.gmra.mrb[8].mxu1 %v15915_v0  ;;  %v11939_v0 = vld [vmem:[%s16231_s5 + $0xd0] sm:$0xff]  }
 0x524   :  { %11343 = vmatpush3.bf16.msra.mxu0 %v11932_v39  ;;  %11365 = vmatpush3.bf16.msra.mxu1 %v11933_v43 }
 0x525   :  { %11344 = vmatprep.subr.bf16.mxu0 %v11934_v11  ;;  %11366 = vmatprep.subr.bf16.mxu1 %v11935_v12  ;;  %v11307_v11 = vld [vmem:[%s16234_s6] ss:$0 sm:$0xff] }
 0x528   :  { %11345 = vmatpush3.bf16.msra.mxu0 %v11936_v20  ;;  %11367 = vmatpush3.bf16.msra.mxu1 %v11937_v13 }
 0x529   :  { %11346 = vmatprep.subr.bf16.mxu0 %v11938_v14  ;;  %11368 = vmatprep.subr.bf16.mxu1 %v11939_v0 }
 0x52c   :  { %11347 = vmatpush3.bf16.msra.mxu0 %v11940_v29  ;;  %11369 = vmatpush3.bf16.msra.mxu1 %v11941_v16 }
 0x52d   :  { %11348 = vmatprep.subr.bf16.mxu0 %v11942_v48  ;;  %11370 = vmatprep.subr.bf16.mxu1 %v11943_v15 }
 0x530   :  { %11349 = vmatpush3.bf16.msra.mxu0 %v11944_v38  ;;  %11371 = vmatpush3.bf16.msra.mxu1 %v11945_v44 }
 0x531   :  { %11350 = vmatprep.subr.bf16.mxu0 %v11946_v19  ;;  %11372 = vmatprep.subr.bf16.mxu1 %v11947_v53 }
 0x534   :  { %11351 = vmatpush3.bf16.msra.mxu0 %v11948_v50  ;;  %11373 = vmatpush3.bf16.msra.mxu1 %v11949_v51  ;;  %v11340_v50 = vld [vmem:[%s16235_s7] ss:$0 sm:$0xff] }
 0x535   :  { %11352 = vmatprep.subr.bf16.mxu0 %v11950_v54  ;;  %11374 = vmatprep.subr.bf16.mxu1 %v11951_v47 }
 0x538   :  { %11353 = vmatpush3.bf16.msra.mxu0 %v11952_v22  ;;  %11375 = vmatpush3.bf16.msra.mxu1 %v11953_v24 }
 0x539   :  { %11354 = vmatprep.subr.bf16.mxu0 %v11954_v25  ;;  %11376 = vmatprep.subr.bf16.mxu1 %v11955_v23  ;;  %v11341_v25 = vld [vmem:[#allocation2] ss:$0 sm:$0xff] }
 0x53c   :  { %11355 = vmatpush3.bf16.msra.mxu0 %v11956_v26  ;;  %11377 = vmatpush3.bf16.msra.mxu1 %v11957_v2 }
 0x53d   :  { %11356 = vmatprep.subr.bf16.mxu0 %v11958_v28  ;;  %11378 = vmatprep.subr.bf16.mxu1 %v11959_v42 }
 0x540   :  { %11357 = vmatpush3.bf16.msra.mxu0 %v11960_v17  ;;  %11379 = vmatpush3.bf16.msra.mxu1 %v11961_v33 }
 0x5f6   :  { %v9438_v3 = vpop.f32.mrb[8].mxu0  ;;  %v9610_v63 = vpop.f32.mrb[8].mxu1 }
 0x5f7   :  { %v11402_v27 = vadd.f32 %v9438_v3, %v7978_v36  ;;  %v11406_v30 = vadd.f32 %v9610_v63, %v7986_v40  ;;  %v9440_v49 = vpop.f32.mrb[9].mxu0  ;;  %v9612_v58 = vpop.f32.mrb[9].mxu1 }
 0x5f8   :  { %v11403_v52 = vadd.f32 %v9440_v49, %v7982_v10  ;;  %v11407_v55 = vadd.f32 %v9612_v58, %v7990_v1  ;;  %v9442_v8 = vpop.f32.mrb[10].mxu0  ;;  %v9614_v56 = vpop.f32.mrb[10].mxu1 }
 0x5f9   :  { %v11404_v41 = vadd.f32 %v9442_v8, %v7978_v36  ;;  %v11408_v35 = vadd.f32 %v9614_v56, %v7986_v40  ;;  %v9444_v57 = vpop.f32.mrb[11].mxu0  ;;  %v9616_v5 = vpop.f32.mrb[11].mxu1  ;;  %v9619_v34 = vmax.f32 %v11402_v27, 0.0  ;;  %v9621_v61 = vmax.f32 %v11406_v30, 0.0 }
 0x5fa   :  { %v11405_v59 = vadd.f32 %v9444_v57, %v7982_v10  ;;  %v11409_v60 = vadd.f32 %v9616_v5, %v7990_v1  ;;  %v9620_v62 = vmax.f32 %v11403_v52, 0.0  ;;  %v9622_v6 = vmax.f32 %v11407_v55, 0.0 }
 0x5fb   :  { %v9623_v21 = vmax.f32 %v11404_v41, 0.0  ;;  %v9625_v37 = vmax.f32 %v11408_v35, 0.0 }
 0x5fc   :  { %v9624_v18 = vmax.f32 %v11405_v59, 0.0  ;;  %v9626_v32 = vmax.f32 %v11409_v60, 0.0 }
 0x5fd   :  { %v9627_v45 = vpack.c.bf16 %v9623_v21, %v9619_v34  ;;  %v9629_v46 = vpack.c.bf16 %v9625_v37, %v9621_v61 }
 0x5fe   :  { %v9628_v7 = vpack.c.bf16 %v9624_v18, %v9620_v62  ;;  %v9630_v9 = vpack.c.bf16 %v9626_v32, %v9622_v6 }
 0x600   :  { %9926 = vmatprep.mubr.bf16.mxu0 %v9628_v7  ;;  %9967 = vmatprep.mubr.bf16.mxu1 %v9630_v9 }
 0x601   :  { %9927 = vmatmul.mubr.bf16.vlgmr.msra.gmra.mrb[12].mxu0 %v9627_v45  ;;  %9968 = vmatmul.mubr.bf16.vlgmr.msra.gmra.mrb[12].mxu1 %v9629_v46 }
 0x6d4   :  { %v11358_v39 = vpop.f32.mrb[12].mxu0  ;;  %v11380_v43 = vpop.f32.mrb[12].mxu1 }
 0x6d5   :  { %v11359_v12 = vpop.f32.mrb[13].mxu0  ;;  %v11381_v20 = vpop.f32.mrb[13].mxu1 }
 0x6d6   :  { %v11360_v13 = vadd.f32 %v11359_v12, %v11358_v39  ;;  %v11382_v14 = vadd.f32 %v11381_v20, %v11380_v43  ;;  %v11361_v0 = vpop.f32.mrb[14].mxu0  ;;  %v11383_v29 = vpop.f32.mrb[14].mxu1 }
 0x6d7   :  { %v11362_v16 = vpop.f32.mrb[15].mxu0  ;;  %v11384_v48 = vpop.f32.mrb[15].mxu1 }
 0x6d8   :  { %v9929_v15 = vadd.f32 %v11360_v13, %v11307_v11  ;;  %v11363_v38 = vadd.f32 %v11362_v16, %v11361_v0  ;;  %v11385_v44 = vadd.f32 %v11384_v48, %v11383_v29 }
 0x6da   :  { %v9932_v19 = vadd.f32 %v11363_v38, %v11307_v11  ;;  %v9970_v53 = vadd.f32 %v11382_v14, %v9929_v15 }
 0x6dc   :  { %v9973_v51 = vadd.f32 %v11385_v44, %v9932_v19  ;;  %v9976_v54 = vmax.f32 %v9970_v53, 0.0 }
 0x6de   :  { %v9977_v47 = vmax.f32 %v9973_v51, 0.0  ;;  %v9985_v22 = vmul.f32 %v11340_v50, %v9976_v54 }
 0x6e0   :  { %9987 = vadd.xlane.f32.xlu0 %v9985_v22  ;;  %v9986_v24 = vmul.f32 %v11340_v50, %v9977_v47 }
 0x6e4   :  { %9989 = vadd.xlane.f32.xlu0 %v9986_v24 }
 0x76d   :  { %v9988_v23 = vpop.xlane.xlu0 %9987 }
 0x76e   :  { %v9998_v26 = vadd.f32 %v11341_v25, %v9988_v23 }
 0x770   :  { %v10000_v2 = vmax.f32 %v9998_v26, 0.0 }
 0x771   :  { %v9990_v28 = vpop.xlane.xlu0 %9989 }
 0x772   :  { %v10002_v42 = vmin.f32 %v10000_v2, 100.0  ;;  %v9999_v17 = vadd.f32 %v11341_v25, %v9990_v28 }
 0x774   :  { %10005 = vst.msk [vmem:[%s16236_s9] sm:$0xff] %vm10004_vm0, %v10002_v42  ;;  %v10001_v33 = vmax.f32 %v9999_v17, 0.0 }
 0x776   :  { %v10003_v4 = vmin.f32 %v10001_v33, 100.0 }
 0x778   :  { %10006 = vst.msk [vmem:[%s16236_s9 + $0x8] sm:$0xff] %vm10004_vm0, %v10003_v4 }

</bundles_post_ra>
